<compile_context>
chip_gen: v6e
topology: v6e:2x2x1
jax: 0.10.0
libtpu: 0.0.40
codegen_flags: <defaults>
</compile_context>

<pallas_src>
import math

import jax
import jax.numpy as jnp
from jax.experimental import pallas as pl

# ----------------------------- model config ---------------------------------
BATCH = 2
SPEECH_H = 8          # speech sequence length (params.speech_h)
SPEECH_W = 24         # raw speech feature width (params.speech_w)
EMBED_DIM = 32        # params.embed_dim == params.hidden_size
HIDDEN = 32
NUM_HEADS = 4
MAX_SEQ = 8           # params.max_sequence_length
N_CLASSES = 3
VOCAB = 100
BERT_FFN = 64


# ------------------------- in-kernel helper functions -----------------------
def _f32_dot(a, b):
    return jnp.dot(a, b, preferred_element_type=jnp.float32)


def _f32_einsum(expr, a, b):
    return jnp.einsum(expr, a, b, preferred_element_type=jnp.float32)


def _softmax_last(z):
    z = z - jnp.max(z, axis=-1, keepdims=True)
    e = jnp.exp(z)
    return e / jnp.sum(e, axis=-1, keepdims=True)


def _layernorm(x, g, b, eps):
    mu = jnp.mean(x, axis=-1, keepdims=True)
    xc = x - mu
    var = jnp.mean(xc * xc, axis=-1, keepdims=True)
    return xc * jax.lax.rsqrt(var + eps) * g + b


def _mha(x, wqkv, bqkv, wo, bo, key_bias=None, need_probs=False):
    """Self-attention on a VMEM-resident (B, S, E) value.

    One merged-QKV matmul, static per-head lane slices, a key bias that is
    broadcast ONCE (not per head), f32 MXU accumulation, and optionally the
    head-averaged probabilities (PyTorch nn.MultiheadAttention convention).
    """
    B, S, E = x.shape
    dh = E // NUM_HEADS
    scale = 1.0 / math.sqrt(dh)

    qkv = (_f32_dot(x.reshape(B * S, E), wqkv) + bqkv).reshape(B, S, 3 * E)
    q = qkv[:, :, 0:E]
    k = qkv[:, :, E:2 * E]
    v = qkv[:, :, 2 * E:3 * E]

    ctx_heads = []
    probs_sum = None
    for h in range(NUM_HEADS):
        sl = slice(h * dh, (h + 1) * dh)
        s = _f32_einsum('bqd,bkd->bqk', q[:, :, sl], k[:, :, sl]) * scale
        if key_bias is not None:
            s = s + key_bias                 # bias already (B, S, S); plain add
        p = _softmax_last(s)
        if need_probs:
            probs_sum = p if probs_sum is None else probs_sum + p
        ctx_heads.append(_f32_einsum('bqk,bkd->bqd', p, v[:, :, sl]))
    ctx = jnp.concatenate(ctx_heads, axis=-1)
    out = (_f32_dot(ctx.reshape(B * S, E), wo) + bo).reshape(B, S, E)
    probs = None if probs_sum is None else probs_sum * (1.0 / NUM_HEADS)
    return out, probs


# --------------------------- the single fused kernel -------------------------
def _fused_forward_kernel(
    # runtime activations
    speechs_ref, ids_ref, mask_ref,
    # BERT embedding tables + embedding LayerNorm
    word_emb_ref, pos_emb_ref, type_row_ref, emb_ln_g_ref, emb_ln_b_ref,
    # speech embedding Linear
    se_w_ref, se_b_ref,
    # folded eval-BatchNorm scale/shift (speech_h / max_seq channel axes)
    sp_bn_scale_ref, sp_bn_shift_ref, tx_bn_scale_ref, tx_bn_shift_ref,
    # speech self-MHA (merged QKV) + shared LayerNorm
    sp_wqkv_ref, sp_bqkv_ref, sp_wo_ref, sp_bo_ref,
    ln_g_ref, ln_b_ref,
    # synthetic 1-layer BERT encoder
    b_wqkv_ref, b_bqkv_ref, b_wo_ref, b_bo_ref,
    b_ln1_g_ref, b_ln1_b_ref, b_win_ref, b_bin_ref, b_wout_ref, b_bout_ref,
    b_ln2_g_ref, b_ln2_b_ref,
    # shared combined_linear
    cl_w1_ref, cl_b1_ref, cl_w2_ref, cl_b2_ref,
    # composition MHAs (speech / text)
    cs_wqkv_ref, cs_bqkv_ref, cs_wo_ref, cs_bo_ref,
    ct_wqkv_ref, ct_bqkv_ref, ct_wo_ref, ct_bo_ref,
    # shared HAN attention pooling
    han_w1_ref, han_b1_ref, han_w2_ref, han_b2_ref,
    # classifier head (fc_w1 pre-split to avoid a lane concat)
    fc_w1a_ref, fc_w1b_ref, fc_b1_ref, fc_w2_ref, fc_b2_ref,
    # outputs
    prob_ref, sta_ref, tsa_ref, sma_ref, sa_ref, ta_ref,
):
    B, Sh, W = speechs_ref.shape
    S, E = pos_emb_ref.shape
    V = word_emb_ref.shape[0]
    ln_g, ln_b = ln_g_ref[...], ln_b_ref[...]

    # ---- speech branch: Linear+ReLU -> eval BN -> self-MHA -> LayerNorm -----
    se = jnp.maximum(
        _f32_dot(speechs_ref[...].reshape(B * Sh, W), se_w_ref[...]) + se_b_ref[...],
        0.0).reshape(B, Sh, E)
    se = se * sp_bn_scale_ref[...] + sp_bn_shift_ref[...]          # dropout = id
    sp_attn, sma = _mha(se, sp_wqkv_ref[...], sp_bqkv_ref[...],
                        sp_wo_ref[...], sp_bo_ref[...], need_probs=True)
    speech_enc = _layernorm(se + sp_attn, ln_g, ln_b, 1e-5)
    sma_ref[...] = sma

    # ---- text branch: in-kernel one-hot embedding + synthetic BERT layer ----
    onehot = (ids_ref[...] ==
              jax.lax.broadcasted_iota(jnp.int32, (B * S, V), 1)).astype(jnp.float32)
    emb = (_f32_dot(onehot, word_emb_ref[...]).reshape(B, S, E)
           + pos_emb_ref[...][None] + type_row_ref[...][None])
    # Additive key-mask bias, broadcast ONCE to (B, S, S) before the head loop.
    key_bias = jnp.broadcast_to((1.0 - mask_ref[...]) * -1e9, (B, S, S))

    h = _layernorm(emb, emb_ln_g_ref[...], emb_ln_b_ref[...], 1e-12)
    attn_out, _ = _mha(h, b_wqkv_ref[...], b_bqkv_ref[...],
                       b_wo_ref[...], b_bo_ref[...], key_bias=key_bias)
    h = _layernorm(h + attn_out, b_ln1_g_ref[...], b_ln1_b_ref[...], 1e-12)
    # TODO(synk): jax.nn.gelu defaults to the tanh approximation (PyTorch BERT uses erf).
    f = jax.nn.gelu(_f32_dot(h.reshape(B * S, E), b_win_ref[...]) + b_bin_ref[...])
    f = _f32_dot(f, b_wout_ref[...]) + b_bout_ref[...]
    text_embedding = _layernorm(h + f.reshape(B, S, E),
                                b_ln2_g_ref[...], b_ln2_b_ref[...], 1e-12)
    text_enc = text_embedding + (text_embedding * tx_bn_scale_ref[...]
                                 + tx_bn_shift_ref[...])

    # ---- ESIM local inference (attT = exact minor-dims transpose of att) ----
    att = _f32_einsum('bqd,bkd->bqk', speech_enc, text_enc)        # (B, Sh, S)
    attT = jnp.swapaxes(att, 1, 2)                                 # (B, S, Sh)
    w1 = _softmax_last(att)
    w2 = _softmax_last(attT)
    sta_ref[...] = w1
    tsa_ref[...] = w2
    x1_align = _f32_einsum('bqk,bkd->bqd', w1, text_enc)
    x2_align = _f32_einsum('bqk,bkd->bqd', w2, speech_enc)
    x1_cat = jnp.concatenate(
        [speech_enc, x1_align, speech_enc - x1_align, speech_enc * x1_align], axis=-1)
    x2_cat = jnp.concatenate(
        [text_enc, x2_align, text_enc - x2_align, text_enc * x2_align], axis=-1)

    def combined(xcat, rows):
        hc = jnp.maximum(_f32_dot(xcat.reshape(rows, 4 * E), cl_w1_ref[...])
                         + cl_b1_ref[...], 0.0)
        return jnp.maximum(_f32_dot(hc, cl_w2_ref[...]) + cl_b2_ref[...], 0.0)

    sc = combined(x1_cat, B * Sh).reshape(B, Sh, E)
    tc = combined(x2_cat, B * S).reshape(B, S, E)

    # ---- composition MHA + LayerNorm + HAN pooling (both branches, fused) ---
    def compose(x, bn_scale, bn_shift, wqkv, bqkv, wo, bo):
        Bc, Sc, Hc = x.shape
        xb = x * bn_scale + bn_shift                               # eval BN (+id dropout)
        attn, _ = _mha(xb, wqkv, bqkv, wo, bo)
        xc = _layernorm(xb + attn, ln_g, ln_b, 1e-5)
        # HAN pooling: Linear -> Tanh -> (H->1) score, softmax over sequence.
        hh = jnp.tanh(_f32_dot(xc.reshape(Bc * Sc, Hc), han_w1_ref[...])
                      + han_b1_ref[...]).reshape(Bc, Sc, Hc)
        v = jnp.sum(hh * han_w2_ref[...], axis=-1) + han_b2_ref[...]   # (B, S) lane-dense
        v = v - jnp.max(v, axis=-1, keepdims=True)
        e = jnp.exp(v)
        alpha = e / jnp.sum(e, axis=-1, keepdims=True)                 # (B, S)
        # Weighted pooling as tiny (1,S)@(S,H) MXU matmuls keeps alpha lane-dense.
        pooled = jnp.concatenate(
            [_f32_dot(alpha[b:b + 1, :], xc[b]) for b in range(Bc)], axis=0)
        return pooled, alpha

    pooled_s, sa = compose(sc, sp_bn_scale_ref[...], sp_bn_shift_ref[...],
                           cs_wqkv_ref[...], cs_bqkv_ref[...],
                           cs_wo_ref[...], cs_bo_ref[...])
    pooled_t, ta = compose(tc, tx_bn_scale_ref[...], tx_bn_shift_ref[...],
                           ct_wqkv_ref[...], ct_bqkv_ref[...],
                           ct_wo_ref[...], ct_bo_ref[...])
    sa_ref[...] = sa
    ta_ref[...] = ta

    # ---- classifier: relu(p_s @ W1a + p_t @ W1b + b1) @ W2 + b2 -------------
    hcls = jnp.maximum(_f32_dot(pooled_s, fc_w1a_ref[...])
                       + _f32_dot(pooled_t, fc_w1b_ref[...]) + fc_b1_ref[...], 0.0)
    prob_ref[...] = _f32_dot(hcls, fc_w2_ref[...]) + fc_b2_ref[...]


# ------------------------------- wrappers ------------------------------------
def prepare_params(p):
    """One-time weight repacking (hoisted out of the per-call path)."""
    row = lambda v: v[None, :]

    def bn_affine(bn):
        gamma, beta, mean, var = bn
        scale = gamma * jax.lax.rsqrt(var + 1e-5)
        shift = beta - mean * scale
        return scale.reshape(1, -1, 1), shift.reshape(1, -1, 1)

    def mha_pack(mp):
        wqkv = jnp.concatenate([mp["wq"], mp["wk"], mp["wv"]], axis=1)   # (E, 3E)
        bqkv = jnp.concatenate([mp["bq"], mp["bk"], mp["bv"]])[None, :]  # (1, 3E)
        return wqkv, bqkv, mp["wo"], mp["bo"][None, :]

    bp = p["bert"]
    layer = bp["layers"][0]
    sp_scale, sp_shift = bn_affine(p["speechs_bn"])
    tx_scale, tx_shift = bn_affine(p["text_bn"])
    sp_wqkv, sp_bqkv, sp_wo, sp_bo = mha_pack(p["speech_mha"])
    b_wqkv, b_bqkv, b_wo, b_bo = mha_pack(layer["attn"])
    cs_wqkv, cs_bqkv, cs_wo, cs_bo = mha_pack(p["comp_speech_mha"])
    ct_wqkv, ct_bqkv, ct_wo, ct_bo = mha_pack(p["comp_text_mha"])

    return (
        # BERT embedding tables + embedding LayerNorm
        bp["word_emb"], bp["pos_emb"], bp["type_emb"][0:1],
        row(bp["emb_ln_g"]), row(bp["emb_ln_b"]),
        # speech embedding Linear
        p["speech_emb_w"], row(p["speech_emb_b"]),
        # folded eval BatchNorms
        sp_scale, sp_shift, tx_scale, tx_shift,
        # speech MHA + shared LayerNorm
        sp_wqkv, sp_bqkv, sp_wo, sp_bo,
        row(p["ln_g"]), row(p["ln_b"]),
        # synthetic BERT encoder
        b_wqkv, b_bqkv, b_wo, b_bo,
        row(layer["ln1_g"]), row(layer["ln1_b"]),
        layer["w_in"], row(layer["b_in"]), layer["w_out"], row(layer["b_out"]),
        row(layer["ln2_g"]), row(layer["ln2_b"]),
        # shared combined_linear
        p["cl_w1"], row(p["cl_b1"]), p["cl_w2"], row(p["cl_b2"]),
        # composition MHAs
        cs_wqkv, cs_bqkv, cs_wo, cs_bo,
        ct_wqkv, ct_bqkv, ct_wo, ct_bo,
        # HAN attention pooling
        p["han"]["w1"], row(p["han"]["b1"]),
        p["han"]["w2"].reshape(1, HIDDEN), p["han"]["b2"].reshape(1, 1),
        # classifier (fc_w1 pre-split: avoids a (B, 2H) lane concat in-kernel)
        p["fc_w1"][:HIDDEN, :], p["fc_w1"][HIDDEN:, :],
        row(p["fc_b1"]), p["fc_w2"], row(p["fc_b2"]),
    )


def forward(packed, speechs, input_ids, attention_mask):
    B, Sh = speechs.shape[0], speechs.shape[1]
    S = input_ids.shape[1]
    ids = input_ids.reshape(B * S, 1).astype(jnp.int32)
    mask = attention_mask.reshape(B, 1, S).astype(jnp.float32)
    return pl.pallas_call(
        _fused_forward_kernel,
        out_shape=(
            jax.ShapeDtypeStruct((B, N_CLASSES), jnp.float32),   # prob
            jax.ShapeDtypeStruct((B, Sh, S), jnp.float32),       # sta
            jax.ShapeDtypeStruct((B, S, Sh), jnp.float32),       # tsa
            jax.ShapeDtypeStruct((B, Sh, Sh), jnp.float32),      # sma
            jax.ShapeDtypeStruct((B, Sh), jnp.float32),          # sa
            jax.ShapeDtypeStruct((B, S), jnp.float32),           # ta
        ),
    )(speechs.astype(jnp.float32), ids, mask, *packed)


# ----------------------------- parameter init --------------------------------
class KeyGen:
    def __init__(self, seed):
        self._key = jax.random.PRNGKey(seed)

    def __call__(self):
        self._key, sub = jax.random.split(self._key)
        return sub


def _w(kg, shape, scale=0.05):
    return scale * jax.random.normal(kg(), shape, dtype=jnp.float32)


def _mha_params(kg, dim):
    return dict(
        wq=_w(kg, (dim, dim)), bq=_w(kg, (dim,), 0.01),
        wk=_w(kg, (dim, dim)), bk=_w(kg, (dim,), 0.01),
        wv=_w(kg, (dim, dim)), bv=_w(kg, (dim,), 0.01),
        wo=_w(kg, (dim, dim)), bo=_w(kg, (dim,), 0.01),
    )


def _bn_params(kg, c):
    return (jnp.ones((c,), jnp.float32) + _w(kg, (c,), 0.01),          # gamma
            _w(kg, (c,), 0.01),                                        # beta
            _w(kg, (c,), 0.01),                                        # running mean
            jnp.ones((c,), jnp.float32) + jnp.abs(_w(kg, (c,), 0.1)))  # running var


def init_params(seed=42):
    kg = KeyGen(seed)
    bert_layers = [dict(
        attn=_mha_params(kg, HIDDEN),
        ln1_g=jnp.ones((HIDDEN,), jnp.float32), ln1_b=jnp.zeros((HIDDEN,), jnp.float32),
        w_in=_w(kg, (HIDDEN, BERT_FFN)), b_in=_w(kg, (BERT_FFN,), 0.01),
        w_out=_w(kg, (BERT_FFN, HIDDEN)), b_out=_w(kg, (HIDDEN,), 0.01),
        ln2_g=jnp.ones((HIDDEN,), jnp.float32), ln2_b=jnp.zeros((HIDDEN,), jnp.float32),
    )]
    return dict(
        speech_emb_w=_w(kg, (SPEECH_W, EMBED_DIM)), speech_emb_b=_w(kg, (EMBED_DIM,), 0.01),
        speechs_bn=_bn_params(kg, SPEECH_H),
        text_bn=_bn_params(kg, MAX_SEQ),
        speech_mha=_mha_params(kg, EMBED_DIM),
        comp_speech_mha=_mha_params(kg, HIDDEN),
        comp_text_mha=_mha_params(kg, HIDDEN),
        ln_g=jnp.ones((EMBED_DIM,), jnp.float32), ln_b=jnp.zeros((EMBED_DIM,), jnp.float32),
        cl_w1=_w(kg, (4 * HIDDEN, 2 * HIDDEN)), cl_b1=_w(kg, (2 * HIDDEN,), 0.01),
        cl_w2=_w(kg, (2 * HIDDEN, HIDDEN)), cl_b2=_w(kg, (HIDDEN,), 0.01),
        han=dict(w1=_w(kg, (HIDDEN, HIDDEN)), b1=_w(kg, (HIDDEN,), 0.01),
                 w2=_w(kg, (HIDDEN, 1)), b2=_w(kg, (1,), 0.01)),
        bert=dict(word_emb=_w(kg, (VOCAB, HIDDEN), 0.1),
                  pos_emb=_w(kg, (MAX_SEQ, HIDDEN), 0.1),
                  type_emb=_w(kg, (2, HIDDEN), 0.1),
                  emb_ln_g=jnp.ones((HIDDEN,), jnp.float32),
                  emb_ln_b=jnp.zeros((HIDDEN,), jnp.float32),
                  layers=bert_layers),
        fc_w1=_w(kg, (2 * HIDDEN, HIDDEN)), fc_b1=_w(kg, (HIDDEN,), 0.01),
        fc_w2=_w(kg, (HIDDEN, N_CLASSES)), fc_b2=_w(kg, (N_CLASSES,), 0.01),
    )


# ----------------------------------- main ------------------------------------
if __name__ == "__main__":
    params = init_params(42)
    packed = prepare_params(params)      # one-time packing, hoisted out of forward

    key = jax.random.PRNGKey(0)
    k_speech, k_ids = jax.random.split(key)
    speechs = jax.random.normal(k_speech, (BATCH, SPEECH_H, SPEECH_W), dtype=jnp.float32)
    input_ids = jax.random.randint(k_ids, (BATCH, MAX_SEQ), 0, VOCAB)
    attention_mask = jnp.array(
        [[1] * MAX_SEQ, [1] * (MAX_SEQ - 2) + [0, 0]], dtype=jnp.int32)

    fwd = jax.jit(forward)
    prob, sta, tsa, sma, sa, ta = fwd(packed, speechs, input_ids, attention_mask)
    jax.block_until_ready((prob, sta, tsa, sma, sa, ta))

    assert prob.shape == (BATCH, N_CLASSES)
    assert sta.shape == (BATCH, SPEECH_H, MAX_SEQ)
    assert tsa.shape == (BATCH, MAX_SEQ, SPEECH_H)
    assert sma.shape == (BATCH, SPEECH_H, SPEECH_H)
    assert sa.shape == (BATCH, SPEECH_H)
    assert ta.shape == (BATCH, MAX_SEQ)
    assert bool(jnp.all(jnp.isfinite(prob)))
    assert bool(jnp.all(jnp.isfinite(sta))) and bool(jnp.all(jnp.isfinite(sa)))
    assert bool(jnp.all(jnp.isfinite(tsa))) and bool(jnp.all(jnp.isfinite(ta)))
    assert bool(jnp.all(jnp.isfinite(sma)))

    print("KERNEL_OK")
</pallas_src>

<mosaic_0001>
module attributes {stable_mosaic.version = 11 : i64} {
  func.func @_fused_forward_kernel(%arg0: memref<2x8x24xf32, #tpu.memory_space<vmem>>, %arg1: memref<16x1xi32, #tpu.memory_space<vmem>>, %arg2: memref<2x1x8xf32, #tpu.memory_space<vmem>>, %arg3: memref<100x32xf32, #tpu.memory_space<vmem>>, %arg4: memref<8x32xf32, #tpu.memory_space<vmem>>, %arg5: memref<1x32xf32, #tpu.memory_space<vmem>>, %arg6: memref<1x32xf32, #tpu.memory_space<vmem>>, %arg7: memref<1x32xf32, #tpu.memory_space<vmem>>, %arg8: memref<24x32xf32, #tpu.memory_space<vmem>>, %arg9: memref<1x32xf32, #tpu.memory_space<vmem>>, %arg10: memref<1x8x1xf32, #tpu.memory_space<vmem>>, %arg11: memref<1x8x1xf32, #tpu.memory_space<vmem>>, %arg12: memref<1x8x1xf32, #tpu.memory_space<vmem>>, %arg13: memref<1x8x1xf32, #tpu.memory_space<vmem>>, %arg14: memref<32x96xf32, #tpu.memory_space<vmem>>, %arg15: memref<1x96xf32, #tpu.memory_space<vmem>>, %arg16: memref<32x32xf32, #tpu.memory_space<vmem>>, %arg17: memref<1x32xf32, #tpu.memory_space<vmem>>, %arg18: memref<1x32xf32, #tpu.memory_space<vmem>>, %arg19: memref<1x32xf32, #tpu.memory_space<vmem>>, %arg20: memref<32x96xf32, #tpu.memory_space<vmem>>, %arg21: memref<1x96xf32, #tpu.memory_space<vmem>>, %arg22: memref<32x32xf32, #tpu.memory_space<vmem>>, %arg23: memref<1x32xf32, #tpu.memory_space<vmem>>, %arg24: memref<1x32xf32, #tpu.memory_space<vmem>>, %arg25: memref<1x32xf32, #tpu.memory_space<vmem>>, %arg26: memref<32x64xf32, #tpu.memory_space<vmem>>, %arg27: memref<1x64xf32, #tpu.memory_space<vmem>>, %arg28: memref<64x32xf32, #tpu.memory_space<vmem>>, %arg29: memref<1x32xf32, #tpu.memory_space<vmem>>, %arg30: memref<1x32xf32, #tpu.memory_space<vmem>>, %arg31: memref<1x32xf32, #tpu.memory_space<vmem>>, %arg32: memref<128x64xf32, #tpu.memory_space<vmem>>, %arg33: memref<1x64xf32, #tpu.memory_space<vmem>>, %arg34: memref<64x32xf32, #tpu.memory_space<vmem>>, %arg35: memref<1x32xf32, #tpu.memory_space<vmem>>, %arg36: memref<32x96xf32, #tpu.memory_space<vmem>>, %arg37: memref<1x96xf32, #tpu.memory_space<vmem>>, %arg38: memref<32x32xf32, #tpu.memory_space<vmem>>, %arg39: memref<1x32xf32, #tpu.memory_space<vmem>>, %arg40: memref<32x96xf32, #tpu.memory_space<vmem>>, %arg41: memref<1x96xf32, #tpu.memory_space<vmem>>, %arg42: memref<32x32xf32, #tpu.memory_space<vmem>>, %arg43: memref<1x32xf32, #tpu.memory_space<vmem>>, %arg44: memref<32x32xf32, #tpu.memory_space<vmem>>, %arg45: memref<1x32xf32, #tpu.memory_space<vmem>>, %arg46: memref<1x32xf32, #tpu.memory_space<vmem>>, %arg47: memref<1x1xf32, #tpu.memory_space<vmem>>, %arg48: memref<32x32xf32, #tpu.memory_space<vmem>>, %arg49: memref<32x32xf32, #tpu.memory_space<vmem>>, %arg50: memref<1x32xf32, #tpu.memory_space<vmem>>, %arg51: memref<32x3xf32, #tpu.memory_space<vmem>>, %arg52: memref<1x3xf32, #tpu.memory_space<vmem>>, %arg53: memref<2x3xf32, #tpu.memory_space<vmem>>, %arg54: memref<2x8x8xf32, #tpu.memory_space<vmem>>, %arg55: memref<2x8x8xf32, #tpu.memory_space<vmem>>, %arg56: memref<2x8x8xf32, #tpu.memory_space<vmem>>, %arg57: memref<2x8xf32, #tpu.memory_space<vmem>>, %arg58: memref<2x8xf32, #tpu.memory_space<vmem>>) attributes {dimension_semantics = [], scalar_prefetch = 0 : i64, scratch_operands = 0 : i64, tpu.core_type = #tpu.core_type<tc>} {
    %c0 = arith.constant 0 : index
    %c0_0 = arith.constant 0 : index
    %0 = vector.load %arg18[%c0, %c0_0] : memref<1x32xf32, #tpu.memory_space<vmem>>, vector<1x32xf32>
    %c0_1 = arith.constant 0 : index
    %c0_2 = arith.constant 0 : index
    %1 = vector.load %arg19[%c0_1, %c0_2] : memref<1x32xf32, #tpu.memory_space<vmem>>, vector<1x32xf32>
    %c0_3 = arith.constant 0 : index
    %c0_4 = arith.constant 0 : index
    %c0_5 = arith.constant 0 : index
    %2 = vector.load %arg0[%c0_3, %c0_4, %c0_5] : memref<2x8x24xf32, #tpu.memory_space<vmem>>, vector<2x8x24xf32>
    %3 = vector.shape_cast %2 : vector<2x8x24xf32> to vector<16x24xf32>
    %c0_6 = arith.constant 0 : index
    %c0_7 = arith.constant 0 : index
    %4 = vector.load %arg8[%c0_6, %c0_7] : memref<24x32xf32, #tpu.memory_space<vmem>>, vector<24x32xf32>
    %cst = arith.constant dense<0.000000e+00> : vector<16x32xf32>
    %5 = tpu.matmul %3, %4, %cst {dimension_numbers = #tpu.dot_dimension_numbers<[1], [0], [0], [1], [0, 0, 1, 1], [], []>} : vector<16x24xf32>, vector<24x32xf32>, vector<16x32xf32> -> vector<16x32xf32>
    %c0_8 = arith.constant 0 : index
    %c0_9 = arith.constant 0 : index
    %6 = vector.load %arg9[%c0_8, %c0_9] : memref<1x32xf32, #tpu.memory_space<vmem>>, vector<1x32xf32>
    %7 = vector.broadcast %6 : vector<1x32xf32> to vector<16x32xf32>
    %8 = arith.addf %5, %7 : vector<16x32xf32>
    %cst_10 = arith.constant 0.000000e+00 : f32
    %9 = vector.broadcast %cst_10 : f32 to vector<16x32xf32>
    %10 = arith.maximumf %8, %9 : vector<16x32xf32>
    %11 = vector.shape_cast %10 : vector<16x32xf32> to vector<2x8x32xf32>
    %c0_11 = arith.constant 0 : index
    %c0_12 = arith.constant 0 : index
    %c0_13 = arith.constant 0 : index
    %12 = vector.load %arg10[%c0_11, %c0_12, %c0_13] : memref<1x8x1xf32, #tpu.memory_space<vmem>>, vector<1x8x1xf32>
    %13 = vector.broadcast %12 : vector<1x8x1xf32> to vector<2x8x32xf32>
    %14 = arith.mulf %11, %13 : vector<2x8x32xf32>
    %c0_14 = arith.constant 0 : index
    %c0_15 = arith.constant 0 : index
    %c0_16 = arith.constant 0 : index
    %15 = vector.load %arg11[%c0_14, %c0_15, %c0_16] : memref<1x8x1xf32, #tpu.memory_space<vmem>>, vector<1x8x1xf32>
    %16 = vector.broadcast %15 : vector<1x8x1xf32> to vector<2x8x32xf32>
    %17 = arith.addf %14, %16 : vector<2x8x32xf32>
    %c0_17 = arith.constant 0 : index
    %c0_18 = arith.constant 0 : index
    %18 = vector.load %arg14[%c0_17, %c0_18] : memref<32x96xf32, #tpu.memory_space<vmem>>, vector<32x96xf32>
    %c0_19 = arith.constant 0 : index
    %c0_20 = arith.constant 0 : index
    %19 = vector.load %arg15[%c0_19, %c0_20] : memref<1x96xf32, #tpu.memory_space<vmem>>, vector<1x96xf32>
    %c0_21 = arith.constant 0 : index
    %c0_22 = arith.constant 0 : index
    %20 = vector.load %arg16[%c0_21, %c0_22] : memref<32x32xf32, #tpu.memory_space<vmem>>, vector<32x32xf32>
    %c0_23 = arith.constant 0 : index
    %c0_24 = arith.constant 0 : index
    %21 = vector.load %arg17[%c0_23, %c0_24] : memref<1x32xf32, #tpu.memory_space<vmem>>, vector<1x32xf32>
    %22 = vector.shape_cast %17 : vector<2x8x32xf32> to vector<16x32xf32>
    %cst_25 = arith.constant dense<0.000000e+00> : vector<16x96xf32>
    %23 = tpu.matmul %22, %18, %cst_25 {dimension_numbers = #tpu.dot_dimension_numbers<[1], [0], [0], [1], [0, 0, 1, 1], [], []>} : vector<16x32xf32>, vector<32x96xf32>, vector<16x96xf32> -> vector<16x96xf32>
    %24 = vector.broadcast %19 : vector<1x96xf32> to vector<16x96xf32>
    %25 = arith.addf %23, %24 : vector<16x96xf32>
    %26 = vector.shape_cast %25 : vector<16x96xf32> to vector<2x8x96xf32>
    %27 = vector.extract_strided_slice %26 {offsets = [0, 0, 0], sizes = [2, 8, 32], strides = [1, 1, 1]} : vector<2x8x96xf32> to vector<2x8x32xf32>
    %28 = vector.extract_strided_slice %26 {offsets = [0, 0, 32], sizes = [2, 8, 32], strides = [1, 1, 1]} : vector<2x8x96xf32> to vector<2x8x32xf32>
    %29 = vector.extract_strided_slice %26 {offsets = [0, 0, 64], sizes = [2, 8, 32], strides = [1, 1, 1]} : vector<2x8x96xf32> to vector<2x8x32xf32>
    %30 = vector.extract_strided_slice %27 {offsets = [0, 0, 0], sizes = [2, 8, 8], strides = [1, 1, 1]} : vector<2x8x32xf32> to vector<2x8x8xf32>
    %31 = vector.extract_strided_slice %28 {offsets = [0, 0, 0], sizes = [2, 8, 8], strides = [1, 1, 1]} : vector<2x8x32xf32> to vector<2x8x8xf32>
    "tpu.trace_start"() <{level = 10 : i32, message = "bqd,bkd->bqk"}> : () -> ()
    %cst_26 = arith.constant dense<0.000000e+00> : vector<2x8x8xf32>
    %32 = tpu.matmul %30, %31, %cst_26 {dimension_numbers = #tpu.dot_dimension_numbers<[2], [2], [1], [1], [0, 0, 0, 1, 1, 1], [0], [0]>} : vector<2x8x8xf32>, vector<2x8x8xf32>, vector<2x8x8xf32> -> vector<2x8x8xf32>
    "tpu.trace_stop"() : () -> ()
    %cst_27 = arith.constant 0.353553385 : f32
    %33 = vector.broadcast %cst_27 : f32 to vector<2x8x8xf32>
    %34 = arith.mulf %32, %33 : vector<2x8x8xf32>
    %cst_28 = arith.constant dense<0xFF800000> : vector<2x8xf32>
    %35 = vector.multi_reduction <maximumf>, %34, %cst_28 [2] : vector<2x8x8xf32> to vector<2x8xf32>
    %36 = vector.shape_cast %35 : vector<2x8xf32> to vector<2x8x1xf32>
    %37 = vector.broadcast %36 : vector<2x8x1xf32> to vector<2x8x8xf32>
    %38 = arith.subf %34, %37 : vector<2x8x8xf32>
    %39 = math.exp %38 : vector<2x8x8xf32>
    %cst_29 = arith.constant dense<0.000000e+00> : vector<2x8xf32>
    %40 = vector.multi_reduction <add>, %39, %cst_29 [2] : vector<2x8x8xf32> to vector<2x8xf32>
    %41 = vector.shape_cast %40 : vector<2x8xf32> to vector<2x8x1xf32>
    %42 = vector.broadcast %41 : vector<2x8x1xf32> to vector<2x8x8xf32>
    %43 = arith.divf %39, %42 : vector<2x8x8xf32>
    %44 = vector.extract_strided_slice %29 {offsets = [0, 0, 0], sizes = [2, 8, 8], strides = [1, 1, 1]} : vector<2x8x32xf32> to vector<2x8x8xf32>
    "tpu.trace_start"() <{level = 10 : i32, message = "bqk,bkd->bqd"}> : () -> ()
    %cst_30 = arith.constant dense<0.000000e+00> : vector<2x8x8xf32>
    %45 = tpu.matmul %43, %44, %cst_30 {dimension_numbers = #tpu.dot_dimension_numbers<[2], [1], [1], [2], [0, 0, 0, 1, 1, 2], [0], [0]>} : vector<2x8x8xf32>, vector<2x8x8xf32>, vector<2x8x8xf32> -> vector<2x8x8xf32>
    "tpu.trace_stop"() : () -> ()
    %46 = vector.extract_strided_slice %27 {offsets = [0, 0, 8], sizes = [2, 8, 8], strides = [1, 1, 1]} : vector<2x8x32xf32> to vector<2x8x8xf32>
    %47 = vector.extract_strided_slice %28 {offsets = [0, 0, 8], sizes = [2, 8, 8], strides = [1, 1, 1]} : vector<2x8x32xf32> to vector<2x8x8xf32>
    "tpu.trace_start"() <{level = 10 : i32, message = "bqd,bkd->bqk"}> : () -> ()
    %cst_31 = arith.constant dense<0.000000e+00> : vector<2x8x8xf32>
    %48 = tpu.matmul %46, %47, %cst_31 {dimension_numbers = #tpu.dot_dimension_numbers<[2], [2], [1], [1], [0, 0, 0, 1, 1, 1], [0], [0]>} : vector<2x8x8xf32>, vector<2x8x8xf32>, vector<2x8x8xf32> -> vector<2x8x8xf32>
    "tpu.trace_stop"() : () -> ()
    %cst_32 = arith.constant 0.353553385 : f32
    %49 = vector.broadcast %cst_32 : f32 to vector<2x8x8xf32>
    %50 = arith.mulf %48, %49 : vector<2x8x8xf32>
    %cst_33 = arith.constant dense<0xFF800000> : vector<2x8xf32>
    %51 = vector.multi_reduction <maximumf>, %50, %cst_33 [2] : vector<2x8x8xf32> to vector<2x8xf32>
    %52 = vector.shape_cast %51 : vector<2x8xf32> to vector<2x8x1xf32>
    %53 = vector.broadcast %52 : vector<2x8x1xf32> to vector<2x8x8xf32>
    %54 = arith.subf %50, %53 : vector<2x8x8xf32>
    %55 = math.exp %54 : vector<2x8x8xf32>
    %cst_34 = arith.constant dense<0.000000e+00> : vector<2x8xf32>
    %56 = vector.multi_reduction <add>, %55, %cst_34 [2] : vector<2x8x8xf32> to vector<2x8xf32>
    %57 = vector.shape_cast %56 : vector<2x8xf32> to vector<2x8x1xf32>
    %58 = vector.broadcast %57 : vector<2x8x1xf32> to vector<2x8x8xf32>
    %59 = arith.divf %55, %58 : vector<2x8x8xf32>
    %60 = arith.addf %43, %59 : vector<2x8x8xf32>
    %61 = vector.extract_strided_slice %29 {offsets = [0, 0, 8], sizes = [2, 8, 8], strides = [1, 1, 1]} : vector<2x8x32xf32> to vector<2x8x8xf32>
    "tpu.trace_start"() <{level = 10 : i32, message = "bqk,bkd->bqd"}> : () -> ()
    %cst_35 = arith.constant dense<0.000000e+00> : vector<2x8x8xf32>
    %62 = tpu.matmul %59, %61, %cst_35 {dimension_numbers = #tpu.dot_dimension_numbers<[2], [1], [1], [2], [0, 0, 0, 1, 1, 2], [0], [0]>} : vector<2x8x8xf32>, vector<2x8x8xf32>, vector<2x8x8xf32> -> vector<2x8x8xf32>
    "tpu.trace_stop"() : () -> ()
    %63 = vector.extract_strided_slice %27 {offsets = [0, 0, 16], sizes = [2, 8, 8], strides = [1, 1, 1]} : vector<2x8x32xf32> to vector<2x8x8xf32>
    %64 = vector.extract_strided_slice %28 {offsets = [0, 0, 16], sizes = [2, 8, 8], strides = [1, 1, 1]} : vector<2x8x32xf32> to vector<2x8x8xf32>
    "tpu.trace_start"() <{level = 10 : i32, message = "bqd,bkd->bqk"}> : () -> ()
    %cst_36 = arith.constant dense<0.000000e+00> : vector<2x8x8xf32>
    %65 = tpu.matmul %63, %64, %cst_36 {dimension_numbers = #tpu.dot_dimension_numbers<[2], [2], [1], [1], [0, 0, 0, 1, 1, 1], [0], [0]>} : vector<2x8x8xf32>, vector<2x8x8xf32>, vector<2x8x8xf32> -> vector<2x8x8xf32>
    "tpu.trace_stop"() : () -> ()
    %cst_37 = arith.constant 0.353553385 : f32
    %66 = vector.broadcast %cst_37 : f32 to vector<2x8x8xf32>
    %67 = arith.mulf %65, %66 : vector<2x8x8xf32>
    %cst_38 = arith.constant dense<0xFF800000> : vector<2x8xf32>
    %68 = vector.multi_reduction <maximumf>, %67, %cst_38 [2] : vector<2x8x8xf32> to vector<2x8xf32>
    %69 = vector.shape_cast %68 : vector<2x8xf32> to vector<2x8x1xf32>
    %70 = vector.broadcast %69 : vector<2x8x1xf32> to vector<2x8x8xf32>
    %71 = arith.subf %67, %70 : vector<2x8x8xf32>
    %72 = math.exp %71 : vector<2x8x8xf32>
    %cst_39 = arith.constant dense<0.000000e+00> : vector<2x8xf32>
    %73 = vector.multi_reduction <add>, %72, %cst_39 [2] : vector<2x8x8xf32> to vector<2x8xf32>
    %74 = vector.shape_cast %73 : vector<2x8xf32> to vector<2x8x1xf32>
    %75 = vector.broadcast %74 : vector<2x8x1xf32> to vector<2x8x8xf32>
    %76 = arith.divf %72, %75 : vector<2x8x8xf32>
    %77 = arith.addf %60, %76 : vector<2x8x8xf32>
    %78 = vector.extract_strided_slice %29 {offsets = [0, 0, 16], sizes = [2, 8, 8], strides = [1, 1, 1]} : vector<2x8x32xf32> to vector<2x8x8xf32>
    "tpu.trace_start"() <{level = 10 : i32, message = "bqk,bkd->bqd"}> : () -> ()
    %cst_40 = arith.constant dense<0.000000e+00> : vector<2x8x8xf32>
    %79 = tpu.matmul %76, %78, %cst_40 {dimension_numbers = #tpu.dot_dimension_numbers<[2], [1], [1], [2], [0, 0, 0, 1, 1, 2], [0], [0]>} : vector<2x8x8xf32>, vector<2x8x8xf32>, vector<2x8x8xf32> -> vector<2x8x8xf32>
    "tpu.trace_stop"() : () -> ()
    %80 = vector.extract_strided_slice %27 {offsets = [0, 0, 24], sizes = [2, 8, 8], strides = [1, 1, 1]} : vector<2x8x32xf32> to vector<2x8x8xf32>
    %81 = vector.extract_strided_slice %28 {offsets = [0, 0, 24], sizes = [2, 8, 8], strides = [1, 1, 1]} : vector<2x8x32xf32> to vector<2x8x8xf32>
    "tpu.trace_start"() <{level = 10 : i32, message = "bqd,bkd->bqk"}> : () -> ()
    %cst_41 = arith.constant dense<0.000000e+00> : vector<2x8x8xf32>
    %82 = tpu.matmul %80, %81, %cst_41 {dimension_numbers = #tpu.dot_dimension_numbers<[2], [2], [1], [1], [0, 0, 0, 1, 1, 1], [0], [0]>} : vector<2x8x8xf32>, vector<2x8x8xf32>, vector<2x8x8xf32> -> vector<2x8x8xf32>
    "tpu.trace_stop"() : () -> ()
    %cst_42 = arith.constant 0.353553385 : f32
    %83 = vector.broadcast %cst_42 : f32 to vector<2x8x8xf32>
    %84 = arith.mulf %82, %83 : vector<2x8x8xf32>
    %cst_43 = arith.constant dense<0xFF800000> : vector<2x8xf32>
    %85 = vector.multi_reduction <maximumf>, %84, %cst_43 [2] : vector<2x8x8xf32> to vector<2x8xf32>
    %86 = vector.shape_cast %85 : vector<2x8xf32> to vector<2x8x1xf32>
    %87 = vector.broadcast %86 : vector<2x8x1xf32> to vector<2x8x8xf32>
    %88 = arith.subf %84, %87 : vector<2x8x8xf32>
    %89 = math.exp %88 : vector<2x8x8xf32>
    %cst_44 = arith.constant dense<0.000000e+00> : vector<2x8xf32>
    %90 = vector.multi_reduction <add>, %89, %cst_44 [2] : vector<2x8x8xf32> to vector<2x8xf32>
    %91 = vector.shape_cast %90 : vector<2x8xf32> to vector<2x8x1xf32>
    %92 = vector.broadcast %91 : vector<2x8x1xf32> to vector<2x8x8xf32>
    %93 = arith.divf %89, %92 : vector<2x8x8xf32>
    %94 = arith.addf %77, %93 : vector<2x8x8xf32>
    %95 = vector.extract_strided_slice %29 {offsets = [0, 0, 24], sizes = [2, 8, 8], strides = [1, 1, 1]} : vector<2x8x32xf32> to vector<2x8x8xf32>
    "tpu.trace_start"() <{level = 10 : i32, message = "bqk,bkd->bqd"}> : () -> ()
    %cst_45 = arith.constant dense<0.000000e+00> : vector<2x8x8xf32>
    %96 = tpu.matmul %93, %95, %cst_45 {dimension_numbers = #tpu.dot_dimension_numbers<[2], [1], [1], [2], [0, 0, 0, 1, 1, 2], [0], [0]>} : vector<2x8x8xf32>, vector<2x8x8xf32>, vector<2x8x8xf32> -> vector<2x8x8xf32>
    "tpu.trace_stop"() : () -> ()
    %97 = tpu.concatenate %45, %62, %79, %96 in 2 : vector<2x8x8xf32>, vector<2x8x8xf32>, vector<2x8x8xf32>, vector<2x8x8xf32> -> vector<2x8x32xf32>
    %98 = vector.shape_cast %97 : vector<2x8x32xf32> to vector<16x32xf32>
    %cst_46 = arith.constant dense<0.000000e+00> : vector<16x32xf32>
    %99 = tpu.matmul %98, %20, %cst_46 {dimension_numbers = #tpu.dot_dimension_numbers<[1], [0], [0], [1], [0, 0, 1, 1], [], []>} : vector<16x32xf32>, vector<32x32xf32>, vector<16x32xf32> -> vector<16x32xf32>
    %100 = vector.broadcast %21 : vector<1x32xf32> to vector<16x32xf32>
    %101 = arith.addf %99, %100 : vector<16x32xf32>
    %102 = vector.shape_cast %101 : vector<16x32xf32> to vector<2x8x32xf32>
    %cst_47 = arith.constant 2.500000e-01 : f32
    %103 = vector.broadcast %cst_47 : f32 to vector<2x8x8xf32>
    %104 = arith.mulf %94, %103 : vector<2x8x8xf32>
    %105 = arith.addf %17, %102 : vector<2x8x32xf32>
    %cst_48 = arith.constant dense<0.000000e+00> : vector<2x8xf32>
    %106 = vector.multi_reduction <add>, %105, %cst_48 [2] : vector<2x8x32xf32> to vector<2x8xf32>
    %107 = vector.shape_cast %106 : vector<2x8xf32> to vector<2x8x1xf32>
    %cst_49 = arith.constant 3.200000e+01 : f32
    %108 = vector.broadcast %cst_49 : f32 to vector<2x8x1xf32>
    %109 = arith.divf %107, %108 : vector<2x8x1xf32>
    %110 = vector.broadcast %109 : vector<2x8x1xf32> to vector<2x8x32xf32>
    %111 = arith.subf %105, %110 : vector<2x8x32xf32>
    %112 = arith.mulf %111, %111 : vector<2x8x32xf32>
    %cst_50 = arith.constant dense<0.000000e+00> : vector<2x8xf32>
    %113 = vector.multi_reduction <add>, %112, %cst_50 [2] : vector<2x8x32xf32> to vector<2x8xf32>
    %114 = vector.shape_cast %113 : vector<2x8xf32> to vector<2x8x1xf32>
    %cst_51 = arith.constant 3.200000e+01 : f32
    %115 = vector.broadcast %cst_51 : f32 to vector<2x8x1xf32>
    %116 = arith.divf %114, %115 : vector<2x8x1xf32>
    %cst_52 = arith.constant 9.99999974E-6 : f32
    %117 = vector.broadcast %cst_52 : f32 to vector<2x8x1xf32>
    %118 = arith.addf %116, %117 : vector<2x8x1xf32>
    %119 = math.rsqrt %118 : vector<2x8x1xf32>
    %120 = vector.broadcast %119 : vector<2x8x1xf32> to vector<2x8x32xf32>
    %121 = arith.mulf %111, %120 : vector<2x8x32xf32>
    %122 = vector.shape_cast %0 : vector<1x32xf32> to vector<1x1x32xf32>
    %123 = vector.broadcast %122 : vector<1x1x32xf32> to vector<2x8x32xf32>
    %124 = arith.mulf %121, %123 : vector<2x8x32xf32>
    %125 = vector.shape_cast %1 : vector<1x32xf32> to vector<1x1x32xf32>
    %126 = vector.broadcast %125 : vector<1x1x32xf32> to vector<2x8x32xf32>
    %127 = arith.addf %124, %126 : vector<2x8x32xf32>
    %c0_53 = arith.constant 0 : index
    %c0_54 = arith.constant 0 : index
    %c0_55 = arith.constant 0 : index
    %128 = vector.load %arg56[%c0_53, %c0_54, %c0_55] : memref<2x8x8xf32, #tpu.memory_space<vmem>>, vector<2x8x8xf32>
    tpu.vector_store %arg56[%c0_53, %c0_54, %c0_55], %104 {strides = array<i32>} : memref<2x8x8xf32, #tpu.memory_space<vmem>>, vector<2x8x8xf32>,
    %c0_56 = arith.constant 0 : index
    %c0_57 = arith.constant 0 : index
    %129 = vector.load %arg1[%c0_56, %c0_57] : memref<16x1xi32, #tpu.memory_space<vmem>>, vector<16x1xi32>
    %130 = tpu.iota {dimensions = array<i32: 1>} : vector<16x100xi32>
    %131 = vector.broadcast %129 : vector<16x1xi32> to vector<16x100xi32>
    %132 = arith.cmpi eq, %131, %130 : vector<16x100xi32>
    %133 = arith.extui %132 : vector<16x100xi1> to vector<16x100xi32>
    %134 = arith.sitofp %133 : vector<16x100xi32> to vector<16x100xf32>
    %c0_58 = arith.constant 0 : index
    %c0_59 = arith.constant 0 : index
    %135 = vector.load %arg3[%c0_58, %c0_59] : memref<100x32xf32, #tpu.memory_space<vmem>>, vector<100x32xf32>
    %cst_60 = arith.constant dense<0.000000e+00> : vector<16x32xf32>
    %136 = tpu.matmul %134, %135, %cst_60 {dimension_numbers = #tpu.dot_dimension_numbers<[1], [0], [0], [1], [0, 0, 1, 1], [], []>} : vector<16x100xf32>, vector<100x32xf32>, vector<16x32xf32> -> vector<16x32xf32>
    %137 = vector.shape_cast %136 : vector<16x32xf32> to vector<2x8x32xf32>
    %c0_61 = arith.constant 0 : index
    %c0_62 = arith.constant 0 : index
    %138 = vector.load %arg4[%c0_61, %c0_62] : memref<8x32xf32, #tpu.memory_space<vmem>>, vector<8x32xf32>
    %139 = vector.shape_cast %138 : vector<8x32xf32> to vector<1x8x32xf32>
    %140 = vector.broadcast %139 : vector<1x8x32xf32> to vector<2x8x32xf32>
    %141 = arith.addf %137, %140 : vector<2x8x32xf32>
    %c0_63 = arith.constant 0 : index
    %c0_64 = arith.constant 0 : index
    %142 = vector.load %arg5[%c0_63, %c0_64] : memref<1x32xf32, #tpu.memory_space<vmem>>, vector<1x32xf32>
    %143 = vector.shape_cast %142 : vector<1x32xf32> to vector<1x1x32xf32>
    %144 = vector.broadcast %143 : vector<1x1x32xf32> to vector<2x8x32xf32>
    %145 = arith.addf %141, %144 : vector<2x8x32xf32>
    %c0_65 = arith.constant 0 : index
    %c0_66 = arith.constant 0 : index
    %c0_67 = arith.constant 0 : index
    %146 = vector.load %arg2[%c0_65, %c0_66, %c0_67] : memref<2x1x8xf32, #tpu.memory_space<vmem>>, vector<2x1x8xf32>
    %cst_68 = arith.constant 1.000000e+00 : f32
    %147 = vector.broadcast %cst_68 : f32 to vector<2x1x8xf32>
    %148 = arith.subf %147, %146 : vector<2x1x8xf32>
    %cst_69 = arith.constant -1.000000e+09 : f32
    %149 = vector.broadcast %cst_69 : f32 to vector<2x1x8xf32>
    %150 = arith.mulf %148, %149 : vector<2x1x8xf32>
    %151 = vector.shape_cast %150 : vector<2x1x8xf32> to vector<2x1x8xf32>
    %152 = vector.broadcast %151 : vector<2x1x8xf32> to vector<2x8x8xf32>
    %c0_70 = arith.constant 0 : index
    %c0_71 = arith.constant 0 : index
    %153 = vector.load %arg6[%c0_70, %c0_71] : memref<1x32xf32, #tpu.memory_space<vmem>>, vector<1x32xf32>
    %c0_72 = arith.constant 0 : index
    %c0_73 = arith.constant 0 : index
    %154 = vector.load %arg7[%c0_72, %c0_73] : memref<1x32xf32, #tpu.memory_space<vmem>>, vector<1x32xf32>
    %cst_74 = arith.constant dense<0.000000e+00> : vector<2x8xf32>
    %155 = vector.multi_reduction <add>, %145, %cst_74 [2] : vector<2x8x32xf32> to vector<2x8xf32>
    %156 = vector.shape_cast %155 : vector<2x8xf32> to vector<2x8x1xf32>
    %cst_75 = arith.constant 3.200000e+01 : f32
    %157 = vector.broadcast %cst_75 : f32 to vector<2x8x1xf32>
    %158 = arith.divf %156, %157 : vector<2x8x1xf32>
    %159 = vector.broadcast %158 : vector<2x8x1xf32> to vector<2x8x32xf32>
    %160 = arith.subf %145, %159 : vector<2x8x32xf32>
    %161 = arith.mulf %160, %160 : vector<2x8x32xf32>
    %cst_76 = arith.constant dense<0.000000e+00> : vector<2x8xf32>
    %162 = vector.multi_reduction <add>, %161, %cst_76 [2] : vector<2x8x32xf32> to vector<2x8xf32>
    %163 = vector.shape_cast %162 : vector<2x8xf32> to vector<2x8x1xf32>
    %cst_77 = arith.constant 3.200000e+01 : f32
    %164 = vector.broadcast %cst_77 : f32 to vector<2x8x1xf32>
    %165 = arith.divf %163, %164 : vector<2x8x1xf32>
    %cst_78 = arith.constant 9.99999996E-13 : f32
    %166 = vector.broadcast %cst_78 : f32 to vector<2x8x1xf32>
    %167 = arith.addf %165, %166 : vector<2x8x1xf32>
    %168 = math.rsqrt %167 : vector<2x8x1xf32>
    %169 = vector.broadcast %168 : vector<2x8x1xf32> to vector<2x8x32xf32>
    %170 = arith.mulf %160, %169 : vector<2x8x32xf32>
    %171 = vector.shape_cast %153 : vector<1x32xf32> to vector<1x1x32xf32>
    %172 = vector.broadcast %171 : vector<1x1x32xf32> to vector<2x8x32xf32>
    %173 = arith.mulf %170, %172 : vector<2x8x32xf32>
    %174 = vector.shape_cast %154 : vector<1x32xf32> to vector<1x1x32xf32>
    %175 = vector.broadcast %174 : vector<1x1x32xf32> to vector<2x8x32xf32>
    %176 = arith.addf %173, %175 : vector<2x8x32xf32>
    %c0_79 = arith.constant 0 : index
    %c0_80 = arith.constant 0 : index
    %177 = vector.load %arg20[%c0_79, %c0_80] : memref<32x96xf32, #tpu.memory_space<vmem>>, vector<32x96xf32>
    %c0_81 = arith.constant 0 : index
    %c0_82 = arith.constant 0 : index
    %178 = vector.load %arg21[%c0_81, %c0_82] : memref<1x96xf32, #tpu.memory_space<vmem>>, vector<1x96xf32>
    %c0_83 = arith.constant 0 : index
    %c0_84 = arith.constant 0 : index
    %179 = vector.load %arg22[%c0_83, %c0_84] : memref<32x32xf32, #tpu.memory_space<vmem>>, vector<32x32xf32>
    %c0_85 = arith.constant 0 : index
    %c0_86 = arith.constant 0 : index
    %180 = vector.load %arg23[%c0_85, %c0_86] : memref<1x32xf32, #tpu.memory_space<vmem>>, vector<1x32xf32>
    %181 = vector.shape_cast %176 : vector<2x8x32xf32> to vector<16x32xf32>
    %cst_87 = arith.constant dense<0.000000e+00> : vector<16x96xf32>
    %182 = tpu.matmul %181, %177, %cst_87 {dimension_numbers = #tpu.dot_dimension_numbers<[1], [0], [0], [1], [0, 0, 1, 1], [], []>} : vector<16x32xf32>, vector<32x96xf32>, vector<16x96xf32> -> vector<16x96xf32>
    %183 = vector.broadcast %178 : vector<1x96xf32> to vector<16x96xf32>
    %184 = arith.addf %182, %183 : vector<16x96xf32>
    %185 = vector.shape_cast %184 : vector<16x96xf32> to vector<2x8x96xf32>
    %186 = vector.extract_strided_slice %185 {offsets = [0, 0, 0], sizes = [2, 8, 32], strides = [1, 1, 1]} : vector<2x8x96xf32> to vector<2x8x32xf32>
    %187 = vector.extract_strided_slice %185 {offsets = [0, 0, 32], sizes = [2, 8, 32], strides = [1, 1, 1]} : vector<2x8x96xf32> to vector<2x8x32xf32>
    %188 = vector.extract_strided_slice %185 {offsets = [0, 0, 64], sizes = [2, 8, 32], strides = [1, 1, 1]} : vector<2x8x96xf32> to vector<2x8x32xf32>
    %189 = vector.extract_strided_slice %186 {offsets = [0, 0, 0], sizes = [2, 8, 8], strides = [1, 1, 1]} : vector<2x8x32xf32> to vector<2x8x8xf32>
    %190 = vector.extract_strided_slice %187 {offsets = [0, 0, 0], sizes = [2, 8, 8], strides = [1, 1, 1]} : vector<2x8x32xf32> to vector<2x8x8xf32>
    "tpu.trace_start"() <{level = 10 : i32, message = "bqd,bkd->bqk"}> : () -> ()
    %cst_88 = arith.constant dense<0.000000e+00> : vector<2x8x8xf32>
    %191 = tpu.matmul %189, %190, %cst_88 {dimension_numbers = #tpu.dot_dimension_numbers<[2], [2], [1], [1], [0, 0, 0, 1, 1, 1], [0], [0]>} : vector<2x8x8xf32>, vector<2x8x8xf32>, vector<2x8x8xf32> -> vector<2x8x8xf32>
    "tpu.trace_stop"() : () -> ()
    %cst_89 = arith.constant 0.353553385 : f32
    %192 = vector.broadcast %cst_89 : f32 to vector<2x8x8xf32>
    %193 = arith.mulf %191, %192 : vector<2x8x8xf32>
    %194 = arith.addf %193, %152 : vector<2x8x8xf32>
    %cst_90 = arith.constant dense<0xFF800000> : vector<2x8xf32>
    %195 = vector.multi_reduction <maximumf>, %194, %cst_90 [2] : vector<2x8x8xf32> to vector<2x8xf32>
    %196 = vector.shape_cast %195 : vector<2x8xf32> to vector<2x8x1xf32>
    %197 = vector.broadcast %196 : vector<2x8x1xf32> to vector<2x8x8xf32>
    %198 = arith.subf %194, %197 : vector<2x8x8xf32>
    %199 = math.exp %198 : vector<2x8x8xf32>
    %cst_91 = arith.constant dense<0.000000e+00> : vector<2x8xf32>
    %200 = vector.multi_reduction <add>, %199, %cst_91 [2] : vector<2x8x8xf32> to vector<2x8xf32>
    %201 = vector.shape_cast %200 : vector<2x8xf32> to vector<2x8x1xf32>
    %202 = vector.broadcast %201 : vector<2x8x1xf32> to vector<2x8x8xf32>
    %203 = arith.divf %199, %202 : vector<2x8x8xf32>
    %204 = vector.extract_strided_slice %188 {offsets = [0, 0, 0], sizes = [2, 8, 8], strides = [1, 1, 1]} : vector<2x8x32xf32> to vector<2x8x8xf32>
    "tpu.trace_start"() <{level = 10 : i32, message = "bqk,bkd->bqd"}> : () -> ()
    %cst_92 = arith.constant dense<0.000000e+00> : vector<2x8x8xf32>
    %205 = tpu.matmul %203, %204, %cst_92 {dimension_numbers = #tpu.dot_dimension_numbers<[2], [1], [1], [2], [0, 0, 0, 1, 1, 2], [0], [0]>} : vector<2x8x8xf32>, vector<2x8x8xf32>, vector<2x8x8xf32> -> vector<2x8x8xf32>
    "tpu.trace_stop"() : () -> ()
    %206 = vector.extract_strided_slice %186 {offsets = [0, 0, 8], sizes = [2, 8, 8], strides = [1, 1, 1]} : vector<2x8x32xf32> to vector<2x8x8xf32>
    %207 = vector.extract_strided_slice %187 {offsets = [0, 0, 8], sizes = [2, 8, 8], strides = [1, 1, 1]} : vector<2x8x32xf32> to vector<2x8x8xf32>
    "tpu.trace_start"() <{level = 10 : i32, message = "bqd,bkd->bqk"}> : () -> ()
    %cst_93 = arith.constant dense<0.000000e+00> : vector<2x8x8xf32>
    %208 = tpu.matmul %206, %207, %cst_93 {dimension_numbers = #tpu.dot_dimension_numbers<[2], [2], [1], [1], [0, 0, 0, 1, 1, 1], [0], [0]>} : vector<2x8x8xf32>, vector<2x8x8xf32>, vector<2x8x8xf32> -> vector<2x8x8xf32>
    "tpu.trace_stop"() : () -> ()
    %cst_94 = arith.constant 0.353553385 : f32
    %209 = vector.broadcast %cst_94 : f32 to vector<2x8x8xf32>
    %210 = arith.mulf %208, %209 : vector<2x8x8xf32>
    %211 = arith.addf %210, %152 : vector<2x8x8xf32>
    %cst_95 = arith.constant dense<0xFF800000> : vector<2x8xf32>
    %212 = vector.multi_reduction <maximumf>, %211, %cst_95 [2] : vector<2x8x8xf32> to vector<2x8xf32>
    %213 = vector.shape_cast %212 : vector<2x8xf32> to vector<2x8x1xf32>
    %214 = vector.broadcast %213 : vector<2x8x1xf32> to vector<2x8x8xf32>
    %215 = arith.subf %211, %214 : vector<2x8x8xf32>
    %216 = math.exp %215 : vector<2x8x8xf32>
    %cst_96 = arith.constant dense<0.000000e+00> : vector<2x8xf32>
    %217 = vector.multi_reduction <add>, %216, %cst_96 [2] : vector<2x8x8xf32> to vector<2x8xf32>
    %218 = vector.shape_cast %217 : vector<2x8xf32> to vector<2x8x1xf32>
    %219 = vector.broadcast %218 : vector<2x8x1xf32> to vector<2x8x8xf32>
    %220 = arith.divf %216, %219 : vector<2x8x8xf32>
    %221 = vector.extract_strided_slice %188 {offsets = [0, 0, 8], sizes = [2, 8, 8], strides = [1, 1, 1]} : vector<2x8x32xf32> to vector<2x8x8xf32>
    "tpu.trace_start"() <{level = 10 : i32, message = "bqk,bkd->bqd"}> : () -> ()
    %cst_97 = arith.constant dense<0.000000e+00> : vector<2x8x8xf32>
    %222 = tpu.matmul %220, %221, %cst_97 {dimension_numbers = #tpu.dot_dimension_numbers<[2], [1], [1], [2], [0, 0, 0, 1, 1, 2], [0], [0]>} : vector<2x8x8xf32>, vector<2x8x8xf32>, vector<2x8x8xf32> -> vector<2x8x8xf32>
    "tpu.trace_stop"() : () -> ()
    %223 = vector.extract_strided_slice %186 {offsets = [0, 0, 16], sizes = [2, 8, 8], strides = [1, 1, 1]} : vector<2x8x32xf32> to vector<2x8x8xf32>
    %224 = vector.extract_strided_slice %187 {offsets = [0, 0, 16], sizes = [2, 8, 8], strides = [1, 1, 1]} : vector<2x8x32xf32> to vector<2x8x8xf32>
    "tpu.trace_start"() <{level = 10 : i32, message = "bqd,bkd->bqk"}> : () -> ()
    %cst_98 = arith.constant dense<0.000000e+00> : vector<2x8x8xf32>
    %225 = tpu.matmul %223, %224, %cst_98 {dimension_numbers = #tpu.dot_dimension_numbers<[2], [2], [1], [1], [0, 0, 0, 1, 1, 1], [0], [0]>} : vector<2x8x8xf32>, vector<2x8x8xf32>, vector<2x8x8xf32> -> vector<2x8x8xf32>
    "tpu.trace_stop"() : () -> ()
    %cst_99 = arith.constant 0.353553385 : f32
    %226 = vector.broadcast %cst_99 : f32 to vector<2x8x8xf32>
    %227 = arith.mulf %225, %226 : vector<2x8x8xf32>
    %228 = arith.addf %227, %152 : vector<2x8x8xf32>
    %cst_100 = arith.constant dense<0xFF800000> : vector<2x8xf32>
    %229 = vector.multi_reduction <maximumf>, %228, %cst_100 [2] : vector<2x8x8xf32> to vector<2x8xf32>
    %230 = vector.shape_cast %229 : vector<2x8xf32> to vector<2x8x1xf32>
    %231 = vector.broadcast %230 : vector<2x8x1xf32> to vector<2x8x8xf32>
    %232 = arith.subf %228, %231 : vector<2x8x8xf32>
    %233 = math.exp %232 : vector<2x8x8xf32>
    %cst_101 = arith.constant dense<0.000000e+00> : vector<2x8xf32>
    %234 = vector.multi_reduction <add>, %233, %cst_101 [2] : vector<2x8x8xf32> to vector<2x8xf32>
    %235 = vector.shape_cast %234 : vector<2x8xf32> to vector<2x8x1xf32>
    %236 = vector.broadcast %235 : vector<2x8x1xf32> to vector<2x8x8xf32>
    %237 = arith.divf %233, %236 : vector<2x8x8xf32>
    %238 = vector.extract_strided_slice %188 {offsets = [0, 0, 16], sizes = [2, 8, 8], strides = [1, 1, 1]} : vector<2x8x32xf32> to vector<2x8x8xf32>
    "tpu.trace_start"() <{level = 10 : i32, message = "bqk,bkd->bqd"}> : () -> ()
    %cst_102 = arith.constant dense<0.000000e+00> : vector<2x8x8xf32>
    %239 = tpu.matmul %237, %238, %cst_102 {dimension_numbers = #tpu.dot_dimension_numbers<[2], [1], [1], [2], [0, 0, 0, 1, 1, 2], [0], [0]>} : vector<2x8x8xf32>, vector<2x8x8xf32>, vector<2x8x8xf32> -> vector<2x8x8xf32>
    "tpu.trace_stop"() : () -> ()
    %240 = vector.extract_strided_slice %186 {offsets = [0, 0, 24], sizes = [2, 8, 8], strides = [1, 1, 1]} : vector<2x8x32xf32> to vector<2x8x8xf32>
    %241 = vector.extract_strided_slice %187 {offsets = [0, 0, 24], sizes = [2, 8, 8], strides = [1, 1, 1]} : vector<2x8x32xf32> to vector<2x8x8xf32>
    "tpu.trace_start"() <{level = 10 : i32, message = "bqd,bkd->bqk"}> : () -> ()
    %cst_103 = arith.constant dense<0.000000e+00> : vector<2x8x8xf32>
    %242 = tpu.matmul %240, %241, %cst_103 {dimension_numbers = #tpu.dot_dimension_numbers<[2], [2], [1], [1], [0, 0, 0, 1, 1, 1], [0], [0]>} : vector<2x8x8xf32>, vector<2x8x8xf32>, vector<2x8x8xf32> -> vector<2x8x8xf32>
    "tpu.trace_stop"() : () -> ()
    %cst_104 = arith.constant 0.353553385 : f32
    %243 = vector.broadcast %cst_104 : f32 to vector<2x8x8xf32>
    %244 = arith.mulf %242, %243 : vector<2x8x8xf32>
    %245 = arith.addf %244, %152 : vector<2x8x8xf32>
    %cst_105 = arith.constant dense<0xFF800000> : vector<2x8xf32>
    %246 = vector.multi_reduction <maximumf>, %245, %cst_105 [2] : vector<2x8x8xf32> to vector<2x8xf32>
    %247 = vector.shape_cast %246 : vector<2x8xf32> to vector<2x8x1xf32>
    %248 = vector.broadcast %247 : vector<2x8x1xf32> to vector<2x8x8xf32>
    %249 = arith.subf %245, %248 : vector<2x8x8xf32>
    %250 = math.exp %249 : vector<2x8x8xf32>
    %cst_106 = arith.constant dense<0.000000e+00> : vector<2x8xf32>
    %251 = vector.multi_reduction <add>, %250, %cst_106 [2] : vector<2x8x8xf32> to vector<2x8xf32>
    %252 = vector.shape_cast %251 : vector<2x8xf32> to vector<2x8x1xf32>
    %253 = vector.broadcast %252 : vector<2x8x1xf32> to vector<2x8x8xf32>
    %254 = arith.divf %250, %253 : vector<2x8x8xf32>
    %255 = vector.extract_strided_slice %188 {offsets = [0, 0, 24], sizes = [2, 8, 8], strides = [1, 1, 1]} : vector<2x8x32xf32> to vector<2x8x8xf32>
    "tpu.trace_start"() <{level = 10 : i32, message = "bqk,bkd->bqd"}> : () -> ()
    %cst_107 = arith.constant dense<0.000000e+00> : vector<2x8x8xf32>
    %256 = tpu.matmul %254, %255, %cst_107 {dimension_numbers = #tpu.dot_dimension_numbers<[2], [1], [1], [2], [0, 0, 0, 1, 1, 2], [0], [0]>} : vector<2x8x8xf32>, vector<2x8x8xf32>, vector<2x8x8xf32> -> vector<2x8x8xf32>
    "tpu.trace_stop"() : () -> ()
    %257 = tpu.concatenate %205, %222, %239, %256 in 2 : vector<2x8x8xf32>, vector<2x8x8xf32>, vector<2x8x8xf32>, vector<2x8x8xf32> -> vector<2x8x32xf32>
    %258 = vector.shape_cast %257 : vector<2x8x32xf32> to vector<16x32xf32>
    %cst_108 = arith.constant dense<0.000000e+00> : vector<16x32xf32>
    %259 = tpu.matmul %258, %179, %cst_108 {dimension_numbers = #tpu.dot_dimension_numbers<[1], [0], [0], [1], [0, 0, 1, 1], [], []>} : vector<16x32xf32>, vector<32x32xf32>, vector<16x32xf32> -> vector<16x32xf32>
    %260 = vector.broadcast %180 : vector<1x32xf32> to vector<16x32xf32>
    %261 = arith.addf %259, %260 : vector<16x32xf32>
    %262 = vector.shape_cast %261 : vector<16x32xf32> to vector<2x8x32xf32>
    %263 = arith.addf %176, %262 : vector<2x8x32xf32>
    %c0_109 = arith.constant 0 : index
    %c0_110 = arith.constant 0 : index
    %264 = vector.load %arg24[%c0_109, %c0_110] : memref<1x32xf32, #tpu.memory_space<vmem>>, vector<1x32xf32>
    %c0_111 = arith.constant 0 : index
    %c0_112 = arith.constant 0 : index
    %265 = vector.load %arg25[%c0_111, %c0_112] : memref<1x32xf32, #tpu.memory_space<vmem>>, vector<1x32xf32>
    %cst_113 = arith.constant dense<0.000000e+00> : vector<2x8xf32>
    %266 = vector.multi_reduction <add>, %263, %cst_113 [2] : vector<2x8x32xf32> to vector<2x8xf32>
    %267 = vector.shape_cast %266 : vector<2x8xf32> to vector<2x8x1xf32>
    %cst_114 = arith.constant 3.200000e+01 : f32
    %268 = vector.broadcast %cst_114 : f32 to vector<2x8x1xf32>
    %269 = arith.divf %267, %268 : vector<2x8x1xf32>
    %270 = vector.broadcast %269 : vector<2x8x1xf32> to vector<2x8x32xf32>
    %271 = arith.subf %263, %270 : vector<2x8x32xf32>
    %272 = arith.mulf %271, %271 : vector<2x8x32xf32>
    %cst_115 = arith.constant dense<0.000000e+00> : vector<2x8xf32>
    %273 = vector.multi_reduction <add>, %272, %cst_115 [2] : vector<2x8x32xf32> to vector<2x8xf32>
    %274 = vector.shape_cast %273 : vector<2x8xf32> to vector<2x8x1xf32>
    %cst_116 = arith.constant 3.200000e+01 : f32
    %275 = vector.broadcast %cst_116 : f32 to vector<2x8x1xf32>
    %276 = arith.divf %274, %275 : vector<2x8x1xf32>
    %cst_117 = arith.constant 9.99999996E-13 : f32
    %277 = vector.broadcast %cst_117 : f32 to vector<2x8x1xf32>
    %278 = arith.addf %276, %277 : vector<2x8x1xf32>
    %279 = math.rsqrt %278 : vector<2x8x1xf32>
    %280 = vector.broadcast %279 : vector<2x8x1xf32> to vector<2x8x32xf32>
    %281 = arith.mulf %271, %280 : vector<2x8x32xf32>
    %282 = vector.shape_cast %264 : vector<1x32xf32> to vector<1x1x32xf32>
    %283 = vector.broadcast %282 : vector<1x1x32xf32> to vector<2x8x32xf32>
    %284 = arith.mulf %281, %283 : vector<2x8x32xf32>
    %285 = vector.shape_cast %265 : vector<1x32xf32> to vector<1x1x32xf32>
    %286 = vector.broadcast %285 : vector<1x1x32xf32> to vector<2x8x32xf32>
    %287 = arith.addf %284, %286 : vector<2x8x32xf32>
    %288 = vector.shape_cast %287 : vector<2x8x32xf32> to vector<16x32xf32>
    %c0_118 = arith.constant 0 : index
    %c0_119 = arith.constant 0 : index
    %289 = vector.load %arg26[%c0_118, %c0_119] : memref<32x64xf32, #tpu.memory_space<vmem>>, vector<32x64xf32>
    %cst_120 = arith.constant dense<0.000000e+00> : vector<16x64xf32>
    %290 = tpu.matmul %288, %289, %cst_120 {dimension_numbers = #tpu.dot_dimension_numbers<[1], [0], [0], [1], [0, 0, 1, 1], [], []>} : vector<16x32xf32>, vector<32x64xf32>, vector<16x64xf32> -> vector<16x64xf32>
    %c0_121 = arith.constant 0 : index
    %c0_122 = arith.constant 0 : index
    %291 = vector.load %arg27[%c0_121, %c0_122] : memref<1x64xf32, #tpu.memory_space<vmem>>, vector<1x64xf32>
    %292 = vector.broadcast %291 : vector<1x64xf32> to vector<16x64xf32>
    %293 = arith.addf %290, %292 : vector<16x64xf32>
    %294 = arith.mulf %293, %293 : vector<16x64xf32>
    %295 = arith.mulf %293, %294 : vector<16x64xf32>
    %cst_123 = arith.constant 4.471500e-02 : f32
    %296 = vector.broadcast %cst_123 : f32 to vector<16x64xf32>
    %297 = arith.mulf %296, %295 : vector<16x64xf32>
    %298 = arith.addf %293, %297 : vector<16x64xf32>
    %cst_124 = arith.constant 0.797884583 : f32
    %299 = vector.broadcast %cst_124 : f32 to vector<16x64xf32>
    %300 = arith.mulf %299, %298 : vector<16x64xf32>
    %301 = math.tanh %300 : vector<16x64xf32>
    %cst_125 = arith.constant 1.000000e+00 : f32
    %302 = vector.broadcast %cst_125 : f32 to vector<16x64xf32>
    %303 = arith.addf %302, %301 : vector<16x64xf32>
    %cst_126 = arith.constant 5.000000e-01 : f32
    %304 = vector.broadcast %cst_126 : f32 to vector<16x64xf32>
    %305 = arith.mulf %304, %303 : vector<16x64xf32>
    %306 = arith.mulf %293, %305 : vector<16x64xf32>
    %c0_127 = arith.constant 0 : index
    %c0_128 = arith.constant 0 : index
    %307 = vector.load %arg28[%c0_127, %c0_128] : memref<64x32xf32, #tpu.memory_space<vmem>>, vector<64x32xf32>
    %cst_129 = arith.constant dense<0.000000e+00> : vector<16x32xf32>
    %308 = tpu.matmul %306, %307, %cst_129 {dimension_numbers = #tpu.dot_dimension_numbers<[1], [0], [0], [1], [0, 0, 1, 1], [], []>} : vector<16x64xf32>, vector<64x32xf32>, vector<16x32xf32> -> vector<16x32xf32>
    %c0_130 = arith.constant 0 : index
    %c0_131 = arith.constant 0 : index
    %309 = vector.load %arg29[%c0_130, %c0_131] : memref<1x32xf32, #tpu.memory_space<vmem>>, vector<1x32xf32>
    %310 = vector.broadcast %309 : vector<1x32xf32> to vector<16x32xf32>
    %311 = arith.addf %308, %310 : vector<16x32xf32>
    %312 = vector.shape_cast %311 : vector<16x32xf32> to vector<2x8x32xf32>
    %313 = arith.addf %287, %312 : vector<2x8x32xf32>
    %c0_132 = arith.constant 0 : index
    %c0_133 = arith.constant 0 : index
    %314 = vector.load %arg30[%c0_132, %c0_133] : memref<1x32xf32, #tpu.memory_space<vmem>>, vector<1x32xf32>
    %c0_134 = arith.constant 0 : index
    %c0_135 = arith.constant 0 : index
    %315 = vector.load %arg31[%c0_134, %c0_135] : memref<1x32xf32, #tpu.memory_space<vmem>>, vector<1x32xf32>
    %cst_136 = arith.constant dense<0.000000e+00> : vector<2x8xf32>
    %316 = vector.multi_reduction <add>, %313, %cst_136 [2] : vector<2x8x32xf32> to vector<2x8xf32>
    %317 = vector.shape_cast %316 : vector<2x8xf32> to vector<2x8x1xf32>
    %cst_137 = arith.constant 3.200000e+01 : f32
    %318 = vector.broadcast %cst_137 : f32 to vector<2x8x1xf32>
    %319 = arith.divf %317, %318 : vector<2x8x1xf32>
    %320 = vector.broadcast %319 : vector<2x8x1xf32> to vector<2x8x32xf32>
    %321 = arith.subf %313, %320 : vector<2x8x32xf32>
    %322 = arith.mulf %321, %321 : vector<2x8x32xf32>
    %cst_138 = arith.constant dense<0.000000e+00> : vector<2x8xf32>
    %323 = vector.multi_reduction <add>, %322, %cst_138 [2] : vector<2x8x32xf32> to vector<2x8xf32>
    %324 = vector.shape_cast %323 : vector<2x8xf32> to vector<2x8x1xf32>
    %cst_139 = arith.constant 3.200000e+01 : f32
    %325 = vector.broadcast %cst_139 : f32 to vector<2x8x1xf32>
    %326 = arith.divf %324, %325 : vector<2x8x1xf32>
    %cst_140 = arith.constant 9.99999996E-13 : f32
    %327 = vector.broadcast %cst_140 : f32 to vector<2x8x1xf32>
    %328 = arith.addf %326, %327 : vector<2x8x1xf32>
    %329 = math.rsqrt %328 : vector<2x8x1xf32>
    %330 = vector.broadcast %329 : vector<2x8x1xf32> to vector<2x8x32xf32>
    %331 = arith.mulf %321, %330 : vector<2x8x32xf32>
    %332 = vector.shape_cast %314 : vector<1x32xf32> to vector<1x1x32xf32>
    %333 = vector.broadcast %332 : vector<1x1x32xf32> to vector<2x8x32xf32>
    %334 = arith.mulf %331, %333 : vector<2x8x32xf32>
    %335 = vector.shape_cast %315 : vector<1x32xf32> to vector<1x1x32xf32>
    %336 = vector.broadcast %335 : vector<1x1x32xf32> to vector<2x8x32xf32>
    %337 = arith.addf %334, %336 : vector<2x8x32xf32>
    %c0_141 = arith.constant 0 : index
    %c0_142 = arith.constant 0 : index
    %c0_143 = arith.constant 0 : index
    %338 = vector.load %arg12[%c0_141, %c0_142, %c0_143] : memref<1x8x1xf32, #tpu.memory_space<vmem>>, vector<1x8x1xf32>
    %339 = vector.broadcast %338 : vector<1x8x1xf32> to vector<2x8x32xf32>
    %340 = arith.mulf %337, %339 : vector<2x8x32xf32>
    %c0_144 = arith.constant 0 : index
    %c0_145 = arith.constant 0 : index
    %c0_146 = arith.constant 0 : index
    %341 = vector.load %arg13[%c0_144, %c0_145, %c0_146] : memref<1x8x1xf32, #tpu.memory_space<vmem>>, vector<1x8x1xf32>
    %342 = vector.broadcast %341 : vector<1x8x1xf32> to vector<2x8x32xf32>
    %343 = arith.addf %340, %342 : vector<2x8x32xf32>
    %344 = arith.addf %337, %343 : vector<2x8x32xf32>
    "tpu.trace_start"() <{level = 10 : i32, message = "bqd,bkd->bqk"}> : () -> ()
    %cst_147 = arith.constant dense<0.000000e+00> : vector<2x8x8xf32>
    %345 = tpu.matmul %127, %344, %cst_147 {dimension_numbers = #tpu.dot_dimension_numbers<[2], [2], [1], [1], [0, 0, 0, 1, 1, 1], [0], [0]>} : vector<2x8x32xf32>, vector<2x8x32xf32>, vector<2x8x8xf32> -> vector<2x8x8xf32>
    "tpu.trace_stop"() : () -> ()
    %346 = tpu.transpose %345, [0, 2, 1] : vector<2x8x8xf32> -> vector<2x8x8xf32>
    %cst_148 = arith.constant dense<0xFF800000> : vector<2x8xf32>
    %347 = vector.multi_reduction <maximumf>, %345, %cst_148 [2] : vector<2x8x8xf32> to vector<2x8xf32>
    %348 = vector.shape_cast %347 : vector<2x8xf32> to vector<2x8x1xf32>
    %349 = vector.broadcast %348 : vector<2x8x1xf32> to vector<2x8x8xf32>
    %350 = arith.subf %345, %349 : vector<2x8x8xf32>
    %351 = math.exp %350 : vector<2x8x8xf32>
    %cst_149 = arith.constant dense<0.000000e+00> : vector<2x8xf32>
    %352 = vector.multi_reduction <add>, %351, %cst_149 [2] : vector<2x8x8xf32> to vector<2x8xf32>
    %353 = vector.shape_cast %352 : vector<2x8xf32> to vector<2x8x1xf32>
    %354 = vector.broadcast %353 : vector<2x8x1xf32> to vector<2x8x8xf32>
    %355 = arith.divf %351, %354 : vector<2x8x8xf32>
    %cst_150 = arith.constant dense<0xFF800000> : vector<2x8xf32>
    %356 = vector.multi_reduction <maximumf>, %346, %cst_150 [2] : vector<2x8x8xf32> to vector<2x8xf32>
    %357 = vector.shape_cast %356 : vector<2x8xf32> to vector<2x8x1xf32>
    %358 = vector.broadcast %357 : vector<2x8x1xf32> to vector<2x8x8xf32>
    %359 = arith.subf %346, %358 : vector<2x8x8xf32>
    %360 = math.exp %359 : vector<2x8x8xf32>
    %cst_151 = arith.constant dense<0.000000e+00> : vector<2x8xf32>
    %361 = vector.multi_reduction <add>, %360, %cst_151 [2] : vector<2x8x8xf32> to vector<2x8xf32>
    %362 = vector.shape_cast %361 : vector<2x8xf32> to vector<2x8x1xf32>
    %363 = vector.broadcast %362 : vector<2x8x1xf32> to vector<2x8x8xf32>
    %364 = arith.divf %360, %363 : vector<2x8x8xf32>
    %c0_152 = arith.constant 0 : index
    %c0_153 = arith.constant 0 : index
    %c0_154 = arith.constant 0 : index
    %365 = vector.load %arg54[%c0_152, %c0_153, %c0_154] : memref<2x8x8xf32, #tpu.memory_space<vmem>>, vector<2x8x8xf32>
    tpu.vector_store %arg54[%c0_152, %c0_153, %c0_154], %355 {strides = array<i32>} : memref<2x8x8xf32, #tpu.memory_space<vmem>>, vector<2x8x8xf32>,
    %c0_155 = arith.constant 0 : index
    %c0_156 = arith.constant 0 : index
    %c0_157 = arith.constant 0 : index
    %366 = vector.load %arg55[%c0_155, %c0_156, %c0_157] : memref<2x8x8xf32, #tpu.memory_space<vmem>>, vector<2x8x8xf32>
    tpu.vector_store %arg55[%c0_155, %c0_156, %c0_157], %364 {strides = array<i32>} : memref<2x8x8xf32, #tpu.memory_space<vmem>>, vector<2x8x8xf32>,
    "tpu.trace_start"() <{level = 10 : i32, message = "bqk,bkd->bqd"}> : () -> ()
    %cst_158 = arith.constant dense<0.000000e+00> : vector<2x8x32xf32>
    %367 = tpu.matmul %355, %344, %cst_158 {dimension_numbers = #tpu.dot_dimension_numbers<[2], [1], [1], [2], [0, 0, 0, 1, 1, 2], [0], [0]>} : vector<2x8x8xf32>, vector<2x8x32xf32>, vector<2x8x32xf32> -> vector<2x8x32xf32>
    %cst_159 = arith.constant dense<0.000000e+00> : vector<2x8x32xf32>
    %368 = tpu.matmul %364, %127, %cst_159 {dimension_numbers = #tpu.dot_dimension_numbers<[2], [1], [1], [2], [0, 0, 0, 1, 1, 2], [0], [0]>} : vector<2x8x8xf32>, vector<2x8x32xf32>, vector<2x8x32xf32> -> vector<2x8x32xf32>
    "tpu.trace_stop"() : () -> ()
    %369 = arith.subf %127, %367 : vector<2x8x32xf32>
    %370 = arith.mulf %127, %367 : vector<2x8x32xf32>
    %371 = tpu.concatenate %127, %367, %369, %370 in 2 : vector<2x8x32xf32>, vector<2x8x32xf32>, vector<2x8x32xf32>, vector<2x8x32xf32> -> vector<2x8x128xf32>
    %372 = arith.subf %344, %368 : vector<2x8x32xf32>
    %373 = arith.mulf %344, %368 : vector<2x8x32xf32>
    %374 = tpu.concatenate %344, %368, %372, %373 in 2 : vector<2x8x32xf32>, vector<2x8x32xf32>, vector<2x8x32xf32>, vector<2x8x32xf32> -> vector<2x8x128xf32>
    %375 = vector.shape_cast %371 : vector<2x8x128xf32> to vector<16x128xf32>
    %c0_160 = arith.constant 0 : index
    %c0_161 = arith.constant 0 : index
    %376 = vector.load %arg32[%c0_160, %c0_161] : memref<128x64xf32, #tpu.memory_space<vmem>>, vector<128x64xf32>
    %cst_162 = arith.constant dense<0.000000e+00> : vector<16x64xf32>
    %377 = tpu.matmul %375, %376, %cst_162 {dimension_numbers = #tpu.dot_dimension_numbers<[1], [0], [0], [1], [0, 0, 1, 1], [], []>} : vector<16x128xf32>, vector<128x64xf32>, vector<16x64xf32> -> vector<16x64xf32>
    %c0_163 = arith.constant 0 : index
    %c0_164 = arith.constant 0 : index
    %378 = vector.load %arg33[%c0_163, %c0_164] : memref<1x64xf32, #tpu.memory_space<vmem>>, vector<1x64xf32>
    %379 = vector.broadcast %378 : vector<1x64xf32> to vector<16x64xf32>
    %380 = arith.addf %377, %379 : vector<16x64xf32>
    %cst_165 = arith.constant 0.000000e+00 : f32
    %381 = vector.broadcast %cst_165 : f32 to vector<16x64xf32>
    %382 = arith.maximumf %380, %381 : vector<16x64xf32>
    %c0_166 = arith.constant 0 : index
    %c0_167 = arith.constant 0 : index
    %383 = vector.load %arg34[%c0_166, %c0_167] : memref<64x32xf32, #tpu.memory_space<vmem>>, vector<64x32xf32>
    %cst_168 = arith.constant dense<0.000000e+00> : vector<16x32xf32>
    %384 = tpu.matmul %382, %383, %cst_168 {dimension_numbers = #tpu.dot_dimension_numbers<[1], [0], [0], [1], [0, 0, 1, 1], [], []>} : vector<16x64xf32>, vector<64x32xf32>, vector<16x32xf32> -> vector<16x32xf32>
    %c0_169 = arith.constant 0 : index
    %c0_170 = arith.constant 0 : index
    %385 = vector.load %arg35[%c0_169, %c0_170] : memref<1x32xf32, #tpu.memory_space<vmem>>, vector<1x32xf32>
    %386 = vector.broadcast %385 : vector<1x32xf32> to vector<16x32xf32>
    %387 = arith.addf %384, %386 : vector<16x32xf32>
    %cst_171 = arith.constant 0.000000e+00 : f32
    %388 = vector.broadcast %cst_171 : f32 to vector<16x32xf32>
    %389 = arith.maximumf %387, %388 : vector<16x32xf32>
    %390 = vector.shape_cast %389 : vector<16x32xf32> to vector<2x8x32xf32>
    %391 = vector.shape_cast %374 : vector<2x8x128xf32> to vector<16x128xf32>
    %c0_172 = arith.constant 0 : index
    %c0_173 = arith.constant 0 : index
    %392 = vector.load %arg32[%c0_172, %c0_173] : memref<128x64xf32, #tpu.memory_space<vmem>>, vector<128x64xf32>
    %cst_174 = arith.constant dense<0.000000e+00> : vector<16x64xf32>
    %393 = tpu.matmul %391, %392, %cst_174 {dimension_numbers = #tpu.dot_dimension_numbers<[1], [0], [0], [1], [0, 0, 1, 1], [], []>} : vector<16x128xf32>, vector<128x64xf32>, vector<16x64xf32> -> vector<16x64xf32>
    %c0_175 = arith.constant 0 : index
    %c0_176 = arith.constant 0 : index
    %394 = vector.load %arg33[%c0_175, %c0_176] : memref<1x64xf32, #tpu.memory_space<vmem>>, vector<1x64xf32>
    %395 = vector.broadcast %394 : vector<1x64xf32> to vector<16x64xf32>
    %396 = arith.addf %393, %395 : vector<16x64xf32>
    %cst_177 = arith.constant 0.000000e+00 : f32
    %397 = vector.broadcast %cst_177 : f32 to vector<16x64xf32>
    %398 = arith.maximumf %396, %397 : vector<16x64xf32>
    %c0_178 = arith.constant 0 : index
    %c0_179 = arith.constant 0 : index
    %399 = vector.load %arg34[%c0_178, %c0_179] : memref<64x32xf32, #tpu.memory_space<vmem>>, vector<64x32xf32>
    %cst_180 = arith.constant dense<0.000000e+00> : vector<16x32xf32>
    %400 = tpu.matmul %398, %399, %cst_180 {dimension_numbers = #tpu.dot_dimension_numbers<[1], [0], [0], [1], [0, 0, 1, 1], [], []>} : vector<16x64xf32>, vector<64x32xf32>, vector<16x32xf32> -> vector<16x32xf32>
    %c0_181 = arith.constant 0 : index
    %c0_182 = arith.constant 0 : index
    %401 = vector.load %arg35[%c0_181, %c0_182] : memref<1x32xf32, #tpu.memory_space<vmem>>, vector<1x32xf32>
    %402 = vector.broadcast %401 : vector<1x32xf32> to vector<16x32xf32>
    %403 = arith.addf %400, %402 : vector<16x32xf32>
    %cst_183 = arith.constant 0.000000e+00 : f32
    %404 = vector.broadcast %cst_183 : f32 to vector<16x32xf32>
    %405 = arith.maximumf %403, %404 : vector<16x32xf32>
    %406 = vector.shape_cast %405 : vector<16x32xf32> to vector<2x8x32xf32>
    %c0_184 = arith.constant 0 : index
    %c0_185 = arith.constant 0 : index
    %c0_186 = arith.constant 0 : index
    %407 = vector.load %arg10[%c0_184, %c0_185, %c0_186] : memref<1x8x1xf32, #tpu.memory_space<vmem>>, vector<1x8x1xf32>
    %c0_187 = arith.constant 0 : index
    %c0_188 = arith.constant 0 : index
    %c0_189 = arith.constant 0 : index
    %408 = vector.load %arg11[%c0_187, %c0_188, %c0_189] : memref<1x8x1xf32, #tpu.memory_space<vmem>>, vector<1x8x1xf32>
    %c0_190 = arith.constant 0 : index
    %c0_191 = arith.constant 0 : index
    %409 = vector.load %arg36[%c0_190, %c0_191] : memref<32x96xf32, #tpu.memory_space<vmem>>, vector<32x96xf32>
    %c0_192 = arith.constant 0 : index
    %c0_193 = arith.constant 0 : index
    %410 = vector.load %arg37[%c0_192, %c0_193] : memref<1x96xf32, #tpu.memory_space<vmem>>, vector<1x96xf32>
    %c0_194 = arith.constant 0 : index
    %c0_195 = arith.constant 0 : index
    %411 = vector.load %arg38[%c0_194, %c0_195] : memref<32x32xf32, #tpu.memory_space<vmem>>, vector<32x32xf32>
    %c0_196 = arith.constant 0 : index
    %c0_197 = arith.constant 0 : index
    %412 = vector.load %arg39[%c0_196, %c0_197] : memref<1x32xf32, #tpu.memory_space<vmem>>, vector<1x32xf32>
    %413 = vector.broadcast %407 : vector<1x8x1xf32> to vector<2x8x32xf32>
    %414 = arith.mulf %390, %413 : vector<2x8x32xf32>
    %415 = vector.broadcast %408 : vector<1x8x1xf32> to vector<2x8x32xf32>
    %416 = arith.addf %414, %415 : vector<2x8x32xf32>
    %417 = vector.shape_cast %416 : vector<2x8x32xf32> to vector<16x32xf32>
    %cst_198 = arith.constant dense<0.000000e+00> : vector<16x96xf32>
    %418 = tpu.matmul %417, %409, %cst_198 {dimension_numbers = #tpu.dot_dimension_numbers<[1], [0], [0], [1], [0, 0, 1, 1], [], []>} : vector<16x32xf32>, vector<32x96xf32>, vector<16x96xf32> -> vector<16x96xf32>
    %419 = vector.broadcast %410 : vector<1x96xf32> to vector<16x96xf32>
    %420 = arith.addf %418, %419 : vector<16x96xf32>
    %421 = vector.shape_cast %420 : vector<16x96xf32> to vector<2x8x96xf32>
    %422 = vector.extract_strided_slice %421 {offsets = [0, 0, 0], sizes = [2, 8, 32], strides = [1, 1, 1]} : vector<2x8x96xf32> to vector<2x8x32xf32>
    %423 = vector.extract_strided_slice %421 {offsets = [0, 0, 32], sizes = [2, 8, 32], strides = [1, 1, 1]} : vector<2x8x96xf32> to vector<2x8x32xf32>
    %424 = vector.extract_strided_slice %421 {offsets = [0, 0, 64], sizes = [2, 8, 32], strides = [1, 1, 1]} : vector<2x8x96xf32> to vector<2x8x32xf32>
    %425 = vector.extract_strided_slice %422 {offsets = [0, 0, 0], sizes = [2, 8, 8], strides = [1, 1, 1]} : vector<2x8x32xf32> to vector<2x8x8xf32>
    %426 = vector.extract_strided_slice %423 {offsets = [0, 0, 0], sizes = [2, 8, 8], strides = [1, 1, 1]} : vector<2x8x32xf32> to vector<2x8x8xf32>
    "tpu.trace_start"() <{level = 10 : i32, message = "bqd,bkd->bqk"}> : () -> ()
    %cst_199 = arith.constant dense<0.000000e+00> : vector<2x8x8xf32>
    %427 = tpu.matmul %425, %426, %cst_199 {dimension_numbers = #tpu.dot_dimension_numbers<[2], [2], [1], [1], [0, 0, 0, 1, 1, 1], [0], [0]>} : vector<2x8x8xf32>, vector<2x8x8xf32>, vector<2x8x8xf32> -> vector<2x8x8xf32>
    "tpu.trace_stop"() : () -> ()
    %cst_200 = arith.constant 0.353553385 : f32
    %428 = vector.broadcast %cst_200 : f32 to vector<2x8x8xf32>
    %429 = arith.mulf %427, %428 : vector<2x8x8xf32>
    %cst_201 = arith.constant dense<0xFF800000> : vector<2x8xf32>
    %430 = vector.multi_reduction <maximumf>, %429, %cst_201 [2] : vector<2x8x8xf32> to vector<2x8xf32>
    %431 = vector.shape_cast %430 : vector<2x8xf32> to vector<2x8x1xf32>
    %432 = vector.broadcast %431 : vector<2x8x1xf32> to vector<2x8x8xf32>
    %433 = arith.subf %429, %432 : vector<2x8x8xf32>
    %434 = math.exp %433 : vector<2x8x8xf32>
    %cst_202 = arith.constant dense<0.000000e+00> : vector<2x8xf32>
    %435 = vector.multi_reduction <add>, %434, %cst_202 [2] : vector<2x8x8xf32> to vector<2x8xf32>
    %436 = vector.shape_cast %435 : vector<2x8xf32> to vector<2x8x1xf32>
    %437 = vector.broadcast %436 : vector<2x8x1xf32> to vector<2x8x8xf32>
    %438 = arith.divf %434, %437 : vector<2x8x8xf32>
    %439 = vector.extract_strided_slice %424 {offsets = [0, 0, 0], sizes = [2, 8, 8], strides = [1, 1, 1]} : vector<2x8x32xf32> to vector<2x8x8xf32>
    "tpu.trace_start"() <{level = 10 : i32, message = "bqk,bkd->bqd"}> : () -> ()
    %cst_203 = arith.constant dense<0.000000e+00> : vector<2x8x8xf32>
    %440 = tpu.matmul %438, %439, %cst_203 {dimension_numbers = #tpu.dot_dimension_numbers<[2], [1], [1], [2], [0, 0, 0, 1, 1, 2], [0], [0]>} : vector<2x8x8xf32>, vector<2x8x8xf32>, vector<2x8x8xf32> -> vector<2x8x8xf32>
    "tpu.trace_stop"() : () -> ()
    %441 = vector.extract_strided_slice %422 {offsets = [0, 0, 8], sizes = [2, 8, 8], strides = [1, 1, 1]} : vector<2x8x32xf32> to vector<2x8x8xf32>
    %442 = vector.extract_strided_slice %423 {offsets = [0, 0, 8], sizes = [2, 8, 8], strides = [1, 1, 1]} : vector<2x8x32xf32> to vector<2x8x8xf32>
    "tpu.trace_start"() <{level = 10 : i32, message = "bqd,bkd->bqk"}> : () -> ()
    %cst_204 = arith.constant dense<0.000000e+00> : vector<2x8x8xf32>
    %443 = tpu.matmul %441, %442, %cst_204 {dimension_numbers = #tpu.dot_dimension_numbers<[2], [2], [1], [1], [0, 0, 0, 1, 1, 1], [0], [0]>} : vector<2x8x8xf32>, vector<2x8x8xf32>, vector<2x8x8xf32> -> vector<2x8x8xf32>
    "tpu.trace_stop"() : () -> ()
    %cst_205 = arith.constant 0.353553385 : f32
    %444 = vector.broadcast %cst_205 : f32 to vector<2x8x8xf32>
    %445 = arith.mulf %443, %444 : vector<2x8x8xf32>
    %cst_206 = arith.constant dense<0xFF800000> : vector<2x8xf32>
    %446 = vector.multi_reduction <maximumf>, %445, %cst_206 [2] : vector<2x8x8xf32> to vector<2x8xf32>
    %447 = vector.shape_cast %446 : vector<2x8xf32> to vector<2x8x1xf32>
    %448 = vector.broadcast %447 : vector<2x8x1xf32> to vector<2x8x8xf32>
    %449 = arith.subf %445, %448 : vector<2x8x8xf32>
    %450 = math.exp %449 : vector<2x8x8xf32>
    %cst_207 = arith.constant dense<0.000000e+00> : vector<2x8xf32>
    %451 = vector.multi_reduction <add>, %450, %cst_207 [2] : vector<2x8x8xf32> to vector<2x8xf32>
    %452 = vector.shape_cast %451 : vector<2x8xf32> to vector<2x8x1xf32>
    %453 = vector.broadcast %452 : vector<2x8x1xf32> to vector<2x8x8xf32>
    %454 = arith.divf %450, %453 : vector<2x8x8xf32>
    %455 = vector.extract_strided_slice %424 {offsets = [0, 0, 8], sizes = [2, 8, 8], strides = [1, 1, 1]} : vector<2x8x32xf32> to vector<2x8x8xf32>
    "tpu.trace_start"() <{level = 10 : i32, message = "bqk,bkd->bqd"}> : () -> ()
    %cst_208 = arith.constant dense<0.000000e+00> : vector<2x8x8xf32>
    %456 = tpu.matmul %454, %455, %cst_208 {dimension_numbers = #tpu.dot_dimension_numbers<[2], [1], [1], [2], [0, 0, 0, 1, 1, 2], [0], [0]>} : vector<2x8x8xf32>, vector<2x8x8xf32>, vector<2x8x8xf32> -> vector<2x8x8xf32>
    "tpu.trace_stop"() : () -> ()
    %457 = vector.extract_strided_slice %422 {offsets = [0, 0, 16], sizes = [2, 8, 8], strides = [1, 1, 1]} : vector<2x8x32xf32> to vector<2x8x8xf32>
    %458 = vector.extract_strided_slice %423 {offsets = [0, 0, 16], sizes = [2, 8, 8], strides = [1, 1, 1]} : vector<2x8x32xf32> to vector<2x8x8xf32>
    "tpu.trace_start"() <{level = 10 : i32, message = "bqd,bkd->bqk"}> : () -> ()
    %cst_209 = arith.constant dense<0.000000e+00> : vector<2x8x8xf32>
    %459 = tpu.matmul %457, %458, %cst_209 {dimension_numbers = #tpu.dot_dimension_numbers<[2], [2], [1], [1], [0, 0, 0, 1, 1, 1], [0], [0]>} : vector<2x8x8xf32>, vector<2x8x8xf32>, vector<2x8x8xf32> -> vector<2x8x8xf32>
    "tpu.trace_stop"() : () -> ()
    %cst_210 = arith.constant 0.353553385 : f32
    %460 = vector.broadcast %cst_210 : f32 to vector<2x8x8xf32>
    %461 = arith.mulf %459, %460 : vector<2x8x8xf32>
    %cst_211 = arith.constant dense<0xFF800000> : vector<2x8xf32>
    %462 = vector.multi_reduction <maximumf>, %461, %cst_211 [2] : vector<2x8x8xf32> to vector<2x8xf32>
    %463 = vector.shape_cast %462 : vector<2x8xf32> to vector<2x8x1xf32>
    %464 = vector.broadcast %463 : vector<2x8x1xf32> to vector<2x8x8xf32>
    %465 = arith.subf %461, %464 : vector<2x8x8xf32>
    %466 = math.exp %465 : vector<2x8x8xf32>
    %cst_212 = arith.constant dense<0.000000e+00> : vector<2x8xf32>
    %467 = vector.multi_reduction <add>, %466, %cst_212 [2] : vector<2x8x8xf32> to vector<2x8xf32>
    %468 = vector.shape_cast %467 : vector<2x8xf32> to vector<2x8x1xf32>
    %469 = vector.broadcast %468 : vector<2x8x1xf32> to vector<2x8x8xf32>
    %470 = arith.divf %466, %469 : vector<2x8x8xf32>
    %471 = vector.extract_strided_slice %424 {offsets = [0, 0, 16], sizes = [2, 8, 8], strides = [1, 1, 1]} : vector<2x8x32xf32> to vector<2x8x8xf32>
    "tpu.trace_start"() <{level = 10 : i32, message = "bqk,bkd->bqd"}> : () -> ()
    %cst_213 = arith.constant dense<0.000000e+00> : vector<2x8x8xf32>
    %472 = tpu.matmul %470, %471, %cst_213 {dimension_numbers = #tpu.dot_dimension_numbers<[2], [1], [1], [2], [0, 0, 0, 1, 1, 2], [0], [0]>} : vector<2x8x8xf32>, vector<2x8x8xf32>, vector<2x8x8xf32> -> vector<2x8x8xf32>
    "tpu.trace_stop"() : () -> ()
    %473 = vector.extract_strided_slice %422 {offsets = [0, 0, 24], sizes = [2, 8, 8], strides = [1, 1, 1]} : vector<2x8x32xf32> to vector<2x8x8xf32>
    %474 = vector.extract_strided_slice %423 {offsets = [0, 0, 24], sizes = [2, 8, 8], strides = [1, 1, 1]} : vector<2x8x32xf32> to vector<2x8x8xf32>
    "tpu.trace_start"() <{level = 10 : i32, message = "bqd,bkd->bqk"}> : () -> ()
    %cst_214 = arith.constant dense<0.000000e+00> : vector<2x8x8xf32>
    %475 = tpu.matmul %473, %474, %cst_214 {dimension_numbers = #tpu.dot_dimension_numbers<[2], [2], [1], [1], [0, 0, 0, 1, 1, 1], [0], [0]>} : vector<2x8x8xf32>, vector<2x8x8xf32>, vector<2x8x8xf32> -> vector<2x8x8xf32>
    "tpu.trace_stop"() : () -> ()
    %cst_215 = arith.constant 0.353553385 : f32
    %476 = vector.broadcast %cst_215 : f32 to vector<2x8x8xf32>
    %477 = arith.mulf %475, %476 : vector<2x8x8xf32>
    %cst_216 = arith.constant dense<0xFF800000> : vector<2x8xf32>
    %478 = vector.multi_reduction <maximumf>, %477, %cst_216 [2] : vector<2x8x8xf32> to vector<2x8xf32>
    %479 = vector.shape_cast %478 : vector<2x8xf32> to vector<2x8x1xf32>
    %480 = vector.broadcast %479 : vector<2x8x1xf32> to vector<2x8x8xf32>
    %481 = arith.subf %477, %480 : vector<2x8x8xf32>
    %482 = math.exp %481 : vector<2x8x8xf32>
    %cst_217 = arith.constant dense<0.000000e+00> : vector<2x8xf32>
    %483 = vector.multi_reduction <add>, %482, %cst_217 [2] : vector<2x8x8xf32> to vector<2x8xf32>
    %484 = vector.shape_cast %483 : vector<2x8xf32> to vector<2x8x1xf32>
    %485 = vector.broadcast %484 : vector<2x8x1xf32> to vector<2x8x8xf32>
    %486 = arith.divf %482, %485 : vector<2x8x8xf32>
    %487 = vector.extract_strided_slice %424 {offsets = [0, 0, 24], sizes = [2, 8, 8], strides = [1, 1, 1]} : vector<2x8x32xf32> to vector<2x8x8xf32>
    "tpu.trace_start"() <{level = 10 : i32, message = "bqk,bkd->bqd"}> : () -> ()
    %cst_218 = arith.constant dense<0.000000e+00> : vector<2x8x8xf32>
    %488 = tpu.matmul %486, %487, %cst_218 {dimension_numbers = #tpu.dot_dimension_numbers<[2], [1], [1], [2], [0, 0, 0, 1, 1, 2], [0], [0]>} : vector<2x8x8xf32>, vector<2x8x8xf32>, vector<2x8x8xf32> -> vector<2x8x8xf32>
    "tpu.trace_stop"() : () -> ()
    %489 = tpu.concatenate %440, %456, %472, %488 in 2 : vector<2x8x8xf32>, vector<2x8x8xf32>, vector<2x8x8xf32>, vector<2x8x8xf32> -> vector<2x8x32xf32>
    %490 = vector.shape_cast %489 : vector<2x8x32xf32> to vector<16x32xf32>
    %cst_219 = arith.constant dense<0.000000e+00> : vector<16x32xf32>
    %491 = tpu.matmul %490, %411, %cst_219 {dimension_numbers = #tpu.dot_dimension_numbers<[1], [0], [0], [1], [0, 0, 1, 1], [], []>} : vector<16x32xf32>, vector<32x32xf32>, vector<16x32xf32> -> vector<16x32xf32>
    %492 = vector.broadcast %412 : vector<1x32xf32> to vector<16x32xf32>
    %493 = arith.addf %491, %492 : vector<16x32xf32>
    %494 = vector.shape_cast %493 : vector<16x32xf32> to vector<2x8x32xf32>
    %495 = arith.addf %416, %494 : vector<2x8x32xf32>
    %cst_220 = arith.constant dense<0.000000e+00> : vector<2x8xf32>
    %496 = vector.multi_reduction <add>, %495, %cst_220 [2] : vector<2x8x32xf32> to vector<2x8xf32>
    %497 = vector.shape_cast %496 : vector<2x8xf32> to vector<2x8x1xf32>
    %cst_221 = arith.constant 3.200000e+01 : f32
    %498 = vector.broadcast %cst_221 : f32 to vector<2x8x1xf32>
    %499 = arith.divf %497, %498 : vector<2x8x1xf32>
    %500 = vector.broadcast %499 : vector<2x8x1xf32> to vector<2x8x32xf32>
    %501 = arith.subf %495, %500 : vector<2x8x32xf32>
    %502 = arith.mulf %501, %501 : vector<2x8x32xf32>
    %cst_222 = arith.constant dense<0.000000e+00> : vector<2x8xf32>
    %503 = vector.multi_reduction <add>, %502, %cst_222 [2] : vector<2x8x32xf32> to vector<2x8xf32>
    %504 = vector.shape_cast %503 : vector<2x8xf32> to vector<2x8x1xf32>
    %cst_223 = arith.constant 3.200000e+01 : f32
    %505 = vector.broadcast %cst_223 : f32 to vector<2x8x1xf32>
    %506 = arith.divf %504, %505 : vector<2x8x1xf32>
    %cst_224 = arith.constant 9.99999974E-6 : f32
    %507 = vector.broadcast %cst_224 : f32 to vector<2x8x1xf32>
    %508 = arith.addf %506, %507 : vector<2x8x1xf32>
    %509 = math.rsqrt %508 : vector<2x8x1xf32>
    %510 = vector.broadcast %509 : vector<2x8x1xf32> to vector<2x8x32xf32>
    %511 = arith.mulf %501, %510 : vector<2x8x32xf32>
    %512 = vector.shape_cast %0 : vector<1x32xf32> to vector<1x1x32xf32>
    %513 = vector.broadcast %512 : vector<1x1x32xf32> to vector<2x8x32xf32>
    %514 = arith.mulf %511, %513 : vector<2x8x32xf32>
    %515 = vector.shape_cast %1 : vector<1x32xf32> to vector<1x1x32xf32>
    %516 = vector.broadcast %515 : vector<1x1x32xf32> to vector<2x8x32xf32>
    %517 = arith.addf %514, %516 : vector<2x8x32xf32>
    %518 = vector.shape_cast %517 : vector<2x8x32xf32> to vector<16x32xf32>
    %c0_225 = arith.constant 0 : index
    %c0_226 = arith.constant 0 : index
    %519 = vector.load %arg44[%c0_225, %c0_226] : memref<32x32xf32, #tpu.memory_space<vmem>>, vector<32x32xf32>
    %cst_227 = arith.constant dense<0.000000e+00> : vector<16x32xf32>
    %520 = tpu.matmul %518, %519, %cst_227 {dimension_numbers = #tpu.dot_dimension_numbers<[1], [0], [0], [1], [0, 0, 1, 1], [], []>} : vector<16x32xf32>, vector<32x32xf32>, vector<16x32xf32> -> vector<16x32xf32>
    %c0_228 = arith.constant 0 : index
    %c0_229 = arith.constant 0 : index
    %521 = vector.load %arg45[%c0_228, %c0_229] : memref<1x32xf32, #tpu.memory_space<vmem>>, vector<1x32xf32>
    %522 = vector.broadcast %521 : vector<1x32xf32> to vector<16x32xf32>
    %523 = arith.addf %520, %522 : vector<16x32xf32>
    %524 = math.tanh %523 : vector<16x32xf32>
    %525 = vector.shape_cast %524 : vector<16x32xf32> to vector<2x8x32xf32>
    %c0_230 = arith.constant 0 : index
    %c0_231 = arith.constant 0 : index
    %526 = vector.load %arg46[%c0_230, %c0_231] : memref<1x32xf32, #tpu.memory_space<vmem>>, vector<1x32xf32>
    %527 = vector.shape_cast %526 : vector<1x32xf32> to vector<1x1x32xf32>
    %528 = vector.broadcast %527 : vector<1x1x32xf32> to vector<2x8x32xf32>
    %529 = arith.mulf %525, %528 : vector<2x8x32xf32>
    %cst_232 = arith.constant dense<0.000000e+00> : vector<2x8xf32>
    %530 = vector.multi_reduction <add>, %529, %cst_232 [2] : vector<2x8x32xf32> to vector<2x8xf32>
    %c0_233 = arith.constant 0 : index
    %c0_234 = arith.constant 0 : index
    %531 = vector.load %arg47[%c0_233, %c0_234] : memref<1x1xf32, #tpu.memory_space<vmem>>, vector<1x1xf32>
    %532 = vector.broadcast %531 : vector<1x1xf32> to vector<2x8xf32>
    %533 = arith.addf %530, %532 : vector<2x8xf32>
    %cst_235 = arith.constant dense<0xFF800000> : vector<2xf32>
    %534 = vector.multi_reduction <maximumf>, %533, %cst_235 [1] : vector<2x8xf32> to vector<2xf32>
    %535 = vector.shape_cast %534 : vector<2xf32> to vector<2x1xf32>
    %536 = vector.broadcast %535 : vector<2x1xf32> to vector<2x8xf32>
    %537 = arith.subf %533, %536 : vector<2x8xf32>
    %538 = math.exp %537 : vector<2x8xf32>
    %cst_236 = arith.constant dense<0.000000e+00> : vector<2xf32>
    %539 = vector.multi_reduction <add>, %538, %cst_236 [1] : vector<2x8xf32> to vector<2xf32>
    %540 = vector.shape_cast %539 : vector<2xf32> to vector<2x1xf32>
    %541 = vector.broadcast %540 : vector<2x1xf32> to vector<2x8xf32>
    %542 = arith.divf %538, %541 : vector<2x8xf32>
    %543 = vector.extract_strided_slice %542 {offsets = [0, 0], sizes = [1, 8], strides = [1, 1]} : vector<2x8xf32> to vector<1x8xf32>
    %544 = vector.extract_strided_slice %517 {offsets = [0, 0, 0], sizes = [1, 8, 32], strides = [1, 1, 1]} : vector<2x8x32xf32> to vector<1x8x32xf32>
    %545 = vector.shape_cast %544 : vector<1x8x32xf32> to vector<8x32xf32>
    %cst_237 = arith.constant dense<0.000000e+00> : vector<1x32xf32>
    %546 = tpu.matmul %543, %545, %cst_237 {dimension_numbers = #tpu.dot_dimension_numbers<[1], [0], [0], [1], [0, 0, 1, 1], [], []>} : vector<1x8xf32>, vector<8x32xf32>, vector<1x32xf32> -> vector<1x32xf32>
    %547 = vector.extract_strided_slice %542 {offsets = [1, 0], sizes = [1, 8], strides = [1, 1]} : vector<2x8xf32> to vector<1x8xf32>
    %548 = vector.extract_strided_slice %517 {offsets = [1, 0, 0], sizes = [1, 8, 32], strides = [1, 1, 1]} : vector<2x8x32xf32> to vector<1x8x32xf32>
    %549 = vector.shape_cast %548 : vector<1x8x32xf32> to vector<8x32xf32>
    %cst_238 = arith.constant dense<0.000000e+00> : vector<1x32xf32>
    %550 = tpu.matmul %547, %549, %cst_238 {dimension_numbers = #tpu.dot_dimension_numbers<[1], [0], [0], [1], [0, 0, 1, 1], [], []>} : vector<1x8xf32>, vector<8x32xf32>, vector<1x32xf32> -> vector<1x32xf32>
    %551 = tpu.concatenate %546, %550 in 0 : vector<1x32xf32>, vector<1x32xf32> -> vector<2x32xf32>
    %c0_239 = arith.constant 0 : index
    %c0_240 = arith.constant 0 : index
    %c0_241 = arith.constant 0 : index
    %552 = vector.load %arg12[%c0_239, %c0_240, %c0_241] : memref<1x8x1xf32, #tpu.memory_space<vmem>>, vector<1x8x1xf32>
    %c0_242 = arith.constant 0 : index
    %c0_243 = arith.constant 0 : index
    %c0_244 = arith.constant 0 : index
    %553 = vector.load %arg13[%c0_242, %c0_243, %c0_244] : memref<1x8x1xf32, #tpu.memory_space<vmem>>, vector<1x8x1xf32>
    %c0_245 = arith.constant 0 : index
    %c0_246 = arith.constant 0 : index
    %554 = vector.load %arg40[%c0_245, %c0_246] : memref<32x96xf32, #tpu.memory_space<vmem>>, vector<32x96xf32>
    %c0_247 = arith.constant 0 : index
    %c0_248 = arith.constant 0 : index
    %555 = vector.load %arg41[%c0_247, %c0_248] : memref<1x96xf32, #tpu.memory_space<vmem>>, vector<1x96xf32>
    %c0_249 = arith.constant 0 : index
    %c0_250 = arith.constant 0 : index
    %556 = vector.load %arg42[%c0_249, %c0_250] : memref<32x32xf32, #tpu.memory_space<vmem>>, vector<32x32xf32>
    %c0_251 = arith.constant 0 : index
    %c0_252 = arith.constant 0 : index
    %557 = vector.load %arg43[%c0_251, %c0_252] : memref<1x32xf32, #tpu.memory_space<vmem>>, vector<1x32xf32>
    %558 = vector.broadcast %552 : vector<1x8x1xf32> to vector<2x8x32xf32>
    %559 = arith.mulf %406, %558 : vector<2x8x32xf32>
    %560 = vector.broadcast %553 : vector<1x8x1xf32> to vector<2x8x32xf32>
    %561 = arith.addf %559, %560 : vector<2x8x32xf32>
    %562 = vector.shape_cast %561 : vector<2x8x32xf32> to vector<16x32xf32>
    %cst_253 = arith.constant dense<0.000000e+00> : vector<16x96xf32>
    %563 = tpu.matmul %562, %554, %cst_253 {dimension_numbers = #tpu.dot_dimension_numbers<[1], [0], [0], [1], [0, 0, 1, 1], [], []>} : vector<16x32xf32>, vector<32x96xf32>, vector<16x96xf32> -> vector<16x96xf32>
    %564 = vector.broadcast %555 : vector<1x96xf32> to vector<16x96xf32>
    %565 = arith.addf %563, %564 : vector<16x96xf32>
    %566 = vector.shape_cast %565 : vector<16x96xf32> to vector<2x8x96xf32>
    %567 = vector.extract_strided_slice %566 {offsets = [0, 0, 0], sizes = [2, 8, 32], strides = [1, 1, 1]} : vector<2x8x96xf32> to vector<2x8x32xf32>
    %568 = vector.extract_strided_slice %566 {offsets = [0, 0, 32], sizes = [2, 8, 32], strides = [1, 1, 1]} : vector<2x8x96xf32> to vector<2x8x32xf32>
    %569 = vector.extract_strided_slice %566 {offsets = [0, 0, 64], sizes = [2, 8, 32], strides = [1, 1, 1]} : vector<2x8x96xf32> to vector<2x8x32xf32>
    %570 = vector.extract_strided_slice %567 {offsets = [0, 0, 0], sizes = [2, 8, 8], strides = [1, 1, 1]} : vector<2x8x32xf32> to vector<2x8x8xf32>
    %571 = vector.extract_strided_slice %568 {offsets = [0, 0, 0], sizes = [2, 8, 8], strides = [1, 1, 1]} : vector<2x8x32xf32> to vector<2x8x8xf32>
    "tpu.trace_start"() <{level = 10 : i32, message = "bqd,bkd->bqk"}> : () -> ()
    %cst_254 = arith.constant dense<0.000000e+00> : vector<2x8x8xf32>
    %572 = tpu.matmul %570, %571, %cst_254 {dimension_numbers = #tpu.dot_dimension_numbers<[2], [2], [1], [1], [0, 0, 0, 1, 1, 1], [0], [0]>} : vector<2x8x8xf32>, vector<2x8x8xf32>, vector<2x8x8xf32> -> vector<2x8x8xf32>
    "tpu.trace_stop"() : () -> ()
    %cst_255 = arith.constant 0.353553385 : f32
    %573 = vector.broadcast %cst_255 : f32 to vector<2x8x8xf32>
    %574 = arith.mulf %572, %573 : vector<2x8x8xf32>
    %cst_256 = arith.constant dense<0xFF800000> : vector<2x8xf32>
    %575 = vector.multi_reduction <maximumf>, %574, %cst_256 [2] : vector<2x8x8xf32> to vector<2x8xf32>
    %576 = vector.shape_cast %575 : vector<2x8xf32> to vector<2x8x1xf32>
    %577 = vector.broadcast %576 : vector<2x8x1xf32> to vector<2x8x8xf32>
    %578 = arith.subf %574, %577 : vector<2x8x8xf32>
    %579 = math.exp %578 : vector<2x8x8xf32>
    %cst_257 = arith.constant dense<0.000000e+00> : vector<2x8xf32>
    %580 = vector.multi_reduction <add>, %579, %cst_257 [2] : vector<2x8x8xf32> to vector<2x8xf32>
    %581 = vector.shape_cast %580 : vector<2x8xf32> to vector<2x8x1xf32>
    %582 = vector.broadcast %581 : vector<2x8x1xf32> to vector<2x8x8xf32>
    %583 = arith.divf %579, %582 : vector<2x8x8xf32>
    %584 = vector.extract_strided_slice %569 {offsets = [0, 0, 0], sizes = [2, 8, 8], strides = [1, 1, 1]} : vector<2x8x32xf32> to vector<2x8x8xf32>
    "tpu.trace_start"() <{level = 10 : i32, message = "bqk,bkd->bqd"}> : () -> ()
    %cst_258 = arith.constant dense<0.000000e+00> : vector<2x8x8xf32>
    %585 = tpu.matmul %583, %584, %cst_258 {dimension_numbers = #tpu.dot_dimension_numbers<[2], [1], [1], [2], [0, 0, 0, 1, 1, 2], [0], [0]>} : vector<2x8x8xf32>, vector<2x8x8xf32>, vector<2x8x8xf32> -> vector<2x8x8xf32>
    "tpu.trace_stop"() : () -> ()
    %586 = vector.extract_strided_slice %567 {offsets = [0, 0, 8], sizes = [2, 8, 8], strides = [1, 1, 1]} : vector<2x8x32xf32> to vector<2x8x8xf32>
    %587 = vector.extract_strided_slice %568 {offsets = [0, 0, 8], sizes = [2, 8, 8], strides = [1, 1, 1]} : vector<2x8x32xf32> to vector<2x8x8xf32>
    "tpu.trace_start"() <{level = 10 : i32, message = "bqd,bkd->bqk"}> : () -> ()
    %cst_259 = arith.constant dense<0.000000e+00> : vector<2x8x8xf32>
    %588 = tpu.matmul %586, %587, %cst_259 {dimension_numbers = #tpu.dot_dimension_numbers<[2], [2], [1], [1], [0, 0, 0, 1, 1, 1], [0], [0]>} : vector<2x8x8xf32>, vector<2x8x8xf32>, vector<2x8x8xf32> -> vector<2x8x8xf32>
    "tpu.trace_stop"() : () -> ()
    %cst_260 = arith.constant 0.353553385 : f32
    %589 = vector.broadcast %cst_260 : f32 to vector<2x8x8xf32>
    %590 = arith.mulf %588, %589 : vector<2x8x8xf32>
    %cst_261 = arith.constant dense<0xFF800000> : vector<2x8xf32>
    %591 = vector.multi_reduction <maximumf>, %590, %cst_261 [2] : vector<2x8x8xf32> to vector<2x8xf32>
    %592 = vector.shape_cast %591 : vector<2x8xf32> to vector<2x8x1xf32>
    %593 = vector.broadcast %592 : vector<2x8x1xf32> to vector<2x8x8xf32>
    %594 = arith.subf %590, %593 : vector<2x8x8xf32>
    %595 = math.exp %594 : vector<2x8x8xf32>
    %cst_262 = arith.constant dense<0.000000e+00> : vector<2x8xf32>
    %596 = vector.multi_reduction <add>, %595, %cst_262 [2] : vector<2x8x8xf32> to vector<2x8xf32>
    %597 = vector.shape_cast %596 : vector<2x8xf32> to vector<2x8x1xf32>
    %598 = vector.broadcast %597 : vector<2x8x1xf32> to vector<2x8x8xf32>
    %599 = arith.divf %595, %598 : vector<2x8x8xf32>
    %600 = vector.extract_strided_slice %569 {offsets = [0, 0, 8], sizes = [2, 8, 8], strides = [1, 1, 1]} : vector<2x8x32xf32> to vector<2x8x8xf32>
    "tpu.trace_start"() <{level = 10 : i32, message = "bqk,bkd->bqd"}> : () -> ()
    %cst_263 = arith.constant dense<0.000000e+00> : vector<2x8x8xf32>
    %601 = tpu.matmul %599, %600, %cst_263 {dimension_numbers = #tpu.dot_dimension_numbers<[2], [1], [1], [2], [0, 0, 0, 1, 1, 2], [0], [0]>} : vector<2x8x8xf32>, vector<2x8x8xf32>, vector<2x8x8xf32> -> vector<2x8x8xf32>
    "tpu.trace_stop"() : () -> ()
    %602 = vector.extract_strided_slice %567 {offsets = [0, 0, 16], sizes = [2, 8, 8], strides = [1, 1, 1]} : vector<2x8x32xf32> to vector<2x8x8xf32>
    %603 = vector.extract_strided_slice %568 {offsets = [0, 0, 16], sizes = [2, 8, 8], strides = [1, 1, 1]} : vector<2x8x32xf32> to vector<2x8x8xf32>
    "tpu.trace_start"() <{level = 10 : i32, message = "bqd,bkd->bqk"}> : () -> ()
    %cst_264 = arith.constant dense<0.000000e+00> : vector<2x8x8xf32>
    %604 = tpu.matmul %602, %603, %cst_264 {dimension_numbers = #tpu.dot_dimension_numbers<[2], [2], [1], [1], [0, 0, 0, 1, 1, 1], [0], [0]>} : vector<2x8x8xf32>, vector<2x8x8xf32>, vector<2x8x8xf32> -> vector<2x8x8xf32>
    "tpu.trace_stop"() : () -> ()
    %cst_265 = arith.constant 0.353553385 : f32
    %605 = vector.broadcast %cst_265 : f32 to vector<2x8x8xf32>
    %606 = arith.mulf %604, %605 : vector<2x8x8xf32>
    %cst_266 = arith.constant dense<0xFF800000> : vector<2x8xf32>
    %607 = vector.multi_reduction <maximumf>, %606, %cst_266 [2] : vector<2x8x8xf32> to vector<2x8xf32>
    %608 = vector.shape_cast %607 : vector<2x8xf32> to vector<2x8x1xf32>
    %609 = vector.broadcast %608 : vector<2x8x1xf32> to vector<2x8x8xf32>
    %610 = arith.subf %606, %609 : vector<2x8x8xf32>
    %611 = math.exp %610 : vector<2x8x8xf32>
    %cst_267 = arith.constant dense<0.000000e+00> : vector<2x8xf32>
    %612 = vector.multi_reduction <add>, %611, %cst_267 [2] : vector<2x8x8xf32> to vector<2x8xf32>
    %613 = vector.shape_cast %612 : vector<2x8xf32> to vector<2x8x1xf32>
    %614 = vector.broadcast %613 : vector<2x8x1xf32> to vector<2x8x8xf32>
    %615 = arith.divf %611, %614 : vector<2x8x8xf32>
    %616 = vector.extract_strided_slice %569 {offsets = [0, 0, 16], sizes = [2, 8, 8], strides = [1, 1, 1]} : vector<2x8x32xf32> to vector<2x8x8xf32>
    "tpu.trace_start"() <{level = 10 : i32, message = "bqk,bkd->bqd"}> : () -> ()
    %cst_268 = arith.constant dense<0.000000e+00> : vector<2x8x8xf32>
    %617 = tpu.matmul %615, %616, %cst_268 {dimension_numbers = #tpu.dot_dimension_numbers<[2], [1], [1], [2], [0, 0, 0, 1, 1, 2], [0], [0]>} : vector<2x8x8xf32>, vector<2x8x8xf32>, vector<2x8x8xf32> -> vector<2x8x8xf32>
    "tpu.trace_stop"() : () -> ()
    %618 = vector.extract_strided_slice %567 {offsets = [0, 0, 24], sizes = [2, 8, 8], strides = [1, 1, 1]} : vector<2x8x32xf32> to vector<2x8x8xf32>
    %619 = vector.extract_strided_slice %568 {offsets = [0, 0, 24], sizes = [2, 8, 8], strides = [1, 1, 1]} : vector<2x8x32xf32> to vector<2x8x8xf32>
    "tpu.trace_start"() <{level = 10 : i32, message = "bqd,bkd->bqk"}> : () -> ()
    %cst_269 = arith.constant dense<0.000000e+00> : vector<2x8x8xf32>
    %620 = tpu.matmul %618, %619, %cst_269 {dimension_numbers = #tpu.dot_dimension_numbers<[2], [2], [1], [1], [0, 0, 0, 1, 1, 1], [0], [0]>} : vector<2x8x8xf32>, vector<2x8x8xf32>, vector<2x8x8xf32> -> vector<2x8x8xf32>
    "tpu.trace_stop"() : () -> ()
    %cst_270 = arith.constant 0.353553385 : f32
    %621 = vector.broadcast %cst_270 : f32 to vector<2x8x8xf32>
    %622 = arith.mulf %620, %621 : vector<2x8x8xf32>
    %cst_271 = arith.constant dense<0xFF800000> : vector<2x8xf32>
    %623 = vector.multi_reduction <maximumf>, %622, %cst_271 [2] : vector<2x8x8xf32> to vector<2x8xf32>
    %624 = vector.shape_cast %623 : vector<2x8xf32> to vector<2x8x1xf32>
    %625 = vector.broadcast %624 : vector<2x8x1xf32> to vector<2x8x8xf32>
    %626 = arith.subf %622, %625 : vector<2x8x8xf32>
    %627 = math.exp %626 : vector<2x8x8xf32>
    %cst_272 = arith.constant dense<0.000000e+00> : vector<2x8xf32>
    %628 = vector.multi_reduction <add>, %627, %cst_272 [2] : vector<2x8x8xf32> to vector<2x8xf32>
    %629 = vector.shape_cast %628 : vector<2x8xf32> to vector<2x8x1xf32>
    %630 = vector.broadcast %629 : vector<2x8x1xf32> to vector<2x8x8xf32>
    %631 = arith.divf %627, %630 : vector<2x8x8xf32>
    %632 = vector.extract_strided_slice %569 {offsets = [0, 0, 24], sizes = [2, 8, 8], strides = [1, 1, 1]} : vector<2x8x32xf32> to vector<2x8x8xf32>
    "tpu.trace_start"() <{level = 10 : i32, message = "bqk,bkd->bqd"}> : () -> ()
    %cst_273 = arith.constant dense<0.000000e+00> : vector<2x8x8xf32>
    %633 = tpu.matmul %631, %632, %cst_273 {dimension_numbers = #tpu.dot_dimension_numbers<[2], [1], [1], [2], [0, 0, 0, 1, 1, 2], [0], [0]>} : vector<2x8x8xf32>, vector<2x8x8xf32>, vector<2x8x8xf32> -> vector<2x8x8xf32>
    "tpu.trace_stop"() : () -> ()
    %634 = tpu.concatenate %585, %601, %617, %633 in 2 : vector<2x8x8xf32>, vector<2x8x8xf32>, vector<2x8x8xf32>, vector<2x8x8xf32> -> vector<2x8x32xf32>
    %635 = vector.shape_cast %634 : vector<2x8x32xf32> to vector<16x32xf32>
    %cst_274 = arith.constant dense<0.000000e+00> : vector<16x32xf32>
    %636 = tpu.matmul %635, %556, %cst_274 {dimension_numbers = #tpu.dot_dimension_numbers<[1], [0], [0], [1], [0, 0, 1, 1], [], []>} : vector<16x32xf32>, vector<32x32xf32>, vector<16x32xf32> -> vector<16x32xf32>
    %637 = vector.broadcast %557 : vector<1x32xf32> to vector<16x32xf32>
    %638 = arith.addf %636, %637 : vector<16x32xf32>
    %639 = vector.shape_cast %638 : vector<16x32xf32> to vector<2x8x32xf32>
    %640 = arith.addf %561, %639 : vector<2x8x32xf32>
    %cst_275 = arith.constant dense<0.000000e+00> : vector<2x8xf32>
    %641 = vector.multi_reduction <add>, %640, %cst_275 [2] : vector<2x8x32xf32> to vector<2x8xf32>
    %642 = vector.shape_cast %641 : vector<2x8xf32> to vector<2x8x1xf32>
    %cst_276 = arith.constant 3.200000e+01 : f32
    %643 = vector.broadcast %cst_276 : f32 to vector<2x8x1xf32>
    %644 = arith.divf %642, %643 : vector<2x8x1xf32>
    %645 = vector.broadcast %644 : vector<2x8x1xf32> to vector<2x8x32xf32>
    %646 = arith.subf %640, %645 : vector<2x8x32xf32>
    %647 = arith.mulf %646, %646 : vector<2x8x32xf32>
    %cst_277 = arith.constant dense<0.000000e+00> : vector<2x8xf32>
    %648 = vector.multi_reduction <add>, %647, %cst_277 [2] : vector<2x8x32xf32> to vector<2x8xf32>
    %649 = vector.shape_cast %648 : vector<2x8xf32> to vector<2x8x1xf32>
    %cst_278 = arith.constant 3.200000e+01 : f32
    %650 = vector.broadcast %cst_278 : f32 to vector<2x8x1xf32>
    %651 = arith.divf %649, %650 : vector<2x8x1xf32>
    %cst_279 = arith.constant 9.99999974E-6 : f32
    %652 = vector.broadcast %cst_279 : f32 to vector<2x8x1xf32>
    %653 = arith.addf %651, %652 : vector<2x8x1xf32>
    %654 = math.rsqrt %653 : vector<2x8x1xf32>
    %655 = vector.broadcast %654 : vector<2x8x1xf32> to vector<2x8x32xf32>
    %656 = arith.mulf %646, %655 : vector<2x8x32xf32>
    %657 = vector.shape_cast %0 : vector<1x32xf32> to vector<1x1x32xf32>
    %658 = vector.broadcast %657 : vector<1x1x32xf32> to vector<2x8x32xf32>
    %659 = arith.mulf %656, %658 : vector<2x8x32xf32>
    %660 = vector.shape_cast %1 : vector<1x32xf32> to vector<1x1x32xf32>
    %661 = vector.broadcast %660 : vector<1x1x32xf32> to vector<2x8x32xf32>
    %662 = arith.addf %659, %661 : vector<2x8x32xf32>
    %663 = vector.shape_cast %662 : vector<2x8x32xf32> to vector<16x32xf32>
    %c0_280 = arith.constant 0 : index
    %c0_281 = arith.constant 0 : index
    %664 = vector.load %arg44[%c0_280, %c0_281] : memref<32x32xf32, #tpu.memory_space<vmem>>, vector<32x32xf32>
    %cst_282 = arith.constant dense<0.000000e+00> : vector<16x32xf32>
    %665 = tpu.matmul %663, %664, %cst_282 {dimension_numbers = #tpu.dot_dimension_numbers<[1], [0], [0], [1], [0, 0, 1, 1], [], []>} : vector<16x32xf32>, vector<32x32xf32>, vector<16x32xf32> -> vector<16x32xf32>
    %c0_283 = arith.constant 0 : index
    %c0_284 = arith.constant 0 : index
    %666 = vector.load %arg45[%c0_283, %c0_284] : memref<1x32xf32, #tpu.memory_space<vmem>>, vector<1x32xf32>
    %667 = vector.broadcast %666 : vector<1x32xf32> to vector<16x32xf32>
    %668 = arith.addf %665, %667 : vector<16x32xf32>
    %669 = math.tanh %668 : vector<16x32xf32>
    %670 = vector.shape_cast %669 : vector<16x32xf32> to vector<2x8x32xf32>
    %c0_285 = arith.constant 0 : index
    %c0_286 = arith.constant 0 : index
    %671 = vector.load %arg46[%c0_285, %c0_286] : memref<1x32xf32, #tpu.memory_space<vmem>>, vector<1x32xf32>
    %672 = vector.shape_cast %671 : vector<1x32xf32> to vector<1x1x32xf32>
    %673 = vector.broadcast %672 : vector<1x1x32xf32> to vector<2x8x32xf32>
    %674 = arith.mulf %670, %673 : vector<2x8x32xf32>
    %cst_287 = arith.constant dense<0.000000e+00> : vector<2x8xf32>
    %675 = vector.multi_reduction <add>, %674, %cst_287 [2] : vector<2x8x32xf32> to vector<2x8xf32>
    %c0_288 = arith.constant 0 : index
    %c0_289 = arith.constant 0 : index
    %676 = vector.load %arg47[%c0_288, %c0_289] : memref<1x1xf32, #tpu.memory_space<vmem>>, vector<1x1xf32>
    %677 = vector.broadcast %676 : vector<1x1xf32> to vector<2x8xf32>
    %678 = arith.addf %675, %677 : vector<2x8xf32>
    %cst_290 = arith.constant dense<0xFF800000> : vector<2xf32>
    %679 = vector.multi_reduction <maximumf>, %678, %cst_290 [1] : vector<2x8xf32> to vector<2xf32>
    %680 = vector.shape_cast %679 : vector<2xf32> to vector<2x1xf32>
    %681 = vector.broadcast %680 : vector<2x1xf32> to vector<2x8xf32>
    %682 = arith.subf %678, %681 : vector<2x8xf32>
    %683 = math.exp %682 : vector<2x8xf32>
    %cst_291 = arith.constant dense<0.000000e+00> : vector<2xf32>
    %684 = vector.multi_reduction <add>, %683, %cst_291 [1] : vector<2x8xf32> to vector<2xf32>
    %685 = vector.shape_cast %684 : vector<2xf32> to vector<2x1xf32>
    %686 = vector.broadcast %685 : vector<2x1xf32> to vector<2x8xf32>
    %687 = arith.divf %683, %686 : vector<2x8xf32>
    %688 = vector.extract_strided_slice %687 {offsets = [0, 0], sizes = [1, 8], strides = [1, 1]} : vector<2x8xf32> to vector<1x8xf32>
    %689 = vector.extract_strided_slice %662 {offsets = [0, 0, 0], sizes = [1, 8, 32], strides = [1, 1, 1]} : vector<2x8x32xf32> to vector<1x8x32xf32>
    %690 = vector.shape_cast %689 : vector<1x8x32xf32> to vector<8x32xf32>
    %cst_292 = arith.constant dense<0.000000e+00> : vector<1x32xf32>
    %691 = tpu.matmul %688, %690, %cst_292 {dimension_numbers = #tpu.dot_dimension_numbers<[1], [0], [0], [1], [0, 0, 1, 1], [], []>} : vector<1x8xf32>, vector<8x32xf32>, vector<1x32xf32> -> vector<1x32xf32>
    %692 = vector.extract_strided_slice %687 {offsets = [1, 0], sizes = [1, 8], strides = [1, 1]} : vector<2x8xf32> to vector<1x8xf32>
    %693 = vector.extract_strided_slice %662 {offsets = [1, 0, 0], sizes = [1, 8, 32], strides = [1, 1, 1]} : vector<2x8x32xf32> to vector<1x8x32xf32>
    %694 = vector.shape_cast %693 : vector<1x8x32xf32> to vector<8x32xf32>
    %cst_293 = arith.constant dense<0.000000e+00> : vector<1x32xf32>
    %695 = tpu.matmul %692, %694, %cst_293 {dimension_numbers = #tpu.dot_dimension_numbers<[1], [0], [0], [1], [0, 0, 1, 1], [], []>} : vector<1x8xf32>, vector<8x32xf32>, vector<1x32xf32> -> vector<1x32xf32>
    %696 = tpu.concatenate %691, %695 in 0 : vector<1x32xf32>, vector<1x32xf32> -> vector<2x32xf32>
    %c0_294 = arith.constant 0 : index
    %c0_295 = arith.constant 0 : index
    %697 = vector.load %arg57[%c0_294, %c0_295] : memref<2x8xf32, #tpu.memory_space<vmem>>, vector<2x8xf32>
    tpu.vector_store %arg57[%c0_294, %c0_295], %542 {strides = array<i32>} : memref<2x8xf32, #tpu.memory_space<vmem>>, vector<2x8xf32>,
    %c0_296 = arith.constant 0 : index
    %c0_297 = arith.constant 0 : index
    %698 = vector.load %arg58[%c0_296, %c0_297] : memref<2x8xf32, #tpu.memory_space<vmem>>, vector<2x8xf32>
    tpu.vector_store %arg58[%c0_296, %c0_297], %687 {strides = array<i32>} : memref<2x8xf32, #tpu.memory_space<vmem>>, vector<2x8xf32>,
    %c0_298 = arith.constant 0 : index
    %c0_299 = arith.constant 0 : index
    %699 = vector.load %arg48[%c0_298, %c0_299] : memref<32x32xf32, #tpu.memory_space<vmem>>, vector<32x32xf32>
    %cst_300 = arith.constant dense<0.000000e+00> : vector<2x32xf32>
    %700 = tpu.matmul %551, %699, %cst_300 {dimension_numbers = #tpu.dot_dimension_numbers<[1], [0], [0], [1], [0, 0, 1, 1], [], []>} : vector<2x32xf32>, vector<32x32xf32>, vector<2x32xf32> -> vector<2x32xf32>
    %c0_301 = arith.constant 0 : index
    %c0_302 = arith.constant 0 : index
    %701 = vector.load %arg49[%c0_301, %c0_302] : memref<32x32xf32, #tpu.memory_space<vmem>>, vector<32x32xf32>
    %cst_303 = arith.constant dense<0.000000e+00> : vector<2x32xf32>
    %702 = tpu.matmul %696, %701, %cst_303 {dimension_numbers = #tpu.dot_dimension_numbers<[1], [0], [0], [1], [0, 0, 1, 1], [], []>} : vector<2x32xf32>, vector<32x32xf32>, vector<2x32xf32> -> vector<2x32xf32>
    %703 = arith.addf %700, %702 : vector<2x32xf32>
    %c0_304 = arith.constant 0 : index
    %c0_305 = arith.constant 0 : index
    %704 = vector.load %arg50[%c0_304, %c0_305] : memref<1x32xf32, #tpu.memory_space<vmem>>, vector<1x32xf32>
    %705 = vector.broadcast %704 : vector<1x32xf32> to vector<2x32xf32>
    %706 = arith.addf %703, %705 : vector<2x32xf32>
    %cst_306 = arith.constant 0.000000e+00 : f32
    %707 = vector.broadcast %cst_306 : f32 to vector<2x32xf32>
    %708 = arith.maximumf %706, %707 : vector<2x32xf32>
    %c0_307 = arith.constant 0 : index
    %c0_308 = arith.constant 0 : index
    %709 = vector.load %arg51[%c0_307, %c0_308] : memref<32x3xf32, #tpu.memory_space<vmem>>, vector<32x3xf32>
    %cst_309 = arith.constant dense<0.000000e+00> : vector<2x3xf32>
    %710 = tpu.matmul %708, %709, %cst_309 {dimension_numbers = #tpu.dot_dimension_numbers<[1], [0], [0], [1], [0, 0, 1, 1], [], []>} : vector<2x32xf32>, vector<32x3xf32>, vector<2x3xf32> -> vector<2x3xf32>
    %c0_310 = arith.constant 0 : index
    %c0_311 = arith.constant 0 : index
    %711 = vector.load %arg52[%c0_310, %c0_311] : memref<1x3xf32, #tpu.memory_space<vmem>>, vector<1x3xf32>
    %712 = vector.broadcast %711 : vector<1x3xf32> to vector<2x3xf32>
    %713 = arith.addf %710, %712 : vector<2x3xf32>
    %c0_312 = arith.constant 0 : index
    %c0_313 = arith.constant 0 : index
    %714 = vector.load %arg53[%c0_312, %c0_313] : memref<2x3xf32, #tpu.memory_space<vmem>>, vector<2x3xf32>
    tpu.vector_store %arg53[%c0_312, %c0_313], %713 {strides = array<i32>} : memref<2x3xf32, #tpu.memory_space<vmem>>, vector<2x3xf32>,
    return
  }
}

</mosaic_0001>

<bundles_post_ra>
// kernel: forward.1
= control target key start
LH: loop header
LB: loop body
LE: loop exit
PB: predicated region body
PF: predicated region fallthrough
CT: control target
= control target key end

     0   :  { %s11167_s6 = smov 1   ;;  %s11168_s10 = smov 2   ;;  %s12873_s0 = inlined_call_operand.smem [shape: u32[59], index: -1, kind: input, shape index: {}] }
   0x1   :  { %s11266_s5 = sld [smem:[%s12873_s0]]   ;;  %s11169_s14 = smov 3  }
   0x2   :  { %s11271_s9 = sld [smem:[%s12873_s0 + %s11167_s6]]   ;;  %s11170_s18 = smov 4  }
   0x3   :  { %s11276_s13 = sld [smem:[%s12873_s0 + %s11168_s10]]   ;;  %s11171_s22 = smov 5  }
   0x4   :  { %s11281_s17 = sld [smem:[%s12873_s0 + %s11169_s14]]   ;;  %s11172_s26 = smov 6  }
   0x5   :  { %s11286_s21 = sld [smem:[%s12873_s0 + %s11170_s18]]   ;;  %s11173_s30 = smov 7  }
   0x6   :  { %s11291_s25 = sld [smem:[%s12873_s0 + %s11171_s22]]   ;;  %s11174_s4 = smov 8  }
   0x7   :  { %s11296_s29 = sld [smem:[%s12873_s0 + %s11172_s26]]   ;;  %s11175_s10 = smov 9  }
   0x8   :  { %12896 = sst [smem:[#allocation35_spill]] %s11271_s9  ;;  %s11176_s15 = smov 10  }
   0x9   :  { %12897 = sst [smem:[#allocation36_spill]] %s11276_s13  ;;  %s11177_s20 = smov 11  }
   0xa   :  { %12898 = sst [smem:[#allocation37_spill]] %s11281_s17  ;;  %s11178_s26 = smov 12  }
   0xb   :  { %12899 = sst [smem:[#allocation38_spill]] %s11286_s21  ;;  %s11179_s1 = smov 13  }
   0xc   :  { %12900 = sst [smem:[#allocation39_spill]] %s11291_s25  ;;  %s11180_s7 = smov 14  }
   0xd   :  { %12901 = sst [smem:[#allocation40_spill]] %s11296_s29  ;;  %s11182_s22 = smov 16  }
   0xe   :  { %s11301_s3 = sld [smem:[%s12873_s0 + %s11173_s30]]   ;;  %s11183_s28 = smov 17  }
   0xf   :  { %s11306_s8 = sld [smem:[%s12873_s0 + %s11174_s4]]   ;;  %s11214_s23 = smov 48  }
  0x10   :  { %s11311_s14 = sld [smem:[%s12873_s0 + %s11175_s10]]   ;;  %s11216_s10 = smov 50  }
  0x11   :  { %s11316_s19 = sld [smem:[%s12873_s0 + %s11176_s15]]   ;;  %s11181_s15 = smov 15  }
  0x12   :  { %s11321_s24 = sld [smem:[%s12873_s0 + %s11177_s20]]   ;;  %s11217_s16 = smov 51  }
  0x13   :  { %s11326_s30 = sld [smem:[%s12873_s0 + %s11178_s26]]  }
  0x14   :  { %12902 = sst [smem:[#allocation41_spill]] %s11301_s3 }
  0x15   :  { %s11331_s6 = sld [smem:[%s12873_s0 + %s11179_s1]]   ;;  %s11215_s1 = smov 49  }
  0x16   :  { %s11336_s12 = sld [smem:[%s12873_s0 + %s11180_s7]]   ;;  %s11184_s7 = smov 18  }
  0x17   :  { %s11341_s20 = sld [smem:[%s12873_s0 + %s11181_s15]]   ;;  %s11185_s15 = smov 19  }
  0x18   :  { %s11346_s27 = sld [smem:[%s12873_s0 + %s11182_s22]]   ;;  %s11186_s22 = smov 20  }
  0x19   :  { %12903 = sst [smem:[#allocation42_spill]] %s11326_s30 }
  0x1a   :  { %s11351_s4 = sld [smem:[%s12873_s0 + %s11183_s28]]   ;;  %s11187_s28 = smov 21  }
  0x1b   :  { %12904 = sst [smem:[#allocation43_spill]] %s11331_s6 }
  0x1c   :  { %s11356_s6 = sld [smem:[%s12873_s0 + %s11184_s7]]   ;;  %s11188_s7 = smov 22  }
  0x1d   :  { %12905 = sst [smem:[#allocation44_spill]] %s11341_s20 }
  0x1e   :  { %12906 = sst [smem:[#allocation45_spill]] %s11346_s27 }
  0x1f   :  { %s11361_s30 = sld [smem:[%s12873_s0 + %s11185_s15]]   ;;  %s11189_s15 = smov 23  }
  0x20   :  { %12907 = sst [smem:[#allocation46_spill]] %s11351_s4 }
  0x21   :  { %s11366_s13 = sld [smem:[%s12873_s0 + %s11186_s22]]   ;;  %s11190_s22 = smov 24  }
  0x22   :  { %12908 = sst [smem:[#allocation47_spill]] %s11356_s6 }
  0x23   :  { %s11371_s4 = sld [smem:[%s12873_s0 + %s11187_s28]]   ;;  %s11191_s28 = smov 25  }
  0x24   :  { %s11376_s6 = sld [smem:[%s12873_s0 + %s11188_s7]]   ;;  %s11192_s7 = smov 26  }
  0x25   :  { %12909 = sst [smem:[#allocation48_spill]] %s11361_s30 }
  0x26   :  { %s11381_s30 = sld [smem:[%s12873_s0 + %s11189_s15]]   ;;  %s11193_s15 = smov 27  }
  0x27   :  { %12910 = sst [smem:[#allocation49_spill]] %s11366_s13 }
  0x28   :  { %s11386_s3 = sld [smem:[%s12873_s0 + %s11190_s22]]   ;;  %s11194_s22 = smov 28  }
  0x29   :  { %12911 = sst [smem:[#allocation50_spill]] %s11371_s4 }
  0x2a   :  { %12912 = sst [smem:[#allocation51_spill]] %s11376_s6 }
  0x2b   :  { %s11391_s4 = sld [smem:[%s12873_s0 + %s11191_s28]]   ;;  %s11195_s28 = smov 29  }
  0x2c   :  { %12913 = sst [smem:[#allocation52_spill]] %s11381_s30 }
  0x2d   :  { %s11396_s6 = sld [smem:[%s12873_s0 + %s11192_s7]]   ;;  %s11196_s7 = smov 30  }
  0x2e   :  { %12914 = sst [smem:[#allocation53_spill]] %s11386_s3 }
  0x2f   :  { %s11401_s30 = sld [smem:[%s12873_s0 + %s11193_s15]]   ;;  %s11197_s15 = smov 31  }
  0x30   :  { %s11406_s3 = sld [smem:[%s12873_s0 + %s11194_s22]]   ;;  %s11198_s22 = smov 32  }
  0x31   :  { %12915 = sst [smem:[#allocation54_spill]] %s11391_s4 }
  0x32   :  { %s11411_s4 = sld [smem:[%s12873_s0 + %s11195_s28]]   ;;  %s11199_s28 = smov 33  }
  0x33   :  { %12916 = sst [smem:[#allocation55_spill]] %s11396_s6 }
  0x34   :  { %s11416_s6 = sld [smem:[%s12873_s0 + %s11196_s7]]   ;;  %s11200_s7 = smov 34  }
  0x35   :  { %12917 = sst [smem:[#allocation56_spill]] %s11401_s30 }
  0x36   :  { %12918 = sst [smem:[#allocation57_spill]] %s11406_s3 }
  0x37   :  { %s11421_s30 = sld [smem:[%s12873_s0 + %s11197_s15]]   ;;  %s11201_s15 = smov 35  }
  0x38   :  { %12919 = sst [smem:[#allocation58_spill]] %s11411_s4 }
  0x39   :  { %s11426_s3 = sld [smem:[%s12873_s0 + %s11198_s22]]   ;;  %s11202_s22 = smov 36  }
  0x3a   :  { %12920 = sst [smem:[#allocation59_spill]] %s11416_s6 }
  0x3b   :  { %s11431_s4 = sld [smem:[%s12873_s0 + %s11199_s28]]   ;;  %s11203_s28 = smov 37  }
  0x3c   :  { %s11436_s6 = sld [smem:[%s12873_s0 + %s11200_s7]]   ;;  %s11204_s7 = smov 38  }
  0x3d   :  { %12921 = sst [smem:[#allocation60_spill]] %s11421_s30 }
  0x3e   :  { %s11441_s30 = sld [smem:[%s12873_s0 + %s11201_s15]]   ;;  %s11205_s15 = smov 39  }
  0x3f   :  { %12922 = sst [smem:[#allocation61_spill]] %s11426_s3 }
  0x40   :  { %s11446_s3 = sld [smem:[%s12873_s0 + %s11202_s22]]   ;;  %s11206_s22 = smov 40  }
  0x41   :  { %12923 = sst [smem:[#allocation62_spill]] %s11431_s4 }
  0x42   :  { %12924 = sst [smem:[#allocation63_spill]] %s11436_s6 }
  0x43   :  { %s11451_s4 = sld [smem:[%s12873_s0 + %s11203_s28]]   ;;  %s11207_s28 = smov 41  }
  0x44   :  { %12925 = sst [smem:[#allocation64_spill]] %s11441_s30 }
  0x45   :  { %s11456_s6 = sld [smem:[%s12873_s0 + %s11204_s7]]   ;;  %s11208_s7 = smov 42  }
  0x46   :  { %12926 = sst [smem:[#allocation65_spill]] %s11446_s3 }
  0x47   :  { %s11461_s30 = sld [smem:[%s12873_s0 + %s11205_s15]]   ;;  %s11209_s15 = smov 43  }
  0x48   :  { %s11466_s3 = sld [smem:[%s12873_s0 + %s11206_s22]]   ;;  %s11210_s22 = smov 44  }
  0x49   :  { %s11471_s29 = sld [smem:[%s12873_s0 + %s11207_s28]]   ;;  %s11211_s28 = smov 45  }
  0x4a   :  { %s11481_s13 = sld [smem:[%s12873_s0 + %s11209_s15]]   ;;  %s11213_s15 = smov 47  }
  0x4b   :  { %12927 = sst [smem:[#allocation66_spill]] %s11456_s6 }
  0x4c   :  { %s11476_s6 = sld [smem:[%s12873_s0 + %s11208_s7]]   ;;  %s11212_s7 = smov 46  }
  0x4d   :  { %s11491_s27 = sld [smem:[%s12873_s0 + %s11211_s28]]  }
  0x4e   :  { %12928 = sst [smem:[#allocation67_spill]] %s11466_s3 }
  0x4f   :  { %s11486_s3 = sld [smem:[%s12873_s0 + %s11210_s22]]   ;;  %s11222_s22 = smov 56  }
  0x50   :  { %s9356_s25 = sld [smem:[%s12873_s0 + %s11213_s15]]  }
  0x51   :  { %s11509_s21 = sld [smem:[%s12873_s0 + %s11215_s1]]   ;;  %s11219_s1 = smov 53  }
  0x52   :  { %12929 = sst [smem:[#allocation68_spill]] %s11476_s6 }
  0x53   :  { %s11496_s6 = sld [smem:[%s12873_s0 + %s11212_s7]]  }
  0x54   :  { %s11514_s17 = sld [smem:[%s12873_s0 + %s11216_s10]]   ;;  %s11220_s10 = smov 54  }
  0x55   :  { %12930 = sst [smem:[#allocation69_spill]] %s11486_s3 }
  0x56   :  { %s11504_s3 = sld [smem:[%s12873_s0 + %s11214_s23]]   ;;  %s11218_s23 = smov 52   ;;  %v123_v0 = vstv %s9356_s25 }
  0x57   :  { %12932 = sst [smem:[#allocation71_spill]] %s11509_s21  ;;  %124 = vst [vmem:[#allocation2] sm:$0x1] %v123_v0  ;;  %s11223_s25 = smov 57  }
  0x58   :  { %s11519_s9 = sld [smem:[%s12873_s0 + %s11217_s16]]   ;;  %s11221_s16 = smov 55  }
  0x59   :  { %s11529_s21 = sld [smem:[%s12873_s0 + %s11219_s1]]  }
  0x5a   :  { %s11534_s15 = sld [smem:[%s12873_s0 + %s11220_s10]]   ;;  %s11224_s10 = smov 58  }
  0x5b   :  { %s11544_s1 = sld [smem:[%s12873_s0 + %s11222_s22]]  }
  0x5c   :  { %12931 = sst [smem:[#allocation70_spill]] %s11504_s3 }
  0x5d   :  { %s11524_s3 = sld [smem:[%s12873_s0 + %s11218_s23]]  }
  0x5e   :  { %12933 = sst [smem:[#allocation72_spill]] %s11519_s9 }
  0x5f   :  { %12934 = sst [smem:[#allocation73_spill]] %s11529_s21 }
  0x60   :  { %12935 = sst [smem:[#allocation74_spill]] %s11534_s15 }
  0x61   :  { %s11539_s23 = sld [smem:[%s12873_s0 + %s11221_s16]]  }
  0x62   :  { %s11549_s7 = sld [smem:[%s12873_s0 + %s11223_s25]]  }
  0x63   :  { %s11554_s15 = sld [smem:[%s12873_s0 + %s11224_s10]]  }
  0x64   :  { %125 = vsyncpa [#allocation4], 0 }
  0x65   :  { %126 = vsyncpa [#allocation7], 0 }
  0x66   :  { %127 = vsyncpa [#allocation10], 0 }
  0x67   :  { %128 = vsyncpa [#allocation13], 0 }
  0x68   :  { %129 = vsyncpa [#allocation16], 0 }
  0x69   :  { %130 = vsyncpa [#allocation5], 0 }
  0x6a   :  { %131 = vsyncpa [#allocation19], 0 }
  0x6b   :  { %132 = vsyncpa [#allocation22], 0 }
  0x6c   :  { %133 = vsyncpa [#allocation25], 0  ;;  %s11225_s9 = smov [#allocation6]   ;;  %s11226_s16 = smov [#allocation9]  }
  0x6d   :  { %s226_s20 = sshll.u32 %s11225_s9, 4  ;;  %s250_s18 = sshll.u32 %s11226_s16, 4  ;;  %s227_s20 = int_to_ptr.vmem [resolvable:$true] %s226_s20  ;;  %s251_s18 = int_to_ptr.vmem [resolvable:$true] %s250_s18 }
  0x6e   :  { %s10877_s22 = scalar_lea.vmem %s227_s20, 16  ;;  %s10881_s21 = scalar_lea.vmem %s227_s20, 32 }
  0x6f   :  { %p10878_p0 = scmp.ne.s32.totalorder %s227_s20, %s10877_s22  ;;  %p10882_p1 = scmp.lt.s32.totalorder %s227_s20, %s227_s20 }
  0x70   :  { %p10883_p2 = scmp.lt.s32.totalorder %s10881_s21, %s10877_s22 }
  0x72   :  { %p10884_p3 = por %p10883_p2, %p10882_p1 }
  0x74   :  { %p10885_p4 = pnand %p10884_p3, %p10878_p0 }
  0x76   :  { %10888 = shalt.err (!%p10885_p4)
}
  0x77   :  { %229 = dma.hbm_to_vmem [thread:$0]  %s11461_s30, 16, %s227_s20, [#allocation7]  }
  0x78   :  { %s10897_s0 = scalar_lea.vmem %s251_s18, 16  ;;  %s10901_s26 = scalar_lea.vmem %s251_s18, 32 }
  0x79   :  { %p10898_p5 = scmp.ne.s32.totalorder %s251_s18, %s10897_s0  ;;  %p10902_p6 = scmp.lt.s32.totalorder %s251_s18, %s251_s18 }
  0x7a   :  { %p10903_p7 = scmp.lt.s32.totalorder %s10901_s26, %s10897_s0 }
  0x7c   :  { %p10904_p8 = por %p10903_p7, %p10902_p6 }
  0x7e   :  { %p10905_p9 = pnand %p10904_p8, %p10898_p5 }
  0x80   :  { %10908 = shalt.err (!%p10905_p9)
}
  0x81   :  { %253 = dma.hbm_to_vmem [thread:$0]  %s11481_s13, 16, %s251_s18, [#allocation10]  }
  0x82   :  { %s11227_s25 = smov [#allocation12]   ;;  %s11228_s2 = smov [#allocation3]  }
  0x83   :  { %s272_s28 = sshll.u32 %s11227_s25, 4  ;;  %s214_s10 = sshll.u32 %s11228_s2, 4  ;;  %s273_s28 = int_to_ptr.vmem [resolvable:$true] %s272_s28  ;;  %s215_s10 = int_to_ptr.vmem [resolvable:$true] %s214_s10 }
  0x84   :  { %s10917_s11 = scalar_lea.vmem %s273_s28, 16  ;;  %s10921_s9 = scalar_lea.vmem %s273_s28, 32 }
  0x85   :  { %p10918_p10 = scmp.ne.s32.totalorder %s273_s28, %s10917_s11  ;;  %p10922_p11 = scmp.lt.s32.totalorder %s273_s28, %s273_s28 }
  0x86   :  { %p10923_p12 = scmp.lt.s32.totalorder %s10921_s9, %s10917_s11 }
  0x88   :  { %p10924_p13 = por %p10923_p12, %p10922_p11 }
  0x8a   :  { %p10925_p0 = pnand %p10924_p13, %p10918_p10 }
  0x8c   :  { %10928 = shalt.err (!%p10925_p0)
}
  0x8d   :  { %275 = dma.hbm_to_vmem [thread:$0]  %s11496_s6, 16, %s273_s28, [#allocation13]  }
  0x8e   :  { %s10937_s30 = scalar_lea.vmem %s215_s10, 16  ;;  %s10941_s20 = scalar_lea.vmem %s215_s10, 32 }
  0x8f   :  { %p10938_p1 = scmp.ne.s32.totalorder %s215_s10, %s10937_s30  ;;  %p10942_p2 = scmp.lt.s32.totalorder %s215_s10, %s215_s10 }
  0x90   :  { %p10943_p3 = scmp.lt.s32.totalorder %s10941_s20, %s10937_s30 }
  0x92   :  { %p10944_p4 = por %p10943_p3, %p10942_p2 }
  0x94   :  { %p10945_p5 = pnand %p10944_p4, %p10938_p1 }
  0x96   :  { %10948 = shalt.err (!%p10945_p5)
}
  0x97   :  { %217 = dma.hbm_to_vmem [thread:$0]  %s11451_s4, 16, %s215_s10, [#allocation4]  }
  0x98   :  { %s11229_s13 = smov [#allocation8]   ;;  %s11230_s18 = smov [#allocation11]  }
  0x99   :  { %s238_s16 = sshll.u32 %s11229_s13, 4  ;;  %s262_s22 = sshll.u32 %s11230_s18, 4  ;;  %s239_s16 = int_to_ptr.vmem [resolvable:$true] %s238_s16  ;;  %s263_s22 = int_to_ptr.vmem [resolvable:$true] %s262_s22 }
  0x9a   :  { %s10957_s21 = scalar_lea.vmem %s239_s16, 16  ;;  %s10961_s0 = scalar_lea.vmem %s239_s16, 32 }
  0x9b   :  { %p10958_p6 = scmp.ne.s32.totalorder %s239_s16, %s10957_s21  ;;  %p10962_p7 = scmp.lt.s32.totalorder %s239_s16, %s239_s16 }
  0x9c   :  { %p10963_p8 = scmp.lt.s32.totalorder %s10961_s0, %s10957_s21 }
  0x9e   :  { %p10964_p9 = por %p10963_p8, %p10962_p7 }
  0xa0   :  { %p10965_p10 = pnand %p10964_p9, %p10958_p6 }
  0xa2   :  { %10968 = shalt.err (!%p10965_p10)
}
  0xa3   :  { %241 = dma.hbm_to_vmem [thread:$0]  %s11471_s29, 16, %s239_s16, [#allocation7]  }
  0xa4   :  { %s10977_s6 = scalar_lea.vmem %s263_s22, 16  ;;  %s10981_s26 = scalar_lea.vmem %s263_s22, 32 }
  0xa5   :  { %p10978_p11 = scmp.ne.s32.totalorder %s263_s22, %s10977_s6  ;;  %p10982_p12 = scmp.lt.s32.totalorder %s263_s22, %s263_s22 }
  0xa6   :  { %p10983_p13 = scmp.lt.s32.totalorder %s10981_s26, %s10977_s6 }
  0xa8   :  { %p10984_p0 = por %p10983_p13, %p10982_p12 }
  0xaa   :  { %p10985_p1 = pnand %p10984_p0, %p10978_p11 }
  0xac   :  { %10988 = shalt.err (!%p10985_p1)
}
  0xad   :  { %265 = dma.hbm_to_vmem [thread:$0]  %s11491_s27, 16, %s263_s22, [#allocation10]  }
  0xae   :  { %s11231_s4 = smov [#allocation14]   ;;  %s11232_s28 = smov [#allocation15]  }
  0xaf   :  { %s288_s25 = sshll.u32 %s11231_s4, 4  ;;  %s300_s2 = sshll.u32 %s11232_s28, 4  ;;  %s289_s25 = int_to_ptr.vmem [resolvable:$true] %s288_s25  ;;  %s301_s2 = int_to_ptr.vmem [resolvable:$true] %s300_s2 }
  0xb0   :  { %s10997_s10 = scalar_lea.vmem %s289_s25, 16  ;;  %s11001_s11 = scalar_lea.vmem %s289_s25, 32 }
  0xb1   :  { %p10998_p2 = scmp.ne.s32.totalorder %s289_s25, %s10997_s10  ;;  %p11002_p3 = scmp.lt.s32.totalorder %s289_s25, %s289_s25 }
  0xb2   :  { %p11003_p4 = scmp.lt.s32.totalorder %s11001_s11, %s10997_s10 }
  0xb4   :  { %p11004_p5 = por %p11003_p4, %p11002_p3 }
  0xb6   :  { %p11005_p6 = pnand %p11004_p5, %p10998_p2 }
  0xb8   :  { %11008 = shalt.err (!%p11005_p6)
}
  0xb9   :  { %291 = dma.hbm_to_vmem [thread:$0]  %s11514_s17, 16, %s289_s25, [#allocation13]  }
  0xba   :  { %s11017_s29 = scalar_lea.vmem %s301_s2, 16  ;;  %s11021_s9 = scalar_lea.vmem %s301_s2, 32 }
  0xbb   :  { %p11018_p7 = scmp.ne.s32.totalorder %s301_s2, %s11017_s29  ;;  %p11022_p8 = scmp.lt.s32.totalorder %s301_s2, %s301_s2 }
  0xbc   :  { %p11023_p9 = scmp.lt.s32.totalorder %s11021_s9, %s11017_s29 }
  0xbe   :  { %p11024_p10 = por %p11023_p9, %p11022_p8 }
  0xc0   :  { %p11025_p11 = pnand %p11024_p10, %p11018_p7 }
  0xc2   :  { %11028 = shalt.err (!%p11025_p11)
}
  0xc3   :  { %303 = dma.hbm_to_vmem [thread:$0]  %s11524_s3, 16, %s301_s2, [#allocation16]  }
  0xc4   :  { %11149 = dma.done.wait [#allocation4], 16  }
  0xc5   :  { %11150 = vsyncadd [#allocation4], 4294967280 }
  0xc6   :  { %11151 = dma.done.wait [#allocation7], 32  }
  0xc7   :  { %11152 = vsyncadd [#allocation7], 4294967264 }
  0xc8   :  { %11153 = dma.done.wait [#allocation10], 32  }
  0xc9   :  { %11154 = vsyncadd [#allocation10], 4294967264 }
  0xca   :  { %11155 = dma.done.wait [#allocation13], 32  }
  0xcb   :  { %11156 = vsyncadd [#allocation13], 4294967264 }
  0xcc   :  { %11157 = dma.done.wait [#allocation16], 16  }
  0xcd   :  { %11158 = vsyncadd [#allocation16], 4294967280  ;;  %v11233_v1 = vmov 0   ;;  %vm342_vm0 = vcmask 195584   ;;  %v334_v2 = vld [vmem:[%s11306_s8 + $0x10] sm:$0xff]  ;;  %v333_v3 = vld [vmem:[%s11306_s8 + $0x8] sm:$0xff] }
  0xce   :  { %10639 = vset.pattern.permute.xlu0 %v11233_v1  ;;  %10640 = vset.pattern.permute.xlu1 %v11233_v1  ;;  %v330_v4 = vld [vmem:[%s11266_s5] sm:$0xff]  ;;  %v331_v7 = vld [vmem:[%s11266_s5 + $0x8] sm:$0xff]  ;;  %v445_v9 = vld [vmem:[%s11336_s12 + $0x18] sm:$0xff]  ;;  %s12936_s5 = sld [smem:[#allocation44_spill]]  ;;  %vm458_vm1 = vcmask 261120   ;;  %v11234_v26 = vmov 0.0  }
  0xcf   :  { %9859 = vmatprep.subr.mxu0 %v334_v2  ;;  %v426_v5 = vld [vmem:[%s11316_s19] sm:$0xff]  ;;  %9865 = vmatprep.mubr.msk.f32.mxu0 %vm342_vm0, %v330_v4  ;;  %v444_v10 = vld [vmem:[%s11336_s12 + $0x10] sm:$0xff]  ;;  %v443_v11 = vld [vmem:[%s11336_s12 + $0x8] sm:$0xff]  ;;  %vm11235_vm2 = vmmov 0   ;;  %s11236_s17 = smov 96   ;;  %vm543_vm3 = vcmask 64512  }
  0xd0   :  { %9860 = vmatpush3.msra.mxu0 %v334_v2  ;;  %v332_v6 = vld [vmem:[%s11306_s8] sm:$0xff]  ;;  %429 = vperm.xlu0 %10639, %v426_v5   ;;  %s11237_s3 = smov 64   ;;  %s11238_s8 = smov 120   ;;  %vm2076_vm4 = vcmask 1043456   ;;  %vm2069_vm6 = vcmask 818176   ;;  %vm1899_vm8 = vcmask 130048  }
  0xd1   :  { %9861 = vmatprep.subr.mxu0 %v333_v3  ;;  %v434_v8 = vld [vmem:[%s11321_s24] sm:$0xff]  ;;  %9868 = vmatprep.subr.mxu1 %v445_v9  ;;  %s11241_s27 = smov 112   ;;  %s11242_s30 = smov 80   ;;  %vm3948_vm9 = vcmask 523264   ;;  %vm4682_vm10 = vcmask 785408   ;;  %vm6796_vm11 = vcmask 1041409  }
  0xd2   :  { %9862 = vmatpush3.msra.mxu0 %v333_v3  ;;  %9869 = vmatpush3.msra.mxu1 %v445_v9  ;;  %v442_v12 = vld [vmem:[%s11336_s12] sm:$0xff]  ;;  %s11240_s12 = smov 56   ;;  %s11243_s20 = smov 48   ;;  %vm6799_vm12 = vcmask 58368   ;;  %vm7019_vm13 = vcmask 1040384  }
  0xd3   :  { %9863 = vmatprep.subr.mxu0 %v332_v6  ;;  %9870 = vmatprep.subr.mxu1 %v444_v10  ;;  %v9368_v13 = vld [vmem:[%s11311_s14] ss:$0 sm:$0xff]  ;;  %s11239_s14 = smov 88   ;;  %s11244_s13 = smov 104  }
  0xd4   :  { %9864 = vmatpush3.msra.mxu0 %v332_v6  ;;  %437 = vperm.xlu0 %10639, %v434_v8   ;;  %v9371_v27 = vld [vmem:[%s12936_s5] ss:$0 sm:$0xff]  ;;  %s11245_s16 = smov 72   ;;  %s12937_s18 = sld [smem:[#allocation35_spill]] }
  0xd5   :  { %9866 = vmatmul.mubr.msk.f32.vlgmr.msra.gmra.mxu0 %vm342_vm0, %v331_v7  ;;  %9871 = vmatpush3.msra.mxu1 %v444_v10  ;;  %s12938_s22 = sld [smem:[#allocation37_spill]]  ;;  %s11246_s21 = smov 40  }
  0xd6   :  { %9872 = vmatprep.subr.mxu1 %v443_v11  ;;  %9879 = vmatprep.subr.mxu0 %v11234_v26  ;;  %s11247_s0 = smov 8   ;;  %s11248_s6 = smov 16  }
  0xd7   :  { %9873 = vmatpush3.msra.mxu1 %v443_v11  ;;  %9881 = vmatprep.mubr.msk.f32.mxu0 %vm11235_vm2, %v11234_v26  ;;  %s12939_s26 = sld [smem:[#allocation38_spill]]  ;;  %s11249_s2 = smov 24  }
  0xd8   :  { %9874 = vmatprep.subr.mxu1 %v442_v12  ;;  %s12940_s4 = sld [smem:[#allocation39_spill]] }
  0xd9   :  { %9875 = vmatpush3.msra.mxu1 %v442_v12  ;;  %s12941_s25 = sld [smem:[#allocation45_spill]] }
  0xda   :  { %9884 = vmatprep.subr.mxu1 %v11234_v26  ;;  %s12942_s28 = sld [smem:[#allocation49_spill]] }
  0xdb   :  { %s12943_s10 = sld [smem:[#allocation40_spill]] }
  0xdc   :  { %s12944_s11 = sld [smem:[#allocation41_spill]] }
  0xdd   :  { %s12945_s29 = sld [smem:[#allocation50_spill]] }
  0xde   :  { %s12946_s9 = sld [smem:[#allocation36_spill]] }
  0xdf   :  { %s12947_s5 = sld [smem:[#allocation51_spill]] }
 0x14b   :  { %v430_v16 = vpop.permute.xlu0 %429 }
 0x14f   :  { %v438_v23 = vpop.permute.xlu0 %437 }
 0x195   :  { %v9867_v14 = vpop.f32.mrf.mxu0 }
 0x196   :  { %v421_v15 = vadd.f32 %v9867_v14, %v9368_v13 }
 0x197   :  { %v415_v17 = vpop.f32.mrf.mxu0 }
 0x198   :  { %v425_v18 = vmax.f32 %v421_v15, 0.0  ;;  %v416_v19 = vadd.f32 %v9368_v13, %v415_v17 }
 0x19a   :  { %v424_v20 = vmax.f32 %v416_v19, 0.0  ;;  %v433_v21 = vmul.f32 %v430_v16, %v425_v18 }
 0x19c   :  { %v432_v22 = vmul.f32 %v430_v16, %v424_v20  ;;  %v11580_v25 = vadd.f32 %v438_v23, %v433_v21 }
 0x19e   :  { %v11578_v24 = vadd.f32 %v438_v23, %v432_v22 }
 0x1a0   :  { %9876 = vmatprep.mubr.msk.f32.mxu1 %vm458_vm1, %v11578_v24 }
 0x1a1   :  { %9877 = vmatmul.mubr.msk.f32.vlgmr.msra.gmra.mxu1 %vm458_vm1, %v11580_v25 }
 0x1a2   :  { %9886 = vmatprep.mubr.msk.f32.mxu1 %vm11235_vm2, %v11234_v26 }
 0x261   :  { %v9878_v28 = vpop.f32.mrf.mxu1 }
 0x262   :  { %v11593_v29 = vadd.f32 %v9878_v28, %v9371_v27 }
 0x263   :  { %v531_v30 = vpop.f32.mrf.mxu1 }
 0x264   :  { %619 = vrot.lane.b32.xlu1 %v11593_v29, %s11236_s17  ;;  %v11597_v31 = vadd.f32 %v9371_v27, %v531_v30 }
 0x268   :  { %541 = vrot.lane.b32.xlu1 %v11597_v31, %s11236_s17 }
 0x2d6   :  { %v620_v32 = vpop.permute.xlu1 %619 }
 0x2d7   :  { %9885 = vmatpush3.xpose.msk.msra.mxu1 %vm543_vm3, %v620_v32 }
 0x2d8   :  { %9894 = vmatprep.subr.mxu1 %v11234_v26 }
 0x2da   :  { %9887 = vmatmul.mubr.msk.f32.vlgmr.msra.gmra.mxu1 %vm543_vm3, %v11593_v29  ;;  %v542_v33 = vpop.permute.xlu1 %541 }
 0x2db   :  { %9880 = vmatpush3.xpose.msk.msra.mxu0 %vm543_vm3, %v542_v33  ;;  %9896 = vmatprep.mubr.msk.f32.mxu1 %vm11235_vm2, %v11234_v26 }
 0x2dc   :  { %9889 = vmatprep.subr.mxu0 %v11234_v26 }
 0x2de   :  { %9882 = vmatmul.mubr.msk.f32.vlgmr.msra.gmra.mxu0 %vm543_vm3, %v11597_v31 }
 0x2df   :  { %9891 = vmatprep.mubr.msk.f32.mxu0 %vm11235_vm2, %v11234_v26 }
 0x39a   :  { %v691_v34 = vpop.f32.mrf.mxu1 }
 0x39b   :  { %v696_v35 = vmul.f32 0.35355338, %v691_v34 }
 0x39c   :  { %v9888_v36 = vpop.f32.mrf.mxu1 }
 0x39d   :  { %v700_v37 = vsel %vm543_vm3, %v696_v35, -inf }
 0x39e   :  { %701 = vmax.xlane.f32.xlu0 %v700_v37  ;;  %v614_v38 = vpop.f32.mrf.mxu0 }
 0x39f   :  { %v695_v46 = vmul.f32 0.35355338, %v614_v38 }
 0x3a0   :  { %v9883_v39 = vpop.f32.mrf.mxu0 }
 0x3a1   :  { %v697_v47 = vsel %vm543_vm3, %v695_v46, -inf }
 0x3b4   :  { %795 = vrot.lane.b32.xlu0 %v11593_v29, %s11237_s3 }
 0x3b8   :  { %949 = vrot.lane.b32.xlu0 %v11593_v29, %s11238_s8 }
 0x427   :  { %v702_v40 = vpop.xlane.xlu0 %701 }
 0x428   :  { %v704_v41 = vsub.f32 %v696_v35, %v702_v40 }
 0x42a   :  { %v707_v42 = vmul.f32 1.442695, %v704_v41 }
 0x42b   :  { %v796_v43 = vpop.permute.xlu0 %795 }
 0x42c   :  { %10671 = vpow2.f32 %v707_v42  ;;  %9895 = vmatpush3.msra.mxu1 %v796_v43 }
 0x42d   :  { %9904 = vmatprep.subr.mxu1 %v11234_v26 }
 0x42f   :  { %v950_v52 = vpop.permute.xlu0 %949 }
 0x439   :  { %v10672_v44 = vpop.eup %10671 }
 0x43a   :  { %v712_v45 = vsel %vm543_vm3, %v10672_v44, 0.0 }
 0x43b   :  { %713 = vadd.xlane.f32.xlu1 %v712_v45 }
 0x44c   :  { %951 = vrot.lane.b32.xlu1 %v11593_v29, %s11239_s14 }
 0x470   :  { %698 = vmax.xlane.f32.xlu1 %v697_v47 }
 0x481   :  { %873 = vrot.lane.b32.xlu1 %v11597_v31, %s11239_s14 }
 0x485   :  { %871 = vrot.lane.b32.xlu1 %v11597_v31, %s11238_s8 }
 0x4c4   :  { %v714_v48 = vpop.xlane.xlu1 %713 }
 0x4c5   :  { %10673 = vrcp.f32 %v714_v48 }
 0x4c8   :  { %v952_v51 = vpop.permute.xlu1 %951 }
 0x4d2   :  { %v10674_v49 = vpop.eup %10673 }
 0x4d3   :  { %v11627_v50 = vmul.f32 %v10674_v49, %v10672_v44 }
 0x4d5   :  { %9897 = vmatmul.mubr.msk.f32.vlgmr.msra.gmra.mxu1 %vm543_vm3, %v11627_v50 }
 0x4d6   :  { %9905 = vmatpush3.xpose.msk.msra.mxu1 %vm543_vm3, %v952_v51  ;;  %9906 = vmatprep.mubr.msk.f32.mxu1 %vm11235_vm2, %v11234_v26 }
 0x4d7   :  { %9914 = vmatprep.subr.mxu1 %v11234_v26 }
 0x4d9   :  { %9907 = vmatmul.mubr.msk.f32.vlgmr.msra.gmra.mxu1 %vm543_vm3, %v950_v52 }
 0x4da   :  { %9916 = vmatprep.mubr.msk.f32.mxu1 %vm11235_vm2, %v11234_v26 }
 0x4f9   :  { %v699_v53 = vpop.xlane.xlu1 %698 }
 0x4fa   :  { %v703_v54 = vsub.f32 %v695_v46, %v699_v53 }
 0x4fc   :  { %v705_v55 = vmul.f32 1.442695, %v703_v54 }
 0x4fd   :  { %v874_v3 = vpop.permute.xlu1 %873 }
 0x4fe   :  { %10675 = vpow2.f32 %v705_v55 }
 0x501   :  { %v872_v5 = vpop.permute.xlu1 %871 }
 0x50b   :  { %v10676_v56 = vpop.eup %10675 }
 0x50c   :  { %v709_v57 = vsel %vm543_vm3, %v10676_v56, 0.0 }
 0x50d   :  { %710 = vadd.xlane.f32.xlu0 %v709_v57 }
 0x523   :  { %719 = vrot.lane.b32.xlu0 %v11597_v31, %s11237_s3 }
 0x595   :  { %v11641_v58 = vpop.f32.mrf.mxu1 }
 0x596   :  { %v711_v59 = vpop.xlane.xlu0 %710 }
 0x597   :  { %10677 = vrcp.f32 %v711_v59  ;;  %v9898_v60 = vpop.f32.mrf.mxu1 }
 0x599   :  { %v1023_v61 = vpop.f32.mrf.mxu1 }
 0x59a   :  { %v1028_v62 = vmul.f32 0.35355338, %v1023_v61  ;;  %v720_v63 = vpop.permute.xlu0 %719 }
 0x59b   :  { %9890 = vmatpush3.msra.mxu0 %v720_v63  ;;  %v9908_v0 = vpop.f32.mrf.mxu1 }
 0x59c   :  { %v1032_v1 = vsel %vm543_vm3, %v1028_v62, -inf  ;;  %9899 = vmatprep.subr.mxu0 %v11234_v26 }
 0x59d   :  { %1033 = vmax.xlane.f32.xlu0 %v1032_v1 }
 0x5a4   :  { %v10678_v2 = vpop.eup %10677 }
 0x5a5   :  { %v11645_v4 = vmul.f32 %v10678_v2, %v10676_v56 }
 0x5a7   :  { %9892 = vmatmul.mubr.msk.f32.vlgmr.msra.gmra.mxu0 %vm543_vm3, %v11645_v4 }
 0x5a8   :  { %9900 = vmatpush3.xpose.msk.msra.mxu0 %vm543_vm3, %v874_v3  ;;  %9901 = vmatprep.mubr.msk.f32.mxu0 %vm11235_vm2, %v11234_v26 }
 0x5a9   :  { %9909 = vmatprep.subr.mxu0 %v11234_v26 }
 0x5ab   :  { %9902 = vmatmul.mubr.msk.f32.vlgmr.msra.gmra.mxu0 %vm543_vm3, %v872_v5 }
 0x5ac   :  { %9911 = vmatprep.mubr.msk.f32.mxu0 %vm11235_vm2, %v11234_v26 }
 0x5b3   :  { %1129 = vrot.lane.b32.xlu0 %v11593_v29, %s11240_s12 }
 0x5b7   :  { %1283 = vrot.lane.b32.xlu0 %v11593_v29, %s11241_s27 }
 0x626   :  { %v1034_v6 = vpop.xlane.xlu0 %1033 }
 0x627   :  { %v1036_v7 = vsub.f32 %v1028_v62, %v1034_v6 }
 0x629   :  { %v1039_v8 = vmul.f32 1.442695, %v1036_v7 }
 0x62a   :  { %v1130_v9 = vpop.permute.xlu0 %1129 }
 0x62b   :  { %10679 = vpow2.f32 %v1039_v8  ;;  %9915 = vmatpush3.msra.mxu1 %v1130_v9 }
 0x62c   :  { %9924 = vmatprep.subr.mxu1 %v11234_v26 }
 0x62e   :  { %v1284_v22 = vpop.permute.xlu0 %1283 }
 0x638   :  { %v10680_v10 = vpop.eup %10679 }
 0x639   :  { %v1044_v11 = vsel %vm543_vm3, %v10680_v10, 0.0 }
 0x63a   :  { %1045 = vadd.xlane.f32.xlu1 %v1044_v11 }
 0x64b   :  { %1285 = vrot.lane.b32.xlu1 %v11593_v29, %s11242_s30 }
 0x667   :  { %v11664_v12 = vpop.f32.mrf.mxu0 }
 0x669   :  { %v9893_v13 = vpop.f32.mrf.mxu0 }
 0x66b   :  { %v945_v14 = vpop.f32.mrf.mxu0 }
 0x66c   :  { %v1027_v15 = vmul.f32 0.35355338, %v945_v14 }
 0x66d   :  { %v9903_v16 = vpop.f32.mrf.mxu0 }
 0x66e   :  { %v1029_v17 = vsel %vm543_vm3, %v1027_v15, -inf }
 0x66f   :  { %1030 = vmax.xlane.f32.xlu1 %v1029_v17 }
 0x680   :  { %1207 = vrot.lane.b32.xlu1 %v11597_v31, %s11242_s30 }
 0x684   :  { %1205 = vrot.lane.b32.xlu1 %v11597_v31, %s11241_s27 }
 0x6c3   :  { %v1046_v18 = vpop.xlane.xlu1 %1045 }
 0x6c4   :  { %10681 = vrcp.f32 %v1046_v18 }
 0x6c7   :  { %v1286_v21 = vpop.permute.xlu1 %1285 }
 0x6d1   :  { %v10682_v19 = vpop.eup %10681 }
 0x6d2   :  { %v11671_v20 = vmul.f32 %v10682_v19, %v10680_v10 }
 0x6d4   :  { %9917 = vmatmul.mubr.msk.f32.vlgmr.msra.gmra.mxu1 %vm543_vm3, %v11671_v20  ;;  %v1052_v61 = vadd.f32 %v11671_v20, %v11627_v50 }
 0x6d5   :  { %9925 = vmatpush3.xpose.msk.msra.mxu1 %vm543_vm3, %v1286_v21  ;;  %9926 = vmatprep.mubr.msk.f32.mxu1 %vm11235_vm2, %v11234_v26 }
 0x6d6   :  { %9934 = vmatprep.subr.mxu1 %v11234_v26 }
 0x6d8   :  { %9927 = vmatmul.mubr.msk.f32.vlgmr.msra.gmra.mxu1 %vm543_vm3, %v1284_v22 }
 0x6d9   :  { %9936 = vmatprep.mubr.msk.f32.mxu1 %vm11235_vm2, %v11234_v26 }
 0x6f8   :  { %v1031_v23 = vpop.xlane.xlu1 %1030 }
 0x6f9   :  { %v1035_v27 = vsub.f32 %v1027_v15, %v1031_v23 }
 0x6fb   :  { %v1037_v28 = vmul.f32 1.442695, %v1035_v27 }
 0x6fc   :  { %v1208_v42 = vpop.permute.xlu1 %1207 }
 0x6fd   :  { %10683 = vpow2.f32 %v1037_v28 }
 0x700   :  { %v1206_v44 = vpop.permute.xlu1 %1205 }
 0x70a   :  { %v10684_v30 = vpop.eup %10683 }
 0x70b   :  { %v1041_v32 = vsel %vm543_vm3, %v10684_v30, 0.0 }
 0x70c   :  { %1042 = vadd.xlane.f32.xlu0 %v1041_v32 }
 0x722   :  { %1053 = vrot.lane.b32.xlu0 %v11597_v31, %s11240_s12 }
 0x794   :  { %v11685_v33 = vpop.f32.mrf.mxu1 }
 0x795   :  { %v1043_v34 = vpop.xlane.xlu0 %1042 }
 0x796   :  { %10685 = vrcp.f32 %v1043_v34  ;;  %v9918_v35 = vpop.f32.mrf.mxu1  ;;  %v2068_v34 = vld [vmem:[%s12938_s22 + $0x60] sm:$0xf] }
 0x797   :  { %v2040_v35 = vld [vmem:[%s12937_s18] sm:$0xff] }
 0x798   :  { %v1357_v36 = vpop.f32.mrf.mxu1 }
 0x799   :  { %v1362_v37 = vmul.f32 0.35355338, %v1357_v36  ;;  %v1054_v38 = vpop.permute.xlu0 %1053 }
 0x79a   :  { %9910 = vmatpush3.msra.mxu0 %v1054_v38  ;;  %v9928_v39 = vpop.f32.mrf.mxu1 }
 0x79b   :  { %v1366_v40 = vsel %vm543_vm3, %v1362_v37, -inf  ;;  %9919 = vmatprep.subr.mxu0 %v11234_v26 }
 0x79c   :  { %1367 = vmax.xlane.f32.xlu0 %v1366_v40 }
 0x7a3   :  { %v10686_v41 = vpop.eup %10685 }
 0x7a4   :  { %v11689_v43 = vmul.f32 %v10686_v41, %v10684_v30 }
 0x7a6   :  { %9912 = vmatmul.mubr.msk.f32.vlgmr.msra.gmra.mxu0 %vm543_vm3, %v11689_v43  ;;  %v1051_v18 = vadd.f32 %v11689_v43, %v11645_v4  ;;  %v2041_v4 = vld [vmem:[%s12937_s18 + $0x8] sm:$0xff]  ;;  %s12948_s18 = sld [smem:[#allocation52_spill]] }
 0x7a7   :  { %9920 = vmatpush3.xpose.msk.msra.mxu0 %vm543_vm3, %v1208_v42  ;;  %9921 = vmatprep.mubr.msk.f32.mxu0 %vm11235_vm2, %v11234_v26  ;;  %v2042_v42 = vlaneseq }
 0x7a8   :  { %9929 = vmatprep.subr.mxu0 %v11234_v26 }
 0x7aa   :  { %9922 = vmatmul.mubr.msk.f32.vlgmr.msra.gmra.mxu0 %vm543_vm3, %v1206_v44  ;;  %v11760_v44 = vand.u32 127, %v2042_v42 }
 0x7ab   :  { %9931 = vmatprep.mubr.msk.f32.mxu0 %vm11235_vm2, %v11234_v26 }
 0x7b2   :  { %1463 = vrot.lane.b32.xlu0 %v11593_v29, %s11243_s20 }
 0x7b6   :  { %1617 = vrot.lane.b32.xlu0 %v11593_v29, %s11244_s13 }
 0x825   :  { %v1368_v45 = vpop.xlane.xlu0 %1367 }
 0x826   :  { %v1370_v46 = vsub.f32 %v1362_v37, %v1368_v45 }
 0x828   :  { %v1373_v47 = vmul.f32 1.442695, %v1370_v46 }
 0x829   :  { %v1464_v48 = vpop.permute.xlu0 %1463 }
 0x82a   :  { %10687 = vpow2.f32 %v1373_v47  ;;  %9935 = vmatpush3.msra.mxu1 %v1464_v48  ;;  %v2067_v48 = vld [vmem:[%s12938_s22 + $0x58] sm:$0xff] }
 0x82b   :  { %9944 = vmatprep.subr.mxu1 %v11234_v26 }
 0x82d   :  { %v1618_v1 = vpop.permute.xlu0 %1617 }
 0x837   :  { %v10688_v49 = vpop.eup %10687 }
 0x838   :  { %v1378_v51 = vsel %vm543_vm3, %v10688_v49, 0.0 }
 0x839   :  { %1379 = vadd.xlane.f32.xlu1 %v1378_v51  ;;  %v2066_v51 = vld [vmem:[%s12938_s22 + $0x50] sm:$0xff] }
 0x84a   :  { %1619 = vrot.lane.b32.xlu1 %v11593_v29, %s11245_s16 }
 0x866   :  { %v11708_v52 = vpop.f32.mrf.mxu0 }
 0x868   :  { %v9913_v53 = vpop.f32.mrf.mxu0 }
 0x86a   :  { %v1279_v54 = vpop.f32.mrf.mxu0 }
 0x86b   :  { %v1361_v55 = vmul.f32 0.35355338, %v1279_v54  ;;  %v2065_v54 = vld [vmem:[%s12938_s22 + $0x48] sm:$0xff] }
 0x86c   :  { %v9923_v56 = vpop.f32.mrf.mxu0 }
 0x86d   :  { %v1363_v57 = vsel %vm543_vm3, %v1361_v55, -inf  ;;  %v2063_v56 = vld [vmem:[%s12938_s22 + $0x38] sm:$0xff] }
 0x86e   :  { %1364 = vmax.xlane.f32.xlu1 %v1363_v57  ;;  %v2062_v57 = vld [vmem:[%s12938_s22 + $0x30] sm:$0xff] }
 0x87f   :  { %1541 = vrot.lane.b32.xlu1 %v11597_v31, %s11245_s16 }
 0x883   :  { %1539 = vrot.lane.b32.xlu1 %v11597_v31, %s11244_s13 }
 0x8c2   :  { %v1380_v59 = vpop.xlane.xlu1 %1379 }
 0x8c3   :  { %10689 = vrcp.f32 %v1380_v59  ;;  %v2061_v59 = vld [vmem:[%s12938_s22 + $0x28] sm:$0xff] }
 0x8c6   :  { %v1620_v63 = vpop.permute.xlu1 %1619 }
 0x8d0   :  { %v10690_v60 = vpop.eup %10689 }
 0x8d1   :  { %v1384_v62 = vmul.f32 %v10690_v60, %v10688_v49  ;;  %v2060_v60 = vld [vmem:[%s12938_s22 + $0x20] sm:$0xff] }
 0x8d3   :  { %v11717_v0 = vadd.f32 %v1384_v62, %v1052_v61  ;;  %9937 = vmatmul.mubr.msk.f32.vlgmr.msra.gmra.mxu1 %vm543_vm3, %v1384_v62  ;;  %v2059_v61 = vld [vmem:[%s12938_s22 + $0x18] sm:$0xff]  ;;  %v2058_v62 = vld [vmem:[%s12938_s22 + $0x10] sm:$0xff] }
 0x8d4   :  { %9945 = vmatpush3.xpose.msk.msra.mxu1 %vm543_vm3, %v1620_v63  ;;  %9946 = vmatprep.mubr.msk.f32.mxu1 %vm11235_vm2, %v11234_v26 }
 0x8d5   :  { %9954 = vmatprep.subr.mxu1 %v11234_v26 }
 0x8d7   :  { %9947 = vmatmul.mubr.msk.f32.vlgmr.msra.gmra.mxu1 %vm543_vm3, %v1618_v1  ;;  %v2056_v1 = vld [vmem:[%s12938_s22] sm:$0xff] }
 0x8d8   :  { %9956 = vmatprep.mubr.msk.f32.mxu1 %vm11235_vm2, %v11234_v26 }
 0x8f7   :  { %v1365_v50 = vpop.xlane.xlu1 %1364 }
 0x8f8   :  { %v1369_v2 = vsub.f32 %v1361_v55, %v1365_v50  ;;  %v2064_v55 = vld [vmem:[%s12938_s22 + $0x40] sm:$0xff] }
 0x8fa   :  { %v1371_v3 = vmul.f32 1.442695, %v1369_v2 }
 0x8fb   :  { %v1542_v17 = vpop.permute.xlu1 %1541 }
 0x8fc   :  { %10691 = vpow2.f32 %v1371_v3 }
 0x8ff   :  { %v1540_v21 = vpop.permute.xlu1 %1539 }
 0x909   :  { %v10692_v5 = vpop.eup %10691 }
 0x90a   :  { %v1375_v6 = vsel %vm543_vm3, %v10692_v5, 0.0 }
 0x90b   :  { %1376 = vadd.xlane.f32.xlu0 %v1375_v6 }
 0x921   :  { %1387 = vrot.lane.b32.xlu0 %v11597_v31, %s11243_s20 }
 0x993   :  { %v11730_v7 = vpop.f32.mrf.mxu1 }
 0x994   :  { %v1377_v8 = vpop.xlane.xlu0 %1376 }
 0x995   :  { %10693 = vrcp.f32 %v1377_v8  ;;  %v9938_v9 = vpop.f32.mrf.mxu1 }
 0x997   :  { %v1691_v10 = vpop.f32.mrf.mxu1 }
 0x998   :  { %v1696_v11 = vmul.f32 0.35355338, %v1691_v10  ;;  %v1388_v13 = vpop.permute.xlu0 %1387 }
 0x999   :  { %9930 = vmatpush3.msra.mxu0 %v1388_v13  ;;  %v9948_v14 = vpop.f32.mrf.mxu1 }
 0x99a   :  { %v1700_v15 = vsel %vm543_vm3, %v1696_v11, -inf  ;;  %9939 = vmatprep.subr.mxu0 %v11234_v26 }
 0x99b   :  { %1701 = vmax.xlane.f32.xlu0 %v1700_v15 }
 0x9a2   :  { %v10694_v16 = vpop.eup %10693 }
 0x9a3   :  { %v1382_v19 = vmul.f32 %v10694_v16, %v10692_v5 }
 0x9a5   :  { %v11736_v20 = vadd.f32 %v1382_v19, %v1051_v18  ;;  %9932 = vmatmul.mubr.msk.f32.vlgmr.msra.gmra.mxu0 %vm543_vm3, %v1382_v19 }
 0x9a6   :  { %9940 = vmatpush3.xpose.msk.msra.mxu0 %vm543_vm3, %v1542_v17  ;;  %9941 = vmatprep.mubr.msk.f32.mxu0 %vm11235_vm2, %v11234_v26  ;;  %v2155_v17 = vld [vmem:[%s12939_s26] sm:$0xff]  ;;  %s12950_s26 = sld [smem:[#allocation53_spill]] }
 0x9a7   :  { %9949 = vmatprep.subr.mxu0 %v11234_v26 }
 0x9a9   :  { %9942 = vmatmul.mubr.msk.f32.vlgmr.msra.gmra.mxu0 %vm543_vm3, %v1540_v21  ;;  %v9408_v21 = vld [vmem:[%s12940_s4] ss:$0 sm:$0xff]  ;;  %s12951_s4 = sld [smem:[#allocation54_spill]] }
 0x9aa   :  { %9951 = vmatprep.mubr.msk.f32.mxu0 %vm11235_vm2, %v11234_v26 }
 0x9b1   :  { %1797 = vrot.lane.b32.xlu0 %v11593_v29, %s11246_s21 }
 0x9b5   :  { %2048 = vperm.xlu0 %10639, %v2041_v4  }
 0xa24   :  { %v1702_v22 = vpop.xlane.xlu0 %1701 }
 0xa25   :  { %v1704_v23 = vsub.f32 %v1696_v11, %v1702_v22 }
 0xa27   :  { %v1707_v27 = vmul.f32 1.442695, %v1704_v23 }
 0xa28   :  { %v1798_v28 = vpop.permute.xlu0 %1797 }
 0xa29   :  { %10695 = vpow2.f32 %v1707_v27  ;;  %9955 = vmatpush3.msra.mxu1 %v1798_v28 }
 0xa2a   :  { %9970 = vmatprep.subr.msk.mxu1 %vm2076_vm4, %v2068_v34 }
 0xa30   :  { %v2049_v63 = vpop.permute.xlu0 %2048 }
 0xa31   :  { %vm2051_vm7 = vcmp.eq.s32.totalorder %v2049_v63, %v11760_v44 }
 0xa32   :  { %v9404_v50 = vsel %vm2051_vm7, 1.0, %v11234_v26 }
 0xa36   :  { %v10696_v30 = vpop.eup %10695 }
 0xa37   :  { %v1712_v32 = vsel %vm543_vm3, %v10696_v30, 0.0 }
 0xa38   :  { %1713 = vadd.xlane.f32.xlu1 %v1712_v32 }
 0xa49   :  { %2045 = vperm.xlu1 %10640, %v2040_v35  }
 0xa65   :  { %v11753_v36 = vpop.f32.mrf.mxu0 }
 0xa67   :  { %v9933_v29 = vpop.f32.mrf.mxu0 }
 0xa69   :  { %v1613_v37 = vpop.f32.mrf.mxu0 }
 0xa6a   :  { %v11755_v38 = vmul.f32 0.35355338, %v1613_v37 }
 0xa6b   :  { %v9943_v39 = vpop.f32.mrf.mxu0 }
 0xa6c   :  { %v1697_v40 = vsel %vm543_vm3, %v11755_v38, -inf  ;;  %v449_v39 = vld [vmem:[%s12941_s25 + $0x10] sm:$0xff] }
 0xa6d   :  { %1698 = vmax.xlane.f32.xlu1 %v1697_v40  ;;  %v448_v40 = vld [vmem:[%s12941_s25 + $0x8] sm:$0xff] }
 0xac1   :  { %v1714_v41 = vpop.xlane.xlu1 %1713 }
 0xac2   :  { %10697 = vrcp.f32 %v1714_v41  ;;  %v447_v41 = vld [vmem:[%s12941_s25] sm:$0xff] }
 0xac5   :  { %v2046_v43 = vpop.permute.xlu1 %2045 }
 0xac6   :  { %vm2050_vm5 = vcmp.eq.s32.totalorder %v2046_v43, %v11760_v44  ;;  %v2232_v43 = vld [vmem:[%s12942_s28 + $0x18] sm:$0xff] }
 0xac7   :  { %v9403_v47 = vsel %vm2050_vm5, 1.0, %v11234_v26 }
 0xacf   :  { %v10698_v45 = vpop.eup %10697 }
 0xad0   :  { %v1718_v46 = vmul.f32 %v10698_v45, %v10696_v30 }
 0xad2   :  { %9957 = vmatmul.mubr.msk.f32.vlgmr.msra.gmra.mxu1 %vm543_vm3, %v1718_v46  ;;  %v1720_v49 = vadd.f32 %v1718_v46, %v11717_v0  ;;  %v2057_v0 = vld [vmem:[%s12938_s22 + $0x8] sm:$0xff]  ;;  %s12949_s22 = sld [smem:[#allocation55_spill]] }
 0xad3   :  { %9971 = vmatpush3.msk.msra.mxu1 %vm2076_vm4, %v2068_v34  ;;  %9996 = vmatprep.mubr.msk.f32.mxu1 %vm2069_vm6, %v9403_v47 }
 0xad4   :  { %9972 = vmatprep.subr.mxu1 %v2067_v48  ;;  %v1992_v53 = vmul.f32 0.25, %v1720_v49 }
 0xad5   :  { %9973 = vmatpush3.msra.mxu1 %v2067_v48 }
 0xad6   :  { %9974 = vmatprep.subr.mxu1 %v2066_v51  ;;  %2039 = vst.msk [vmem:[#allocation21 + $0x8] sm:$0xff] %vm543_vm3, %v1992_v53 }
 0xad7   :  { %9975 = vmatpush3.msra.mxu1 %v2066_v51 }
 0xad8   :  { %9976 = vmatprep.subr.mxu1 %v2065_v54 }
 0xad9   :  { %9977 = vmatpush3.msra.mxu1 %v2065_v54 }
 0xada   :  { %9978 = vmatprep.subr.mxu1 %v2064_v55 }
 0xadb   :  { %9979 = vmatpush3.msra.mxu1 %v2064_v55 }
 0xadc   :  { %9980 = vmatprep.subr.mxu1 %v2063_v56 }
 0xadd   :  { %9981 = vmatpush3.msra.mxu1 %v2063_v56 }
 0xade   :  { %9982 = vmatprep.subr.mxu1 %v2062_v57 }
 0xadf   :  { %9983 = vmatpush3.msra.mxu1 %v2062_v57 }
 0xae0   :  { %9984 = vmatprep.subr.mxu1 %v2061_v59 }
 0xae1   :  { %9985 = vmatpush3.msra.mxu1 %v2061_v59 }
 0xae2   :  { %9986 = vmatprep.subr.mxu1 %v2060_v60 }
 0xae3   :  { %9987 = vmatpush3.msra.mxu1 %v2060_v60 }
 0xae4   :  { %9988 = vmatprep.subr.mxu1 %v2059_v61 }
 0xae5   :  { %9989 = vmatpush3.msra.mxu1 %v2059_v61 }
 0xae6   :  { %9990 = vmatprep.subr.mxu1 %v2058_v62 }
 0xae7   :  { %9991 = vmatpush3.msra.mxu1 %v2058_v62 }
 0xae8   :  { %9992 = vmatprep.subr.mxu1 %v2057_v0 }
 0xae9   :  { %9993 = vmatpush3.msra.mxu1 %v2057_v0 }
 0xaea   :  { %9994 = vmatprep.subr.mxu1 %v2056_v1 }
 0xaeb   :  { %9995 = vmatpush3.msra.mxu1 %v2056_v1 }
 0xaec   :  { %9997 = vmatmul.mubr.msk.f32.vlgmr.msra.gmra.mxu1 %vm2069_vm6, %v9404_v50  ;;  %10030 = vmatprep.subr.mxu1 %v11234_v26 }
 0xaed   :  { %10032 = vmatprep.mubr.msk.f32.mxu1 %vm11235_vm2, %v11234_v26 }
 0xaf6   :  { %v1699_v2 = vpop.xlane.xlu1 %1698 }
 0xaf7   :  { %v1703_v3 = vsub.f32 %v11755_v38, %v1699_v2  ;;  %v450_v38 = vld [vmem:[%s12941_s25 + $0x18] sm:$0xff]  ;;  %v2231_v2 = vld [vmem:[%s12942_s28 + $0x10] sm:$0xff]  ;;  %s12952_s25 = sld [smem:[#allocation57_spill]] }
 0xaf9   :  { %v1705_v5 = vmul.f32 1.442695, %v1703_v3  ;;  %v2230_v3 = vld [vmem:[%s12942_s28 + $0x8] sm:$0xff] }
 0xafb   :  { %10699 = vpow2.f32 %v1705_v5  ;;  %v2229_v5 = vld [vmem:[%s12942_s28] sm:$0xff]  ;;  %s12953_s28 = sld [smem:[#allocation56_spill]] }
 0xb08   :  { %v10700_v6 = vpop.eup %10699 }
 0xb09   :  { %v1709_v8 = vsel %vm543_vm3, %v10700_v6, 0.0 }
 0xb0a   :  { %1710 = vadd.xlane.f32.xlu0 %v1709_v8  ;;  %v9409_v8 = vld [vmem:[%s12943_s10] ss:$0 sm:$0xff]  ;;  %s12954_s10 = sld [smem:[#allocation46_spill]] }
 0xb20   :  { %1721 = vrot.lane.b32.xlu0 %v11597_v31, %s11246_s21 }
 0xb24   :  { %1877 = vrot.lane.b32.xlu0 %v11685_v33, %s11247_s0 }
 0xb28   :  { %1883 = vrot.lane.b32.xlu0 %v11753_v36, %s11248_s6 }
 0xb2c   :  { %1885 = vrot.lane.b32.xlu0 %v11730_v7, %s11248_s6 }
 0xb92   :  { %v1869_v9 = vpop.f32.mrf.mxu1 }
 0xb93   :  { %v1711_v10 = vpop.xlane.xlu0 %1710 }
 0xb94   :  { %10701 = vrcp.f32 %v1711_v10  ;;  %v9958_v11 = vpop.f32.mrf.mxu1 }
 0xb97   :  { %v1722_v13 = vpop.permute.xlu0 %1721 }
 0xb98   :  { %9950 = vmatpush3.msra.mxu0 %v1722_v13  ;;  %v9410_v13 = vld [vmem:[%s12944_s11] ss:$0 sm:$0xff]  ;;  %s12955_s11 = sld [smem:[#allocation58_spill]] }
 0xb99   :  { %9959 = vmatprep.subr.mxu0 %v450_v38 }
 0xb9b   :  { %v1878_v47 = vpop.permute.xlu0 %1877 }
 0xb9c   :  { %v1898_v63 = vsel %vm543_vm3, %v11641_v58, %v1878_v47 }
 0xb9f   :  { %v1884_v48 = vpop.permute.xlu0 %1883 }
 0xba1   :  { %v10702_v31 = vpop.eup %10701 }
 0xba2   :  { %v1716_v14 = vmul.f32 %v10702_v31, %v10700_v6 }
 0xba3   :  { %v1886_v53 = vpop.permute.xlu0 %1885 }
 0xba4   :  { %9952 = vmatmul.mubr.msk.f32.vlgmr.msra.gmra.mxu0 %vm543_vm3, %v1716_v14  ;;  %v1719_v33 = vadd.f32 %v1716_v14, %v11736_v20 }
 0xba5   :  { %9960 = vmatpush3.msra.mxu0 %v450_v38 }
 0xba6   :  { %v1991_v15 = vmul.f32 0.25, %v1719_v33  ;;  %9961 = vmatprep.subr.mxu0 %v449_v39 }
 0xba7   :  { %9962 = vmatpush3.msra.mxu0 %v449_v39 }
 0xba8   :  { %2038 = vst.msk [vmem:[#allocation21] sm:$0xff] %vm543_vm3, %v1991_v15  ;;  %9963 = vmatprep.subr.mxu0 %v448_v40 }
 0xba9   :  { %9964 = vmatpush3.msra.mxu0 %v448_v40 }
 0xbaa   :  { %9965 = vmatprep.subr.mxu0 %v447_v41 }
 0xbab   :  { %9966 = vmatpush3.msra.mxu0 %v447_v41 }
 0xbac   :  { %v9998_v16 = vpop.f32.mrf.mxu1  ;;  %9999 = vmatprep.subr.mxu0 %v2232_v43 }
 0xbad   :  { %v2157_v7 = vadd.f32 %v9998_v16, %v2155_v17 }
 0xbae   :  { %v2146_v18 = vpop.f32.mrf.mxu1 }
 0xbaf   :  { %v2156_v19 = vadd.f32 %v2155_v17, %v2146_v18  ;;  %v2166_v23 = vadd.f32 %v9408_v21, %v2157_v7  ;;  %v9411_v17 = vld [vmem:[%s12945_s29] ss:$0 sm:$0xff]  ;;  %s12956_s29 = sld [smem:[#allocation42_spill]] }
 0xbb1   :  { %v2165_v4 = vadd.f32 %v9408_v21, %v2156_v19  ;;  %v2190_v27 = vsel %vm458_vm1, %v2166_v23, 0.0 }
 0xbb3   :  { %v2187_v22 = vsel %vm458_vm1, %v2165_v4, 0.0 }
 0xbb4   :  { %2188 = vadd.xlane.f32.xlu1 %v2187_v22 }
 0xbb8   :  { %2191 = vadd.xlane.f32.xlu1 %v2190_v27  ;;  %v11873_v27 = vshrl.u32 %v2042_v42, 7 }
 0xbc9   :  { %1875 = vrot.lane.b32.xlu1 %v11708_v52, %s11247_s0 }
 0xc3d   :  { %v2189_v20 = vpop.xlane.xlu1 %2188 }
 0xc3e   :  { %v2193_v28 = vmul.f32 0.03125, %v2189_v20 }
 0xc40   :  { %v11806_v34 = vsub.f32 %v2165_v4, %v2193_v28  ;;  %v2168_v28 = vld [vmem:[%s12946_s9 + $0x1] sm:$0x1] }
 0xc41   :  { %v2192_v30 = vpop.xlane.xlu1 %2191 }
 0xc42   :  { %v2194_v32 = vmul.f32 0.03125, %v2192_v30  ;;  %v2197_v37 = vmul.f32 %v11806_v34, %v11806_v34  ;;  %v11877_v30 = vsub.s32 0, %v11873_v27 }
 0xc44   :  { %v2196_v35 = vsub.f32 %v2166_v23, %v2194_v32  ;;  %v2199_v52 = vsel %vm458_vm1, %v2197_v37, 0.0  ;;  %v2167_v23 = vld [vmem:[%s12946_s9] sm:$0x1]  ;;  %s12957_s9 = sld [smem:[#allocation43_spill]] }
 0xc45   :  { %v1876_v49 = vpop.permute.xlu1 %1875  ;;  %v2169_v20 = vsub.f32 1.0, %v2167_v23 }
 0xc46   :  { %v2198_v36 = vmul.f32 %v2196_v35, %v2196_v35  ;;  %v1897_v55 = vsel %vm543_vm3, %v11664_v12, %v1876_v49  ;;  %v1901_v12 = vsel %vm1899_vm8, %v1898_v63, %v1886_v53 }
 0xc47   :  { %v1900_v61 = vsel %vm1899_vm8, %v1897_v55, %v1884_v48  ;;  %v2171_v32 = vmul.f32 -1e+09, %v2169_v20 }
 0xc48   :  { %v2202_v29 = vsel %vm458_vm1, %v2198_v36, 0.0 }
 0xc49   :  { %2203 = vadd.xlane.f32.xlu1 %v2202_v29 }
 0xc4d   :  { %2200 = vadd.xlane.f32.xlu1 %v2199_v52 }
 0xc5e   :  { %1893 = vrot.lane.b32.xlu1 %v1869_v9, %s11249_s2 }
 0xc64   :  { %v1793_v45 = vpop.f32.mrf.mxu0 }
 0xc65   :  { %1891 = vrot.lane.b32.xlu0 %v1793_v45, %s11249_s2 }
 0xc66   :  { %v9953_v46 = vpop.f32.mrf.mxu0 }
 0xcd2   :  { %v2204_v51 = vpop.xlane.xlu1 %2203 }
 0xcd3   :  { %v2206_v54 = vmul.f32 0.03125, %v2204_v51 }
 0xcd5   :  { %v2208_v56 = vadd.f32 1e-12, %v2206_v54 }
 0xcd6   :  { %v2201_v57 = vpop.xlane.xlu1 %2200 }
 0xcd7   :  { %10703 = vrsqrt.f32 %v2208_v56  ;;  %v2205_v59 = vmul.f32 0.03125, %v2201_v57  ;;  %v1892_v60 = vpop.permute.xlu0 %1891 }
 0xcd8   :  { %v1902_v62 = vsel %vm342_vm0, %v1900_v61, %v1892_v60 }
 0xcd9   :  { %v2207_v0 = vadd.f32 1e-12, %v2205_v59  ;;  %9967 = vmatprep.mubr.msk.f32.mxu0 %vm458_vm1, %v1902_v62 }
 0xcda   :  { %v1894_v1 = vpop.permute.xlu1 %1893 }
 0xcdb   :  { %10705 = vrsqrt.f32 %v2207_v0  ;;  %v1903_v50 = vsel %vm342_vm0, %v1901_v12, %v1894_v1 }
 0xcdc   :  { %9968 = vmatmul.mubr.msk.f32.vlgmr.msra.gmra.mxu0 %vm458_vm1, %v1903_v50 }
 0xcdd   :  { %10000 = vmatpush3.msra.mxu0 %v2232_v43 }
 0xcde   :  { %10001 = vmatprep.subr.mxu0 %v2231_v2 }
 0xcdf   :  { %10002 = vmatpush3.msra.mxu0 %v2231_v2 }
 0xce0   :  { %10003 = vmatprep.subr.mxu0 %v2230_v3 }
 0xce1   :  { %10004 = vmatpush3.msra.mxu0 %v2230_v3 }
 0xce2   :  { %10005 = vmatprep.subr.mxu0 %v2229_v5 }
 0xce3   :  { %10006 = vmatpush3.msra.mxu0 %v2229_v5 }
 0xce4   :  { %v10704_v58 = vpop.eup %10703  ;;  %10010 = vmatprep.subr.mxu0 %v11234_v26 }
 0xce5   :  { %v2212_v6 = vmul.f32 %v10704_v58, %v2196_v35  ;;  %v11880_v35 = vrot.slane %v2171_v32, %v11877_v30 }
 0xce7   :  { %v2220_v11 = vmul.f32 %v9409_v8, %v2212_v6 }
 0xce8   :  { %v10706_v9 = vpop.eup %10705 }
 0xce9   :  { %v2211_v10 = vmul.f32 %v10706_v9, %v11806_v34  ;;  %v11838_v33 = vadd.f32 %v9410_v13, %v2220_v11  ;;  %v2170_v34 = vsub.f32 1.0, %v2168_v28 }
 0xceb   :  { %v2219_v31 = vmul.f32 %v9409_v8, %v2211_v10  ;;  %v2172_v36 = vmul.f32 -1e+09, %v2170_v34 }
 0xced   :  { %v11836_v14 = vadd.f32 %v9410_v13, %v2219_v31  ;;  %v11884_v39 = vrot.slane %v2172_v36, %v11877_v30 }
 0xcef   :  { %10007 = vmatprep.mubr.msk.f32.mxu0 %vm458_vm1, %v11836_v14 }
 0xcf0   :  { %10008 = vmatmul.mubr.msk.f32.vlgmr.msra.gmra.mxu0 %vm458_vm1, %v11838_v33 }
 0xcf1   :  { %10012 = vmatprep.mubr.msk.f32.mxu0 %vm11235_vm2, %v11234_v26 }
 0xd9c   :  { %v11846_v15 = vpop.f32.mrf.mxu0 }
 0xd9e   :  { %v11848_v16 = vpop.f32.mrf.mxu0 }
 0xdb0   :  { %v10009_v18 = vpop.f32.mrf.mxu0 }
 0xdb1   :  { %v11851_v7 = vadd.f32 %v10009_v18, %v9411_v17 }
 0xdb2   :  { %v2317_v19 = vpop.f32.mrf.mxu0 }
 0xdb3   :  { %v11853_v21 = vadd.f32 %v9411_v17, %v2317_v19  ;;  %2404 = vrot.lane.b32.xlu1 %v11851_v7, %s11236_s17 }
 0xdb5   :  { %2327 = vrot.lane.b32.xlu0 %v11853_v21, %s11236_s17 }
 0xe25   :  { %v2405_v22 = vpop.permute.xlu1 %2404 }
 0xe27   :  { %v2328_v4 = vpop.permute.xlu0 %2327 }
 0xe28   :  { %10011 = vmatpush3.xpose.msk.msra.mxu0 %vm543_vm3, %v2328_v4 }
 0xe29   :  { %10015 = vmatprep.subr.mxu0 %v11234_v26 }
 0xe2b   :  { %10013 = vmatmul.mubr.msk.f32.vlgmr.msra.gmra.mxu0 %vm543_vm3, %v11853_v21 }
 0xe2c   :  { %10016 = vmatpush3.xpose.msk.msra.mxu0 %vm543_vm3, %v2405_v22  ;;  %10017 = vmatprep.mubr.msk.f32.mxu0 %vm11235_vm2, %v11234_v26 }
 0xe2d   :  { %10020 = vmatprep.subr.mxu0 %v11234_v26 }
 0xe2f   :  { %10018 = vmatmul.mubr.msk.f32.vlgmr.msra.gmra.mxu0 %vm543_vm3, %v11851_v7 }
 0xe30   :  { %10022 = vmatprep.mubr.msk.f32.mxu0 %vm11235_vm2, %v11234_v26 }
 0xeeb   :  { %v2399_v29 = vpop.f32.mrf.mxu0 }
 0xeec   :  { %v2480_v37 = vmul.f32 0.35355338, %v2399_v29 }
 0xeed   :  { %v10014_v52 = vpop.f32.mrf.mxu0 }
 0xeee   :  { %v2482_v38 = vadd.f32 %v2480_v37, %v11880_v35 }
 0xeef   :  { %v2476_v42 = vpop.f32.mrf.mxu0 }
 0xef0   :  { %v2481_v40 = vmul.f32 0.35355338, %v2476_v42  ;;  %v2484_v41 = vsel %vm543_vm3, %v2482_v38, -inf }
 0xef1   :  { %2485 = vmax.xlane.f32.xlu0 %v2484_v41  ;;  %v10019_v43 = vpop.f32.mrf.mxu0 }
 0xef2   :  { %v2483_v45 = vadd.f32 %v2481_v40, %v11884_v39 }
 0xef4   :  { %v2487_v46 = vsel %vm543_vm3, %v2483_v45, -inf }
 0xef5   :  { %2488 = vmax.xlane.f32.xlu1 %v2487_v46 }
 0xf06   :  { %2506 = vrot.lane.b32.xlu1 %v11853_v21, %s11237_s3 }
 0xf07   :  { %2582 = vrot.lane.b32.xlu0 %v11851_v7, %s11237_s3 }
 0xf0a   :  { %2660 = vrot.lane.b32.xlu1 %v11853_v21, %s11239_s14 }
 0xf0e   :  { %2738 = vrot.lane.b32.xlu1 %v11851_v7, %s11239_s14 }
 0xf12   :  { %2736 = vrot.lane.b32.xlu1 %v11851_v7, %s11238_s8 }
 0xf7a   :  { %v2486_v47 = vpop.xlane.xlu0 %2485 }
 0xf7b   :  { %v2490_v48 = vsub.f32 %v2482_v38, %v2486_v47 }
 0xf7d   :  { %v2492_v49 = vmul.f32 1.442695, %v2490_v48 }
 0xf7e   :  { %v2489_v51 = vpop.xlane.xlu1 %2488  ;;  %v2583_v62 = vpop.permute.xlu0 %2582 }
 0xf7f   :  { %10707 = vpow2.f32 %v2492_v49  ;;  %v2491_v53 = vsub.f32 %v2483_v45, %v2489_v51 }
 0xf81   :  { %v2494_v54 = vmul.f32 1.442695, %v2491_v53 }
 0xf82   :  { %v2507_v55 = vpop.permute.xlu1 %2506 }
 0xf83   :  { %10709 = vpow2.f32 %v2494_v54  ;;  %10021 = vmatpush3.msra.mxu0 %v2507_v55 }
 0xf84   :  { %10025 = vmatprep.subr.mxu0 %v11234_v26 }
 0xf86   :  { %v2661_v56 = vpop.permute.xlu1 %2660 }
 0xf87   :  { %10031 = vmatpush3.xpose.msk.msra.mxu1 %vm543_vm3, %v2661_v56 }
 0xf88   :  { %10040 = vmatprep.subr.mxu1 %v11234_v26 }
 0xf8a   :  { %v2739_v3 = vpop.permute.xlu1 %2738 }
 0xf8c   :  { %v10708_v57 = vpop.eup %10707 }
 0xf8d   :  { %v2496_v59 = vsel %vm543_vm3, %v10708_v57, 0.0 }
 0xf8e   :  { %2497 = vadd.xlane.f32.xlu0 %v2496_v59  ;;  %v2737_v58 = vpop.permute.xlu1 %2736 }
 0xf90   :  { %v10710_v60 = vpop.eup %10709 }
 0xf91   :  { %v2499_v61 = vsel %vm543_vm3, %v10710_v60, 0.0 }
 0xf92   :  { %2500 = vadd.xlane.f32.xlu0 %v2499_v61 }
 0xfa8   :  { %2658 = vrot.lane.b32.xlu0 %v11853_v21, %s11238_s8 }
0x1017   :  { %v2498_v63 = vpop.xlane.xlu0 %2497 }
0x1018   :  { %10711 = vrcp.f32 %v2498_v63 }
0x101b   :  { %v2501_v0 = vpop.xlane.xlu0 %2500 }
0x101c   :  { %10713 = vrcp.f32 %v2501_v0 }
0x101f   :  { %v2659_v12 = vpop.permute.xlu0 %2658 }
0x1020   :  { %10033 = vmatmul.mubr.msk.f32.vlgmr.msra.gmra.mxu1 %vm543_vm3, %v2659_v12 }
0x1021   :  { %10042 = vmatprep.mubr.msk.f32.mxu1 %vm11235_vm2, %v11234_v26 }
0x1025   :  { %v10712_v1 = vpop.eup %10711 }
0x1026   :  { %v2503_v50 = vmul.f32 %v10712_v1, %v10708_v57 }
0x1028   :  { %10023 = vmatmul.mubr.msk.f32.vlgmr.msra.gmra.mxu0 %vm543_vm3, %v2503_v50 }
0x1029   :  { %v10714_v2 = vpop.eup %10713  ;;  %10026 = vmatpush3.msra.mxu0 %v2583_v62  ;;  %10027 = vmatprep.mubr.msk.f32.mxu0 %vm11235_vm2, %v11234_v26 }
0x102a   :  { %10035 = vmatprep.subr.mxu0 %v11234_v26  ;;  %v2505_v5 = vmul.f32 %v10714_v2, %v10710_v60 }
0x102c   :  { %10028 = vmatmul.mubr.msk.f32.vlgmr.msra.gmra.mxu0 %vm543_vm3, %v2505_v5 }
0x102d   :  { %10036 = vmatpush3.xpose.msk.msra.mxu0 %vm543_vm3, %v2739_v3  ;;  %10037 = vmatprep.mubr.msk.f32.mxu0 %vm11235_vm2, %v11234_v26 }
0x102e   :  { %10045 = vmatprep.subr.mxu0 %v11234_v26 }
0x1030   :  { %10038 = vmatmul.mubr.msk.f32.vlgmr.msra.gmra.mxu0 %vm543_vm3, %v2737_v58 }
0x1031   :  { %10047 = vmatprep.mubr.msk.f32.mxu0 %vm11235_vm2, %v11234_v26 }
0x10e0   :  { %v2732_v6 = vpop.f32.mrf.mxu1 }
0x10e1   :  { %v2814_v8 = vmul.f32 0.35355338, %v2732_v6 }
0x10e2   :  { %v10034_v9 = vpop.f32.mrf.mxu1 }
0x10e3   :  { %v2816_v10 = vadd.f32 %v2814_v8, %v11880_v35 }
0x10e5   :  { %v2818_v11 = vsel %vm543_vm3, %v2816_v10, -inf }
0x10e6   :  { %2819 = vmax.xlane.f32.xlu0 %v2818_v11 }
0x10e8   :  { %v11923_v13 = vpop.f32.mrf.mxu0 }
0x10ea   :  { %v10024_v31 = vpop.f32.mrf.mxu0 }
0x10ec   :  { %v11925_v17 = vpop.f32.mrf.mxu0 }
0x10ee   :  { %v10029_v18 = vpop.f32.mrf.mxu0 }
0x10f0   :  { %v2810_v19 = vpop.f32.mrf.mxu0 }
0x10f1   :  { %v2815_v4 = vmul.f32 0.35355338, %v2810_v19 }
0x10f2   :  { %v10039_v22 = vpop.f32.mrf.mxu0 }
0x10f3   :  { %v2817_v23 = vadd.f32 %v2815_v4, %v11884_v39 }
0x10f5   :  { %v2821_v20 = vsel %vm543_vm3, %v2817_v23, -inf }
0x10f6   :  { %2822 = vmax.xlane.f32.xlu1 %v2821_v20 }
0x1107   :  { %2840 = vrot.lane.b32.xlu1 %v11853_v21, %s11240_s12 }
0x110b   :  { %2994 = vrot.lane.b32.xlu1 %v11853_v21, %s11242_s30 }
0x110f   :  { %3072 = vrot.lane.b32.xlu1 %v11851_v7, %s11242_s30 }
0x1113   :  { %3070 = vrot.lane.b32.xlu1 %v11851_v7, %s11241_s27 }
0x116f   :  { %v2820_v28 = vpop.xlane.xlu0 %2819 }
0x1170   :  { %v2824_v32 = vsub.f32 %v2816_v10, %v2820_v28 }
0x1172   :  { %v2826_v34 = vmul.f32 1.442695, %v2824_v32 }
0x1174   :  { %10715 = vpow2.f32 %v2826_v34 }
0x117f   :  { %v2823_v36 = vpop.xlane.xlu1 %2822 }
0x1180   :  { %v2825_v38 = vsub.f32 %v2817_v23, %v2823_v36 }
0x1181   :  { %v10716_v29 = vpop.eup %10715 }
0x1182   :  { %v2830_v37 = vsel %vm543_vm3, %v10716_v29, 0.0  ;;  %v2828_v42 = vmul.f32 1.442695, %v2825_v38 }
0x1183   :  { %2831 = vadd.xlane.f32.xlu0 %v2830_v37  ;;  %v2841_v52 = vpop.permute.xlu1 %2840 }
0x1184   :  { %10041 = vmatpush3.msra.mxu1 %v2841_v52  ;;  %10717 = vpow2.f32 %v2828_v42 }
0x1185   :  { %10050 = vmatprep.subr.mxu1 %v11234_v26 }
0x1187   :  { %v2995_v48 = vpop.permute.xlu1 %2994 }
0x118b   :  { %v3073_v54 = vpop.permute.xlu1 %3072 }
0x118f   :  { %v3071_v56 = vpop.permute.xlu1 %3070 }
0x1191   :  { %v10718_v40 = vpop.eup %10717 }
0x1192   :  { %v2833_v41 = vsel %vm543_vm3, %v10718_v40, 0.0 }
0x1199   :  { %2916 = vrot.lane.b32.xlu0 %v11851_v7, %s11240_s12 }
0x11b8   :  { %2834 = vadd.xlane.f32.xlu0 %v2833_v41 }
0x11ce   :  { %2992 = vrot.lane.b32.xlu0 %v11853_v21, %s11241_s27 }
0x120c   :  { %v2832_v43 = vpop.xlane.xlu0 %2831 }
0x120d   :  { %10719 = vrcp.f32 %v2832_v43 }
0x1210   :  { %v2917_v45 = vpop.permute.xlu0 %2916 }
0x1211   :  { %10046 = vmatpush3.msra.mxu0 %v2917_v45 }
0x1212   :  { %10055 = vmatprep.subr.mxu0 %v11234_v26 }
0x121a   :  { %v10720_v46 = vpop.eup %10719 }
0x121b   :  { %v2837_v47 = vmul.f32 %v10720_v46, %v10716_v29 }
0x121d   :  { %10043 = vmatmul.mubr.msk.f32.vlgmr.msra.gmra.mxu1 %vm543_vm3, %v2837_v47 }
0x121e   :  { %10051 = vmatpush3.xpose.msk.msra.mxu1 %vm543_vm3, %v2995_v48  ;;  %10052 = vmatprep.mubr.msk.f32.mxu1 %vm11235_vm2, %v11234_v26 }
0x121f   :  { %10060 = vmatprep.subr.mxu1 %v11234_v26 }
0x1241   :  { %v2835_v49 = vpop.xlane.xlu0 %2834 }
0x1242   :  { %10721 = vrcp.f32 %v2835_v49 }
0x1245   :  { %v2993_v51 = vpop.permute.xlu0 %2992 }
0x1246   :  { %10053 = vmatmul.mubr.msk.f32.vlgmr.msra.gmra.mxu1 %vm543_vm3, %v2993_v51 }
0x1247   :  { %10062 = vmatprep.mubr.msk.f32.mxu1 %vm11235_vm2, %v11234_v26 }
0x124f   :  { %v10722_v53 = vpop.eup %10721 }
0x1250   :  { %v2839_v55 = vmul.f32 %v10722_v53, %v10718_v40 }
0x1252   :  { %10048 = vmatmul.mubr.msk.f32.vlgmr.msra.gmra.mxu0 %vm543_vm3, %v2839_v55 }
0x1253   :  { %10056 = vmatpush3.xpose.msk.msra.mxu0 %vm543_vm3, %v3073_v54  ;;  %10057 = vmatprep.mubr.msk.f32.mxu0 %vm11235_vm2, %v11234_v26 }
0x1254   :  { %10065 = vmatprep.subr.mxu0 %v11234_v26 }
0x1256   :  { %10058 = vmatmul.mubr.msk.f32.vlgmr.msra.gmra.mxu0 %vm543_vm3, %v3071_v56 }
0x1257   :  { %10067 = vmatprep.mubr.msk.f32.mxu0 %vm11235_vm2, %v11234_v26 }
0x12dd   :  { %v11961_v57 = vpop.f32.mrf.mxu1 }
0x12df   :  { %v10044_v59 = vpop.f32.mrf.mxu1 }
0x1306   :  { %v3066_v60 = vpop.f32.mrf.mxu1 }
0x1307   :  { %v3148_v61 = vmul.f32 0.35355338, %v3066_v60 }
0x1308   :  { %v10054_v62 = vpop.f32.mrf.mxu1 }
0x1309   :  { %v3150_v63 = vadd.f32 %v3148_v61, %v11880_v35 }
0x130b   :  { %v3152_v0 = vsel %vm543_vm3, %v3150_v63, -inf }
0x130c   :  { %3153 = vmax.xlane.f32.xlu0 %v3152_v0 }
0x1312   :  { %v11965_v12 = vpop.f32.mrf.mxu0 }
0x1314   :  { %v10049_v1 = vpop.f32.mrf.mxu0 }
0x1316   :  { %v3144_v50 = vpop.f32.mrf.mxu0 }
0x1317   :  { %v3149_v2 = vmul.f32 0.35355338, %v3144_v50 }
0x1318   :  { %v10059_v3 = vpop.f32.mrf.mxu0 }
0x1319   :  { %v3151_v5 = vadd.f32 %v3149_v2, %v11884_v39 }
0x131b   :  { %v3155_v58 = vsel %vm543_vm3, %v3151_v5, -inf }
0x131c   :  { %3156 = vmax.xlane.f32.xlu1 %v3155_v58 }
0x132d   :  { %3174 = vrot.lane.b32.xlu1 %v11853_v21, %s11243_s20 }
0x1331   :  { %3328 = vrot.lane.b32.xlu1 %v11853_v21, %s11245_s16 }
0x1335   :  { %3406 = vrot.lane.b32.xlu1 %v11851_v7, %s11245_s16 }
0x1339   :  { %3404 = vrot.lane.b32.xlu1 %v11851_v7, %s11244_s13 }
0x1395   :  { %v3154_v6 = vpop.xlane.xlu0 %3153 }
0x1396   :  { %v3158_v8 = vsub.f32 %v3150_v63, %v3154_v6 }
0x1398   :  { %v3160_v9 = vmul.f32 1.442695, %v3158_v8 }
0x139a   :  { %10723 = vpow2.f32 %v3160_v9 }
0x13a5   :  { %v3157_v10 = vpop.xlane.xlu1 %3156 }
0x13a6   :  { %v3159_v19 = vsub.f32 %v3151_v5, %v3157_v10  ;;  %v2237_v10 = vld [vmem:[%s12947_s5 + $0x18] sm:$0xff] }
0x13a7   :  { %v10724_v11 = vpop.eup %10723 }
0x13a8   :  { %v3164_v31 = vsel %vm543_vm3, %v10724_v11, 0.0  ;;  %v3162_v4 = vmul.f32 1.442695, %v3159_v19 }
0x13a9   :  { %3165 = vadd.xlane.f32.xlu0 %v3164_v31  ;;  %v3175_v18 = vpop.permute.xlu1 %3174  ;;  %v2234_v31 = vld [vmem:[%s12947_s5] sm:$0xff] }
0x13aa   :  { %10061 = vmatpush3.msra.mxu1 %v3175_v18  ;;  %10725 = vpow2.f32 %v3162_v4 }
0x13ab   :  { %10070 = vmatprep.subr.mxu1 %v11234_v26 }
0x13ad   :  { %v3329_v36 = vpop.permute.xlu1 %3328 }
0x13b1   :  { %v3407_v38 = vpop.permute.xlu1 %3406 }
0x13b5   :  { %v3405_v40 = vpop.permute.xlu1 %3404 }
0x13b7   :  { %v10726_v22 = vpop.eup %10725 }
0x13b8   :  { %v3167_v23 = vsel %vm543_vm3, %v10726_v22, 0.0 }
0x13bf   :  { %3250 = vrot.lane.b32.xlu0 %v11851_v7, %s11243_s20 }
0x13de   :  { %3168 = vadd.xlane.f32.xlu0 %v3167_v23 }
0x13f4   :  { %3326 = vrot.lane.b32.xlu0 %v11853_v21, %s11244_s13 }
0x1432   :  { %v3166_v20 = vpop.xlane.xlu0 %3165 }
0x1433   :  { %10727 = vrcp.f32 %v3166_v20 }
0x1436   :  { %v3251_v28 = vpop.permute.xlu0 %3250 }
0x1437   :  { %10066 = vmatpush3.msra.mxu0 %v3251_v28 }
0x1438   :  { %10075 = vmatprep.subr.mxu0 %v11234_v26 }
0x1440   :  { %v10728_v32 = vpop.eup %10727 }
0x1441   :  { %v3171_v34 = vmul.f32 %v10728_v32, %v10724_v11  ;;  %v2235_v11 = vld [vmem:[%s12947_s5 + $0x8] sm:$0xff] }
0x1443   :  { %10063 = vmatmul.mubr.msk.f32.vlgmr.msra.gmra.mxu1 %vm543_vm3, %v3171_v34 }
0x1444   :  { %10071 = vmatpush3.xpose.msk.msra.mxu1 %vm543_vm3, %v3329_v36  ;;  %10072 = vmatprep.mubr.msk.f32.mxu1 %vm11235_vm2, %v11234_v26 }
0x1445   :  { %10080 = vmatprep.subr.mxu1 %v11234_v26 }
0x1467   :  { %v3169_v29 = vpop.xlane.xlu0 %3168 }
0x1468   :  { %10729 = vrcp.f32 %v3169_v29 }
0x146b   :  { %v3327_v37 = vpop.permute.xlu0 %3326 }
0x146c   :  { %10073 = vmatmul.mubr.msk.f32.vlgmr.msra.gmra.mxu1 %vm543_vm3, %v3327_v37 }
0x146d   :  { %10082 = vmatprep.mubr.msk.f32.mxu1 %vm11235_vm2, %v11234_v26 }
0x1475   :  { %v10730_v52 = vpop.eup %10729 }
0x1476   :  { %v3173_v42 = vmul.f32 %v10730_v52, %v10726_v22 }
0x1478   :  { %10068 = vmatmul.mubr.msk.f32.vlgmr.msra.gmra.mxu0 %vm543_vm3, %v3173_v42 }
0x1479   :  { %10076 = vmatpush3.xpose.msk.msra.mxu0 %vm543_vm3, %v3407_v38  ;;  %10077 = vmatprep.mubr.msk.f32.mxu0 %vm11235_vm2, %v11234_v26 }
0x147a   :  { %10085 = vmatprep.subr.mxu0 %v11234_v26 }
0x147c   :  { %10078 = vmatmul.mubr.msk.f32.vlgmr.msra.gmra.mxu0 %vm543_vm3, %v3405_v40 }
0x147d   :  { %10087 = vmatprep.mubr.msk.f32.mxu0 %vm11235_vm2, %v11234_v26 }
0x1503   :  { %v3246_v41 = vpop.f32.mrf.mxu1 }
0x1505   :  { %v10064_v43 = vpop.f32.mrf.mxu1 }
0x152c   :  { %v3400_v45 = vpop.f32.mrf.mxu1 }
0x152d   :  { %v3482_v46 = vmul.f32 0.35355338, %v3400_v45 }
0x152e   :  { %v10074_v47 = vpop.f32.mrf.mxu1 }
0x152f   :  { %v3484_v48 = vadd.f32 %v3482_v46, %v11880_v35 }
0x1531   :  { %v3486_v49 = vsel %vm543_vm3, %v3484_v48, -inf }
0x1532   :  { %3487 = vmax.xlane.f32.xlu0 %v3486_v49 }
0x1538   :  { %v3322_v51 = vpop.f32.mrf.mxu0 }
0x153a   :  { %v10069_v53 = vpop.f32.mrf.mxu0 }
0x153c   :  { %v3478_v54 = vpop.f32.mrf.mxu0 }
0x153d   :  { %v3483_v55 = vmul.f32 0.35355338, %v3478_v54 }
0x153e   :  { %v10079_v56 = vpop.f32.mrf.mxu0 }
0x153f   :  { %v3485_v59 = vadd.f32 %v3483_v55, %v11884_v39 }
0x1541   :  { %v3489_v60 = vsel %vm543_vm3, %v3485_v59, -inf }
0x1542   :  { %3490 = vmax.xlane.f32.xlu1 %v3489_v60 }
0x1553   :  { %3508 = vrot.lane.b32.xlu1 %v11853_v21, %s11246_s21 }
0x1557   :  { %3662 = vrot.lane.b32.xlu1 %v11961_v57, %s11247_s0 }
0x155b   :  { %3664 = vrot.lane.b32.xlu1 %v11965_v12, %s11247_s0 }
0x155f   :  { %3672 = vrot.lane.b32.xlu1 %v3322_v51, %s11248_s6 }
0x15bb   :  { %v3488_v35 = vpop.xlane.xlu0 %3487 }
0x15bc   :  { %v3492_v61 = vsub.f32 %v3484_v48, %v3488_v35 }
0x15be   :  { %v3494_v62 = vmul.f32 1.442695, %v3492_v61  ;;  %v3826_v61 = vld [vmem:[%s12949_s22 + $0x18] sm:$0xff] }
0x15c0   :  { %10731 = vpow2.f32 %v3494_v62  ;;  %v3825_v62 = vld [vmem:[%s12949_s22 + $0x10] sm:$0xff] }
0x15cb   :  { %v3491_v63 = vpop.xlane.xlu1 %3490 }
0x15cc   :  { %v3493_v39 = vsub.f32 %v3485_v59, %v3491_v63  ;;  %v3824_v63 = vld [vmem:[%s12949_s22 + $0x8] sm:$0xff] }
0x15cd   :  { %v10732_v0 = vpop.eup %10731 }
0x15ce   :  { %v3496_v1 = vmul.f32 1.442695, %v3493_v39  ;;  %v3498_v50 = vsel %vm543_vm3, %v10732_v0, 0.0  ;;  %v3823_v39 = vld [vmem:[%s12949_s22] sm:$0xff]  ;;  %s12960_s22 = sld [smem:[#allocation60_spill]] }
0x15cf   :  { %3499 = vadd.xlane.f32.xlu0 %v3498_v50  ;;  %v3509_v21 = vpop.permute.xlu1 %3508 }
0x15d0   :  { %10733 = vpow2.f32 %v3496_v1  ;;  %10081 = vmatpush3.msra.mxu1 %v3509_v21 }
0x15d1   :  { %10090 = vmatprep.subr.mxu1 %v2237_v10 }
0x15d3   :  { %v3663_v23 = vpop.permute.xlu1 %3662 }
0x15d4   :  { %v3684_v28 = vsel %vm543_vm3, %v11923_v13, %v3663_v23  ;;  %v9438_v13 = vld [vmem:[%s12948_s18] ss:$0 sm:$0xff]  ;;  %v3935_v23 = vld [vmem:[%s12952_s25 + $0x10] sm:$0xff]  ;;  %s12959_s18 = sld [smem:[#allocation47_spill]] }
0x15d7   :  { %v3665_v29 = vpop.permute.xlu1 %3664 }
0x15d8   :  { %v3685_v52 = vsel %vm543_vm3, %v11925_v17, %v3665_v29 }
0x15db   :  { %v3673_v37 = vpop.permute.xlu1 %3672 }
0x15dc   :  { %v3687_v38 = vsel %vm1899_vm8, %v3685_v52, %v3673_v37 }
0x15dd   :  { %v10734_v57 = vpop.eup %10733 }
0x15de   :  { %v3501_v2 = vsel %vm543_vm3, %v10734_v57, 0.0 }
0x15df   :  { %3502 = vadd.xlane.f32.xlu0 %v3501_v2 }
0x15f5   :  { %3584 = vrot.lane.b32.xlu0 %v11851_v7, %s11246_s21  ;;  %v2236_v7 = vld [vmem:[%s12947_s5 + $0x10] sm:$0xff]  ;;  %s12958_s5 = sld [smem:[#allocation59_spill]] }
0x15f9   :  { %3670 = vrot.lane.b32.xlu0 %v3246_v41, %s11248_s6 }
0x1658   :  { %v3500_v12 = vpop.xlane.xlu0 %3499 }
0x1659   :  { %10735 = vrcp.f32 %v3500_v12 }
0x1666   :  { %v10736_v3 = vpop.eup %10735 }
0x1667   :  { %v3505_v5 = vmul.f32 %v10736_v3, %v10732_v0  ;;  %v9441_v3 = vld [vmem:[%s12950_s26] ss:$0 sm:$0xff]  ;;  %s12961_s26 = sld [smem:[#allocation48_spill]] }
0x1668   :  { %v3503_v58 = vpop.xlane.xlu0 %3502 }
0x1669   :  { %10737 = vrcp.f32 %v3503_v58  ;;  %10083 = vmatmul.mubr.msk.f32.vlgmr.msra.gmra.mxu1 %vm543_vm3, %v3505_v5  ;;  %v9442_v58 = vld [vmem:[%s12951_s4] ss:$0 sm:$0xff]  ;;  %s12962_s4 = sld [smem:[#allocation61_spill]] }
0x166a   :  { %10091 = vmatpush3.msra.mxu1 %v2237_v10 }
0x166b   :  { %10092 = vmatprep.subr.mxu1 %v2236_v7 }
0x166c   :  { %v3585_v6 = vpop.permute.xlu0 %3584  ;;  %10093 = vmatpush3.msra.mxu1 %v2236_v7 }
0x166d   :  { %10086 = vmatpush3.msra.mxu0 %v3585_v6  ;;  %10094 = vmatprep.subr.mxu1 %v2235_v11 }
0x166e   :  { %10095 = vmatpush3.msra.mxu1 %v2235_v11  ;;  %10101 = vmatprep.subr.mxu0 %v3826_v61 }
0x166f   :  { %10096 = vmatprep.subr.mxu1 %v2234_v31 }
0x1670   :  { %10097 = vmatpush3.msra.mxu1 %v2234_v31  ;;  %v3671_v20 = vpop.permute.xlu0 %3670  ;;  %v3940_v31 = vld [vmem:[%s12952_s25 + $0x38] sm:$0xff] }
0x1671   :  { %v3686_v32 = vsel %vm1899_vm8, %v3684_v28, %v3671_v20  ;;  %10112 = vmatprep.subr.mxu1 %v3940_v31  ;;  %v3934_v20 = vld [vmem:[%s12952_s25 + $0x8] sm:$0xff]  ;;  %v3933_v28 = vld [vmem:[%s12952_s25] sm:$0xff] }
0x1676   :  { %v10738_v8 = vpop.eup %10737 }
0x1677   :  { %v3507_v9 = vmul.f32 %v10738_v8, %v10734_v57 }
0x1679   :  { %10088 = vmatmul.mubr.msk.f32.vlgmr.msra.gmra.mxu0 %vm543_vm3, %v3507_v9 }
0x167a   :  { %10102 = vmatpush3.msra.mxu0 %v3826_v61 }
0x167b   :  { %10103 = vmatprep.subr.mxu0 %v3825_v62 }
0x167c   :  { %10104 = vmatpush3.msra.mxu0 %v3825_v62 }
0x167d   :  { %10105 = vmatprep.subr.mxu0 %v3824_v63 }
0x167e   :  { %10106 = vmatpush3.msra.mxu0 %v3824_v63 }
0x167f   :  { %10107 = vmatprep.subr.mxu0 %v3823_v39 }
0x1680   :  { %10108 = vmatpush3.msra.mxu0 %v3823_v39 }
0x1681   :  { %10131 = vmatprep.subr.mxu0 %v11234_v26 }
0x1729   :  { %v3580_v18 = vpop.f32.mrf.mxu1 }
0x172a   :  { %3678 = vrot.lane.b32.xlu0 %v3580_v18, %s11249_s2  ;;  %v3939_v18 = vld [vmem:[%s12952_s25 + $0x30] sm:$0xff] }
0x172b   :  { %v10084_v19 = vpop.f32.mrf.mxu1 }
0x172c   :  { %v3938_v19 = vld [vmem:[%s12952_s25 + $0x28] sm:$0xff] }
0x1739   :  { %v3656_v4 = vpop.f32.mrf.mxu0 }
0x173a   :  { %3680 = vrot.lane.b32.xlu1 %v3656_v4, %s11249_s2  ;;  %v3937_v4 = vld [vmem:[%s12952_s25 + $0x20] sm:$0xff] }
0x173b   :  { %v10089_v22 = vpop.f32.mrf.mxu0 }
0x173c   :  { %v3936_v22 = vld [vmem:[%s12952_s25 + $0x18] sm:$0xff]  ;;  %s11250_s25 = smov 32  }
0x179c   :  { %v3679_v34 = vpop.permute.xlu0 %3678 }
0x179d   :  { %v3688_v36 = vsel %vm342_vm0, %v3686_v32, %v3679_v34  ;;  %v9443_v32 = vld [vmem:[%s12953_s28] ss:$0 sm:$0xff]  ;;  %s12963_s28 = sld [smem:[#allocation63_spill]] }
0x179e   :  { %10098 = vmatprep.mubr.msk.f32.mxu1 %vm458_vm1, %v3688_v36 }
0x17ac   :  { %v3681_v42 = vpop.permute.xlu1 %3680 }
0x17ad   :  { %v3689_v40 = vsel %vm342_vm0, %v3687_v38, %v3681_v42 }
0x17ae   :  { %10099 = vmatmul.mubr.msk.f32.vlgmr.msra.gmra.mxu1 %vm458_vm1, %v3689_v40 }
0x17af   :  { %10113 = vmatpush3.msra.mxu1 %v3940_v31 }
0x17b0   :  { %10114 = vmatprep.subr.mxu1 %v3939_v18 }
0x17b1   :  { %10115 = vmatpush3.msra.mxu1 %v3939_v18 }
0x17b2   :  { %10116 = vmatprep.subr.mxu1 %v3938_v19 }
0x17b3   :  { %10117 = vmatpush3.msra.mxu1 %v3938_v19 }
0x17b4   :  { %10118 = vmatprep.subr.mxu1 %v3937_v4 }
0x17b5   :  { %10119 = vmatpush3.msra.mxu1 %v3937_v4 }
0x17b6   :  { %10120 = vmatprep.subr.mxu1 %v3936_v22 }
0x17b7   :  { %10121 = vmatpush3.msra.mxu1 %v3936_v22 }
0x17b8   :  { %10122 = vmatprep.subr.mxu1 %v3935_v23 }
0x17b9   :  { %10123 = vmatpush3.msra.mxu1 %v3935_v23 }
0x17ba   :  { %10124 = vmatprep.subr.mxu1 %v3934_v20 }
0x17bb   :  { %10125 = vmatpush3.msra.mxu1 %v3934_v20 }
0x17bc   :  { %10126 = vmatprep.subr.mxu1 %v3933_v28 }
0x17bd   :  { %10127 = vmatpush3.msra.mxu1 %v3933_v28  ;;  %v4076_v28 = vld [vmem:[%s12956_s29] sm:$0xff] }
0x17be   :  { %10151 = vmatprep.subr.mxu1 %v11234_v26 }
0x186e   :  { %v10100_v41 = vpop.f32.mrf.mxu1 }
0x186f   :  { %v3774_v43 = vadd.f32 %v10100_v41, %v9438_v13 }
0x1870   :  { %v3768_v45 = vpop.f32.mrf.mxu1 }
0x1871   :  { %v3769_v46 = vadd.f32 %v9438_v13, %v3768_v45  ;;  %v3778_v47 = vadd.f32 %v3774_v43, %v11838_v33 }
0x1873   :  { %v3784_v48 = vsel %vm458_vm1, %v3778_v47, 0.0  ;;  %v3777_v49 = vadd.f32 %v3769_v46, %v11836_v14 }
0x1874   :  { %3785 = vadd.xlane.f32.xlu1 %v3784_v48 }
0x1875   :  { %v3781_v17 = vsel %vm458_vm1, %v3777_v49, 0.0 }
0x1876   :  { %3782 = vadd.xlane.f32.xlu0 %v3781_v17 }
0x18fd   :  { %v3786_v51 = vpop.xlane.xlu1 %3785 }
0x18fe   :  { %v3788_v53 = vmul.f32 0.03125, %v3786_v51 }
0x18ff   :  { %v3783_v54 = vpop.xlane.xlu0 %3782 }
0x1900   :  { %v3787_v55 = vmul.f32 0.03125, %v3783_v54  ;;  %v3790_v56 = vsub.f32 %v3778_v47, %v3788_v53 }
0x1902   :  { %v3789_v59 = vsub.f32 %v3777_v49, %v3787_v55  ;;  %v3792_v35 = vmul.f32 %v3790_v56, %v3790_v56 }
0x1904   :  { %v3791_v60 = vmul.f32 %v3789_v59, %v3789_v59  ;;  %v3796_v14 = vsel %vm458_vm1, %v3792_v35, 0.0 }
0x1906   :  { %v3793_v33 = vsel %vm458_vm1, %v3791_v60, 0.0  ;;  %v9446_v60 = vld [vmem:[%s12955_s11] ss:$0 sm:$0xff]  ;;  %s12967_s11 = sld [smem:[#allocation66_spill]] }
0x1907   :  { %3794 = vadd.xlane.f32.xlu0 %v3793_v33 }
0x190b   :  { %3797 = vadd.xlane.f32.xlu0 %v3796_v14 }
0x1990   :  { %v3795_v0 = vpop.xlane.xlu0 %3794 }
0x1991   :  { %v3799_v1 = vmul.f32 0.03125, %v3795_v0 }
0x1993   :  { %v3801_v50 = vadd.f32 1e-12, %v3799_v1 }
0x1994   :  { %v3798_v21 = vpop.xlane.xlu0 %3797 }
0x1995   :  { %10739 = vrsqrt.f32 %v3801_v50  ;;  %v3800_v57 = vmul.f32 0.03125, %v3798_v21 }
0x1997   :  { %v3802_v2 = vadd.f32 1e-12, %v3800_v57 }
0x1999   :  { %10741 = vrsqrt.f32 %v3802_v2 }
0x19a2   :  { %v10740_v12 = vpop.eup %10739 }
0x19a3   :  { %v3805_v5 = vmul.f32 %v10740_v12, %v3789_v59  ;;  %v9398_v59 = vld [vmem:[%s12954_s10] ss:$0 sm:$0xff]  ;;  %s12964_s10 = sld [smem:[#allocation62_spill]] }
0x19a4   :  { %v1988_v35 = vadd.f32 %v11846_v15, %v9398_v59  ;;  %v1983_v62 = vadd.f32 %v9398_v59, %v11848_v16 }
0x19a5   :  { %v3813_v6 = vmul.f32 %v9441_v3, %v3805_v5 }
0x19a6   :  { %v10742_v8 = vpop.eup %10741  ;;  %v1994_v0 = vadd.f32 %v1988_v35, %v11580_v25  ;;  %v1993_v21 = vadd.f32 %v1983_v62, %v11578_v24 }
0x19a7   :  { %v3806_v9 = vmul.f32 %v10742_v8, %v3790_v56  ;;  %v12049_v10 = vadd.f32 %v9442_v58, %v3813_v6 }
0x19a8   :  { %v1998_v15 = vsel %vm458_vm1, %v1994_v0, 0.0  ;;  %v1995_v16 = vsel %vm458_vm1, %v1993_v21, 0.0 }
0x19a9   :  { %v3814_v7 = vmul.f32 %v9441_v3, %v3806_v9  ;;  %10109 = vmatprep.mubr.msk.f32.mxu0 %vm458_vm1, %v12049_v10 }
0x19ab   :  { %v12053_v11 = vadd.f32 %v9442_v58, %v3814_v7 }
0x19ad   :  { %10110 = vmatmul.mubr.msk.f32.vlgmr.msra.gmra.mxu0 %vm458_vm1, %v12053_v11 }
0x19ae   :  { %10133 = vmatprep.mubr.msk.f32.mxu0 %vm11235_vm2, %v11234_v26 }
0x1a6d   :  { %v10111_v34 = vpop.f32.mrf.mxu0 }
0x1a6e   :  { %v3912_v36 = vadd.f32 %v10111_v34, %v9443_v32 }
0x1a6f   :  { %v3906_v29 = vpop.f32.mrf.mxu0 }
0x1a70   :  { %v3916_v37 = vmul.f32 %v3912_v36, %v3912_v36  ;;  %v3907_v52 = vadd.f32 %v9443_v32, %v3906_v29  ;;  %v4084_v32 = vld [vmem:[%s12957_s9] sm:$0xff] }
0x1a72   :  { %v3918_v38 = vmul.f32 %v3916_v37, %v3912_v36  ;;  %v3915_v42 = vmul.f32 %v3907_v52, %v3907_v52 }
0x1a74   :  { %v3920_v40 = vmul.f32 0.044715, %v3918_v38  ;;  %v3917_v13 = vmul.f32 %v3915_v42, %v3907_v52 }
0x1a76   :  { %v3922_v41 = vadd.f32 %v3920_v40, %v3912_v36  ;;  %v3919_v43 = vmul.f32 0.044715, %v3917_v13 }
0x1a78   :  { %v3924_v45 = vmul.f32 0.7978846, %v3922_v41  ;;  %v3921_v46 = vadd.f32 %v3919_v43, %v3907_v52 }
0x1a7a   :  { %10743 = vtanh.f32 %v3924_v45  ;;  %v3923_v47 = vmul.f32 0.7978846, %v3921_v46 }
0x1a7c   :  { %10745 = vtanh.f32 %v3923_v47 }
0x1a87   :  { %v10744_v48 = vpop.eup %10743 }
0x1a88   :  { %v3928_v49 = vadd.f32 1.0, %v10744_v48 }
0x1a89   :  { %v10746_v17 = vpop.eup %10745 }
0x1a8a   :  { %v3927_v51 = vadd.f32 1.0, %v10746_v17  ;;  %v3930_v53 = vmul.f32 0.5, %v3928_v49  ;;  %v9449_v49 = vld [vmem:[%s12958_s5] ss:$0 sm:$0xff]  ;;  %s12968_s5 = sld [smem:[#allocation69_spill]] }
0x1a8b   :  { %v9401_v17 = vld [vmem:[%s12959_s18] ss:$0 sm:$0xff] }
0x1a8c   :  { %v3929_v54 = vmul.f32 0.5, %v3927_v51  ;;  %v3932_v56 = vmul.f32 %v3930_v53, %v3912_v36 }
0x1a8e   :  { %v3931_v55 = vmul.f32 %v3929_v54, %v3907_v52 }
0x1a90   :  { %10128 = vmatprep.mubr.msk.f32.mxu1 %vm3948_vm9, %v3931_v55  ;;  %v9450_v55 = vld [vmem:[%s12960_s22] ss:$0 sm:$0xff] }
0x1a91   :  { %10129 = vmatmul.mubr.msk.f32.vlgmr.msra.gmra.mxu1 %vm3948_vm9, %v3932_v56  ;;  %v9402_v56 = vld [vmem:[%s12961_s26] ss:$0 sm:$0xff] }
0x1a92   :  { %10153 = vmatprep.mubr.msk.f32.mxu1 %vm11235_vm2, %v11234_v26 }
0x1b51   :  { %v10130_v33 = vpop.f32.mrf.mxu1 }
0x1b52   :  { %v4027_v14 = vadd.f32 %v10130_v33, %v9446_v60 }
0x1b53   :  { %v4021_v61 = vpop.f32.mrf.mxu1 }
0x1b54   :  { %v4031_v63 = vadd.f32 %v4027_v14, %v12053_v11  ;;  %v4022_v39 = vadd.f32 %v9446_v60, %v4021_v61 }
0x1b56   :  { %v4030_v1 = vadd.f32 %v4022_v39, %v12049_v10  ;;  %v4037_v50 = vsel %vm458_vm1, %v4031_v63, 0.0 }
0x1b57   :  { %4038 = vadd.xlane.f32.xlu0 %v4037_v50 }
0x1b58   :  { %v4034_v57 = vsel %vm458_vm1, %v4030_v1, 0.0 }
0x1b59   :  { %4035 = vadd.xlane.f32.xlu1 %v4034_v57 }
0x1b5b   :  { %1999 = vadd.xlane.f32.xlu0 %v1998_v15 }
0x1b5d   :  { %1996 = vadd.xlane.f32.xlu1 %v1995_v16 }
0x1be0   :  { %v4039_v2 = vpop.xlane.xlu0 %4038 }
0x1be1   :  { %v4041_v3 = vmul.f32 0.03125, %v4039_v2 }
0x1be2   :  { %v4036_v12 = vpop.xlane.xlu1 %4035 }
0x1be3   :  { %v4040_v5 = vmul.f32 0.03125, %v4036_v12  ;;  %v4043_v8 = vsub.f32 %v4031_v63, %v4041_v3 }
0x1be4   :  { %v2000_v25 = vpop.xlane.xlu0 %1999 }
0x1be5   :  { %v2003_v58 = vmul.f32 0.03125, %v2000_v25  ;;  %v4042_v10 = vsub.f32 %v4030_v1, %v4040_v5  ;;  %v4045_v19 = vmul.f32 %v4043_v8, %v4043_v8 }
0x1be6   :  { %v1997_v6 = vpop.xlane.xlu1 %1996 }
0x1be7   :  { %v2005_v9 = vsub.f32 %v1994_v0, %v2003_v58  ;;  %v2002_v24 = vmul.f32 0.03125, %v1997_v6  ;;  %v4044_v22 = vmul.f32 %v4042_v10, %v4042_v10  ;;  %v4049_v23 = vsel %vm458_vm1, %v4045_v19, 0.0 }
0x1be9   :  { %v2004_v7 = vsub.f32 %v1993_v21, %v2002_v24  ;;  %v2007_v11 = vmul.f32 %v2005_v9, %v2005_v9  ;;  %v4046_v20 = vsel %vm458_vm1, %v4044_v22, 0.0 }
0x1beb   :  { %v2011_v31 = vsel %vm458_vm1, %v2007_v11, 0.0  ;;  %v2006_v18 = vmul.f32 %v2004_v7, %v2004_v7 }
0x1bec   :  { %2012 = vadd.xlane.f32.xlu0 %v2011_v31 }
0x1bed   :  { %v2008_v4 = vsel %vm458_vm1, %v2006_v18, 0.0 }
0x1bee   :  { %2009 = vadd.xlane.f32.xlu1 %v2008_v4 }
0x1bf0   :  { %4050 = vadd.xlane.f32.xlu0 %v4049_v23 }
0x1bf2   :  { %4047 = vadd.xlane.f32.xlu1 %v4046_v20 }
0x1c03   :  { %4079 = vperm.xlu1 %10640, %v4076_v28  }
0x1c06   :  { %4087 = vperm.xlu0 %10639, %v4084_v32  }
0x1c75   :  { %v2013_v34 = vpop.xlane.xlu0 %2012 }
0x1c76   :  { %v2015_v43 = vmul.f32 0.03125, %v2013_v34 }
0x1c77   :  { %v2010_v36 = vpop.xlane.xlu1 %2009 }
0x1c78   :  { %v2014_v29 = vmul.f32 0.03125, %v2010_v36  ;;  %v2017_v45 = vadd.f32 1e-05, %v2015_v43 }
0x1c79   :  { %v4051_v37 = vpop.xlane.xlu0 %4050 }
0x1c7a   :  { %v2016_v52 = vadd.f32 1e-05, %v2014_v29  ;;  %v4053_v38 = vmul.f32 0.03125, %v4051_v37 }
0x1c7b   :  { %v4048_v42 = vpop.xlane.xlu1 %4047 }
0x1c7c   :  { %10747 = vrsqrt.f32 %v2016_v52  ;;  %v4055_v40 = vadd.f32 1e-12, %v4053_v38  ;;  %v4052_v13 = vmul.f32 0.03125, %v4048_v42 }
0x1c7e   :  { %10749 = vrsqrt.f32 %v4055_v40  ;;  %v4054_v41 = vadd.f32 1e-12, %v4052_v13 }
0x1c7f   :  { %v4080_v62 = vpop.permute.xlu1 %4079 }
0x1c80   :  { %10751 = vrsqrt.f32 %v4054_v41 }
0x1c81   :  { %10753 = vrsqrt.f32 %v2017_v45  ;;  %v4088_v1 = vpop.permute.xlu0 %4087 }
0x1c89   :  { %v10748_v46 = vpop.eup %10747 }
0x1c8a   :  { %v2020_v47 = vmul.f32 %v10748_v46, %v2004_v7 }
0x1c8b   :  { %v10750_v48 = vpop.eup %10749 }
0x1c8c   :  { %v4059_v51 = vmul.f32 %v10750_v48, %v4043_v8  ;;  %v2028_v53 = vmul.f32 %v9401_v17, %v2020_v47 }
0x1c8d   :  { %v10752_v54 = vpop.eup %10751 }
0x1c8e   :  { %v4058_v59 = vmul.f32 %v10752_v54, %v4042_v10  ;;  %v4067_v60 = vmul.f32 %v9449_v49, %v4059_v51  ;;  %v12095_v33 = vadd.f32 %v9402_v56, %v2028_v53  ;;  %v10754_v63 = vpop.eup %10753 }
0x1c8f   :  { %v2021_v21 = vmul.f32 %v10754_v63, %v2005_v9 }
0x1c90   :  { %v4066_v35 = vmul.f32 %v9449_v49, %v4058_v59  ;;  %v4075_v14 = vadd.f32 %v9450_v55, %v4067_v60  ;;  %10152 = vmatpush3.msra.mxu1 %v12095_v33 }
0x1c91   :  { %v2029_v16 = vmul.f32 %v9401_v17, %v2021_v21 }
0x1c92   :  { %v4074_v61 = vadd.f32 %v9450_v55, %v4066_v35  ;;  %v4083_v0 = vmul.f32 %v4080_v62, %v4075_v14 }
0x1c93   :  { %v12111_v12 = vadd.f32 %v9402_v56, %v2029_v16 }
0x1c94   :  { %v4082_v39 = vmul.f32 %v4080_v62, %v4074_v61  ;;  %v4091_v57 = vadd.f32 %v4088_v1, %v4083_v0  ;;  %v12147_v62 = vld [vmem:[%s12962_s4 + $0x78] sm:$0xff] }
0x1c95   :  { %10161 = vmatprep.subr.mxu1 %v12147_v62 }
0x1c96   :  { %v4090_v50 = vadd.f32 %v4088_v1, %v4082_v39  ;;  %v12103_v2 = vadd.f32 %v4091_v57, %v4075_v14 }
0x1c98   :  { %v12098_v15 = vadd.f32 %v4090_v50, %v4074_v61 }
0x1c9a   :  { %10132 = vmatpush3.xpose.msk.msra.mxu0 %vm458_vm1, %v12098_v15 }
0x1c9b   :  { %10136 = vmatprep.subr.mxu0 %v11234_v26 }
0x1c9d   :  { %10134 = vmatmul.mubr.msk.f32.vlgmr.msra.gmra.mxu0 %vm458_vm1, %v12095_v33 }
0x1c9e   :  { %10137 = vmatpush3.xpose.msk.msra.mxu0 %vm458_vm1, %v12103_v2  ;;  %10138 = vmatprep.mubr.msk.f32.mxu0 %vm11235_vm2, %v11234_v26 }
0x1c9f   :  { %10141 = vmatprep.subr.mxu0 %v11234_v26 }
0x1ca1   :  { %10139 = vmatmul.mubr.msk.f32.vlgmr.msra.gmra.mxu0 %vm458_vm1, %v12111_v12 }
0x1ca2   :  { %10142 = vmatpush3.msra.mxu0 %v12098_v15  ;;  %10143 = vmatprep.mubr.msk.f32.mxu0 %vm11235_vm2, %v11234_v26 }
0x1ca3   :  { %10146 = vmatprep.subr.mxu0 %v11234_v26 }
0x1d5d   :  { %v4166_v3 = vpop.f32.mrf.mxu0 }
0x1d5e   :  { %v4310_v25 = vsel %vm543_vm3, %v4166_v3, -inf }
0x1d5f   :  { %4311 = vmax.xlane.f32.xlu1 %v4310_v25  ;;  %v10135_v5 = vpop.f32.mrf.mxu0 }
0x1d61   :  { %v4242_v58 = vpop.f32.mrf.mxu0 }
0x1d62   :  { %v4313_v6 = vsel %vm543_vm3, %v4242_v58, -inf }
0x1d63   :  { %4314 = vmax.xlane.f32.xlu0 %v4313_v6  ;;  %v10140_v8 = vpop.f32.mrf.mxu0 }
0x1d64   :  { %v12164_v8 = vld [vmem:[%s12962_s4 + $0x70] sm:$0xff] }
0x1de8   :  { %v4312_v9 = vpop.xlane.xlu1 %4311 }
0x1de9   :  { %v4316_v24 = vsub.f32 %v4166_v3, %v4312_v9 }
0x1deb   :  { %v4318_v10 = vmul.f32 1.442695, %v4316_v24  ;;  %v12172_v24 = vld [vmem:[%s12962_s4 + $0x68] sm:$0xff] }
0x1dec   :  { %v4315_v7 = vpop.xlane.xlu0 %4314 }
0x1ded   :  { %10755 = vpow2.f32 %v4318_v10  ;;  %v4317_v11 = vsub.f32 %v4242_v58, %v4315_v7  ;;  %v12177_v10 = vld [vmem:[%s12962_s4 + $0x60] sm:$0xff]  ;;  %v12182_v7 = vld [vmem:[%s12962_s4 + $0x58] sm:$0xff] }
0x1def   :  { %v4320_v31 = vmul.f32 1.442695, %v4317_v11  ;;  %v12187_v11 = vld [vmem:[%s12962_s4 + $0x50] sm:$0xff] }
0x1df1   :  { %10757 = vpow2.f32 %v4320_v31  ;;  %v12192_v31 = vld [vmem:[%s12962_s4 + $0x48] sm:$0xff] }
0x1dfa   :  { %v10756_v18 = vpop.eup %10755 }
0x1dfb   :  { %v4322_v19 = vsel %vm543_vm3, %v10756_v18, 0.0 }
0x1dfc   :  { %4323 = vadd.xlane.f32.xlu1 %v4322_v19  ;;  %v12202_v19 = vld [vmem:[%s12962_s4 + $0x38] sm:$0xff] }
0x1dfe   :  { %v10758_v4 = vpop.eup %10757 }
0x1dff   :  { %v4325_v22 = vsel %vm543_vm3, %v10758_v4, 0.0 }
0x1e00   :  { %4326 = vadd.xlane.f32.xlu0 %v4325_v22  ;;  %v12212_v22 = vld [vmem:[%s12962_s4 + $0x28] sm:$0xff] }
0x1e2d   :  { %4278 = vxpose.xlu0.b32.start.end [1/1] (short) (narrow) %v4242_v58, 8 }
0x1e2f   :  { %4246 = vxpose.xlu1.b32.start.end [1/1] (short) (narrow) %v4166_v3, 8 }
0x1e85   :  { %v4324_v23 = vpop.xlane.xlu1 %4323 }
0x1e86   :  { %10759 = vrcp.f32 %v4324_v23  ;;  %v12217_v23 = vld [vmem:[%s12962_s4 + $0x20] sm:$0xff] }
0x1e89   :  { %v4327_v20 = vpop.xlane.xlu0 %4326 }
0x1e8a   :  { %10761 = vrcp.f32 %v4327_v20  ;;  %v12222_v20 = vld [vmem:[%s12962_s4 + $0x18] sm:$0xff] }
0x1e93   :  { %v10760_v28 = vpop.eup %10759 }
0x1e94   :  { %v4329_v32 = vmul.f32 %v10760_v28, %v10756_v18  ;;  %v12197_v18 = vld [vmem:[%s12962_s4 + $0x40] sm:$0xff] }
0x1e96   :  { %10144 = vmatmul.mubr.msk.f32.vlgmr.msra.gmra.mxu0 %vm543_vm3, %v4329_v32  ;;  %4354 = vst.msk [vmem:[#allocation18] sm:$0xff] %vm543_vm3, %v4329_v32  ;;  %v12228_v32 = vld [vmem:[%s12962_s4 + $0x10] sm:$0xff] }
0x1e97   :  { %v10762_v34 = vpop.eup %10761  ;;  %10147 = vmatpush3.msra.mxu0 %v12103_v2  ;;  %10148 = vmatprep.mubr.msk.f32.mxu0 %vm11235_vm2, %v11234_v26 }
0x1e98   :  { %10156 = vmatprep.subr.mxu0 %v11234_v26  ;;  %v4331_v36 = vmul.f32 %v10762_v34, %v10758_v4  ;;  %v12207_v4 = vld [vmem:[%s12962_s4 + $0x30] sm:$0xff]  ;;  %v12233_v34 = vld [vmem:[%s12962_s4 + $0x8] sm:$0xff] }
0x1e9a   :  { %10149 = vmatmul.mubr.msk.f32.vlgmr.msra.gmra.mxu0 %vm543_vm3, %v4331_v36  ;;  %4355 = vst.msk [vmem:[#allocation18 + $0x8] sm:$0xff] %vm543_vm3, %v4331_v36 }
0x1e9b   :  { %10157 = vmatpush3.msra.mxu0 %v12111_v12  ;;  %10158 = vmatprep.mubr.msk.f32.mxu0 %vm11235_vm2, %v11234_v26 }
0x1ea9   :  { %v4294_v29 = vpop.trf.xlu0 }
0x1eaa   :  { %v4335_v37 = vsel %vm543_vm3, %v4294_v29, -inf }
0x1eab   :  { %v4262_v52 = vpop.trf.xlu1  ;;  %4336 = vmax.xlane.f32.xlu1 %v4335_v37 }
0x1eac   :  { %v4332_v38 = vsel %vm543_vm3, %v4262_v52, -inf }
0x1ead   :  { %4333 = vmax.xlane.f32.xlu0 %v4332_v38 }
0x1f34   :  { %v4337_v42 = vpop.xlane.xlu1 %4336 }
0x1f35   :  { %v4339_v40 = vsub.f32 %v4294_v29, %v4337_v42  ;;  %v12239_v29 = vld [vmem:[%s12962_s4] sm:$0xff] }
0x1f36   :  { %v4334_v13 = vpop.xlane.xlu0 %4333 }
0x1f37   :  { %v4342_v41 = vmul.f32 1.442695, %v4339_v40  ;;  %v4338_v43 = vsub.f32 %v4262_v52, %v4334_v13  ;;  %v4826_v40 = vld [vmem:[%s12963_s28 + $0x38] sm:$0xff]  ;;  %v4825_v13 = vld [vmem:[%s12963_s28 + $0x30] sm:$0xff] }
0x1f38   :  { %10196 = vmatprep.subr.mxu0 %v4826_v40 }
0x1f39   :  { %10763 = vpow2.f32 %v4342_v41  ;;  %v4340_v45 = vmul.f32 1.442695, %v4338_v43  ;;  %v4823_v41 = vld [vmem:[%s12963_s28 + $0x20] sm:$0xff]  ;;  %v4822_v43 = vld [vmem:[%s12963_s28 + $0x18] sm:$0xff] }
0x1f3b   :  { %10765 = vpow2.f32 %v4340_v45  ;;  %v4821_v45 = vld [vmem:[%s12963_s28 + $0x10] sm:$0xff] }
0x1f46   :  { %v10764_v46 = vpop.eup %10763 }
0x1f47   :  { %v4347_v47 = vsel %vm543_vm3, %v10764_v46, 0.0 }
0x1f48   :  { %v10766_v48 = vpop.eup %10765  ;;  %4348 = vadd.xlane.f32.xlu0 %v4347_v47  ;;  %v4819_v47 = vld [vmem:[%s12963_s28] sm:$0xff] }
0x1f49   :  { %v4344_v49 = vsel %vm543_vm3, %v10766_v48, 0.0 }
0x1f4a   :  { %4345 = vadd.xlane.f32.xlu1 %v4344_v49 }
0x1f56   :  { %v4427_v17 = vpop.f32.mrf.mxu0 }
0x1f57   :  { %v4650_v54 = vsub.f32 %v12095_v33, %v4427_v17  ;;  %v4652_v35 = vmul.f32 %v4427_v17, %v12095_v33 }
0x1f58   :  { %v10145_v51 = vpop.f32.mrf.mxu0 }
0x1f5a   :  { %v4500_v53 = vpop.f32.mrf.mxu0 }
0x1f5b   :  { %v10641_v55 = vpack.i.bf16 %v4500_v53, %v4427_v17  ;;  %v4653_v56 = vmul.f32 %v4500_v53, %v12111_v12  ;;  %v4651_v59 = vsub.f32 %v12111_v12, %v4500_v53 }
0x1f5c   :  { %v10150_v60 = vpop.f32.mrf.mxu0 }
0x1f5d   :  { %v10646_v14 = vpack.i.bf16 %v4651_v59, %v4650_v54  ;;  %10642 = vrot.lane.b32.xlu1 %v10641_v55, %s11250_s25  ;;  %v10651_v61 = vpack.i.bf16 %v4653_v56, %v4652_v35 }
0x1f5f   :  { %10647 = vrot.lane.b32.xlu0 %v10646_v14, %s11237_s3  ;;  %v5077_v14 = vld [vmem:[%s11316_s19] sm:$0xff]  ;;  %s12965_s19 = sld [smem:[#allocation65_spill]] }
0x1f61   :  { %10652 = vrot.lane.b32.xlu1 %v10651_v61, %s11236_s17  ;;  %v5078_v61 = vld [vmem:[%s11321_s24] sm:$0xff]  ;;  %s12966_s24 = sld [smem:[#allocation64_spill]] }
0x1fd1   :  { %v4349_v63 = vpop.xlane.xlu0 %4348 }
0x1fd2   :  { %10767 = vrcp.f32 %v4349_v63  ;;  %v12269_v63 = vld [vmem:[%s12964_s10] ss:$0 sm:$0xff] }
0x1fd3   :  { %v4346_v39 = vpop.xlane.xlu1 %4345 }
0x1fd4   :  { %10769 = vrcp.f32 %v4346_v39 }
0x1fd5   :  { %v12155_v21 = vpop.permute.xlu0 %10647 }
0x1fd6   :  { %v10649_v58 = vunpack.i.l.bf16 %v12155_v21  ;;  %v10650_v52 = vunpack.i.h.bf16 %v12155_v21 }
0x1fd7   :  { %v12150_v0 = vpop.permute.xlu1 %10642 }
0x1fd8   :  { %v10644_v1 = vunpack.i.l.bf16 %v12150_v0  ;;  %v10645_v28 = vunpack.i.h.bf16 %v12150_v0 }
0x1fda   :  { %v4678_v25 = vsel %vm458_vm1, %v12095_v33, %v10644_v1  ;;  %v4679_v37 = vsel %vm458_vm1, %v12111_v12, %v10645_v28  ;;  %v4824_v12 = vld [vmem:[%s12963_s28 + $0x28] sm:$0xff] }
0x1fdb   :  { %v12153_v50 = vpop.permute.xlu1 %10652  ;;  %v4680_v9 = vsel %vm3948_vm9, %v4678_v25, %v10649_v58  ;;  %v4681_v38 = vsel %vm3948_vm9, %v4679_v37, %v10650_v52 }
0x1fdc   :  { %v10654_v16 = vunpack.i.l.bf16 %v12153_v50  ;;  %v10655_v36 = vunpack.i.h.bf16 %v12153_v50 }
0x1fde   :  { %v4683_v33 = vsel %vm4682_vm10, %v4680_v9, %v10654_v16  ;;  %v4684_v42 = vsel %vm4682_vm10, %v4681_v38, %v10655_v36 }
0x1fdf   :  { %v10768_v57 = vpop.eup %10767 }
0x1fe0   :  { %v4353_v3 = vmul.f32 %v10768_v57, %v10764_v46  ;;  %v4820_v46 = vld [vmem:[%s12963_s28 + $0x8] sm:$0xff] }
0x1fe1   :  { %v10770_v5 = vpop.eup %10769 }
0x1fe2   :  { %10159 = vmatmul.mubr.msk.f32.vlgmr.msra.gmra.mxu0 %vm543_vm3, %v4353_v3  ;;  %4357 = vst.msk [vmem:[#allocation20 + $0x8] sm:$0xff] %vm543_vm3, %v4353_v3  ;;  %v4351_v6 = vmul.f32 %v10770_v5, %v10766_v48 }
0x1fe3   :  { %10197 = vmatpush3.msra.mxu0 %v4826_v40 }
0x1fe4   :  { %10154 = vmatmul.mubr.msk.f32.vlgmr.msra.gmra.mxu1 %vm543_vm3, %v4351_v6  ;;  %4356 = vst.msk [vmem:[#allocation20] sm:$0xff] %vm543_vm3, %v4351_v6  ;;  %10198 = vmatprep.subr.mxu0 %v4825_v13 }
0x1fe5   :  { %10162 = vmatpush3.msra.mxu1 %v12147_v62  ;;  %10193 = vmatprep.mubr.f32.mxu1 %v4683_v33 }
0x1fe6   :  { %10163 = vmatprep.subr.mxu1 %v12164_v8  ;;  %10199 = vmatpush3.msra.mxu0 %v4825_v13 }
0x1fe7   :  { %10164 = vmatpush3.msra.mxu1 %v12164_v8  ;;  %10200 = vmatprep.subr.mxu0 %v4824_v12 }
0x1fe8   :  { %10165 = vmatprep.subr.mxu1 %v12172_v24  ;;  %10201 = vmatpush3.msra.mxu0 %v4824_v12 }
0x1fe9   :  { %10166 = vmatpush3.msra.mxu1 %v12172_v24  ;;  %10202 = vmatprep.subr.mxu0 %v4823_v41 }
0x1fea   :  { %10167 = vmatprep.subr.mxu1 %v12177_v10  ;;  %10203 = vmatpush3.msra.mxu0 %v4823_v41 }
0x1feb   :  { %10168 = vmatpush3.msra.mxu1 %v12177_v10  ;;  %10204 = vmatprep.subr.mxu0 %v4822_v43 }
0x1fec   :  { %10169 = vmatprep.subr.mxu1 %v12182_v7  ;;  %10205 = vmatpush3.msra.mxu0 %v4822_v43 }
0x1fed   :  { %10170 = vmatpush3.msra.mxu1 %v12182_v7  ;;  %10206 = vmatprep.subr.mxu0 %v4821_v45 }
0x1fee   :  { %10171 = vmatprep.subr.mxu1 %v12187_v11  ;;  %10207 = vmatpush3.msra.mxu0 %v4821_v45 }
0x1fef   :  { %10172 = vmatpush3.msra.mxu1 %v12187_v11  ;;  %10208 = vmatprep.subr.mxu0 %v4820_v46 }
0x1ff0   :  { %10173 = vmatprep.subr.mxu1 %v12192_v31  ;;  %10209 = vmatpush3.msra.mxu0 %v4820_v46 }
0x1ff1   :  { %10174 = vmatpush3.msra.mxu1 %v12192_v31  ;;  %10210 = vmatprep.subr.mxu0 %v4819_v47 }
0x1ff2   :  { %10175 = vmatprep.subr.mxu1 %v12197_v18  ;;  %10211 = vmatpush3.msra.mxu0 %v4819_v47 }
0x1ff3   :  { %10176 = vmatpush3.msra.mxu1 %v12197_v18  ;;  %10215 = vmatprep.subr.mxu0 %v12147_v62 }
0x1ff4   :  { %10177 = vmatprep.subr.mxu1 %v12202_v19 }
0x1ff5   :  { %10178 = vmatpush3.msra.mxu1 %v12202_v19 }
0x1ff6   :  { %10179 = vmatprep.subr.mxu1 %v12207_v4 }
0x1ff7   :  { %10180 = vmatpush3.msra.mxu1 %v12207_v4 }
0x1ff8   :  { %10181 = vmatprep.subr.mxu1 %v12212_v22 }
0x1ff9   :  { %10182 = vmatpush3.msra.mxu1 %v12212_v22 }
0x1ffa   :  { %10183 = vmatprep.subr.mxu1 %v12217_v23 }
0x1ffb   :  { %10184 = vmatpush3.msra.mxu1 %v12217_v23 }
0x1ffc   :  { %10185 = vmatprep.subr.mxu1 %v12222_v20 }
0x1ffd   :  { %10186 = vmatpush3.msra.mxu1 %v12222_v20 }
0x1ffe   :  { %10187 = vmatprep.subr.mxu1 %v12228_v32 }
0x1fff   :  { %10188 = vmatpush3.msra.mxu1 %v12228_v32 }
0x2000   :  { %10189 = vmatprep.subr.mxu1 %v12233_v34 }
0x2001   :  { %10190 = vmatpush3.msra.mxu1 %v12233_v34 }
0x2002   :  { %10191 = vmatprep.subr.mxu1 %v12239_v29 }
0x2003   :  { %10192 = vmatpush3.msra.mxu1 %v12239_v29 }
0x2004   :  { %10194 = vmatmul.mubr.f32.vlgmr.msra.gmra.mxu1 %v4684_v42  ;;  %10250 = vmatprep.subr.mxu1 %v4826_v40 }
0x2005   :  { %10251 = vmatpush3.msra.mxu1 %v4826_v40 }
0x2006   :  { %10252 = vmatprep.subr.mxu1 %v4825_v13 }
0x2007   :  { %10253 = vmatpush3.msra.mxu1 %v4825_v13  ;;  %v5081_v13 = vld [vmem:[%s12965_s19 + $0x10] sm:$0xff] }
0x2008   :  { %10254 = vmatprep.subr.mxu1 %v4824_v12 }
0x2009   :  { %10255 = vmatpush3.msra.mxu1 %v4824_v12  ;;  %v5080_v12 = vld [vmem:[%s12965_s19 + $0x8] sm:$0xff] }
0x200a   :  { %10256 = vmatprep.subr.mxu1 %v4823_v41 }
0x200b   :  { %10257 = vmatpush3.msra.mxu1 %v4823_v41 }
0x200c   :  { %10258 = vmatprep.subr.mxu1 %v4822_v43 }
0x200d   :  { %10259 = vmatpush3.msra.mxu1 %v4822_v43  ;;  %v5079_v43 = vld [vmem:[%s12965_s19] sm:$0xff] }
0x200e   :  { %10260 = vmatprep.subr.mxu1 %v4821_v45 }
0x200f   :  { %10261 = vmatpush3.msra.mxu1 %v4821_v45 }
0x2010   :  { %10262 = vmatprep.subr.mxu1 %v4820_v46 }
0x2011   :  { %10263 = vmatpush3.msra.mxu1 %v4820_v46 }
0x2012   :  { %10264 = vmatprep.subr.mxu1 %v4819_v47 }
0x2013   :  { %10265 = vmatpush3.msra.mxu1 %v4819_v47 }
0x20a2   :  { %v4646_v48 = vpop.f32.mrf.mxu0 }
0x20a3   :  { %v4686_v51 = vsub.f32 %v12103_v2, %v4646_v48  ;;  %v4688_v59 = vmul.f32 %v4646_v48, %v12103_v2 }
0x20a4   :  { %v4573_v49 = vpop.f32.mrf.mxu1  ;;  %v10160_v17 = vpop.f32.mrf.mxu0 }
0x20a5   :  { %v4685_v53 = vsub.f32 %v12098_v15, %v4573_v49  ;;  %v4687_v54 = vmul.f32 %v4573_v49, %v12098_v15  ;;  %v10656_v55 = vpack.i.bf16 %v4646_v48, %v4573_v49  ;;  %v9465_v48 = vld [vmem:[#allocation3] ss:$0 sm:$0xff] }
0x20a6   :  { %v10155_v56 = vpop.f32.mrf.mxu1 }
0x20a7   :  { %v10661_v60 = vpack.i.bf16 %v4686_v51, %v4685_v53  ;;  %10657 = vrot.lane.b32.xlu1 %v10656_v55, %s11250_s25  ;;  %v10666_v35 = vpack.i.bf16 %v4688_v59, %v4687_v54 }
0x20a9   :  { %10662 = vrot.lane.b32.xlu0 %v10661_v60, %s11237_s3 }
0x20ab   :  { %10667 = vrot.lane.b32.xlu1 %v10666_v35, %s11236_s17 }
0x20ad   :  { %5091 = vperm.xlu0 %10639, %v5077_v14  }
0x20af   :  { %5098 = vperm.xlu1 %10640, %v5078_v61  }
0x20c4   :  { %v10195_v39 = vpop.f32.mrf.mxu1 }
0x20c5   :  { %v4814_v0 = vadd.f32 %v10195_v39, %v12269_v63 }
0x20c6   :  { %v4808_v1 = vpop.f32.mrf.mxu1 }
0x20c7   :  { %v4809_v50 = vadd.f32 %v12269_v63, %v4808_v1  ;;  %v4818_v57 = vmax.f32 %v4814_v0, 0.0 }
0x20c9   :  { %v4817_v21 = vmax.f32 %v4809_v50, 0.0 }
0x20cb   :  { %10212 = vmatprep.mubr.msk.f32.mxu0 %vm3948_vm9, %v4817_v21 }
0x20cc   :  { %10213 = vmatmul.mubr.msk.f32.vlgmr.msra.gmra.mxu0 %vm3948_vm9, %v4818_v57 }
0x20cd   :  { %10216 = vmatpush3.msra.mxu0 %v12147_v62 }
0x20ce   :  { %10217 = vmatprep.subr.mxu0 %v12164_v8 }
0x20cf   :  { %10218 = vmatpush3.msra.mxu0 %v12164_v8 }
0x20d0   :  { %10219 = vmatprep.subr.mxu0 %v12172_v24 }
0x20d1   :  { %10220 = vmatpush3.msra.mxu0 %v12172_v24 }
0x20d2   :  { %10221 = vmatprep.subr.mxu0 %v12177_v10 }
0x20d3   :  { %10222 = vmatpush3.msra.mxu0 %v12177_v10 }
0x20d4   :  { %10223 = vmatprep.subr.mxu0 %v12182_v7 }
0x20d5   :  { %10224 = vmatpush3.msra.mxu0 %v12182_v7 }
0x20d6   :  { %10225 = vmatprep.subr.mxu0 %v12187_v11 }
0x20d7   :  { %10226 = vmatpush3.msra.mxu0 %v12187_v11 }
0x20d8   :  { %10227 = vmatprep.subr.mxu0 %v12192_v31 }
0x20d9   :  { %10228 = vmatpush3.msra.mxu0 %v12192_v31 }
0x20da   :  { %10229 = vmatprep.subr.mxu0 %v12197_v18 }
0x20db   :  { %10230 = vmatpush3.msra.mxu0 %v12197_v18 }
0x20dc   :  { %10231 = vmatprep.subr.mxu0 %v12202_v19 }
0x20dd   :  { %10232 = vmatpush3.msra.mxu0 %v12202_v19  ;;  %v12319_v19 = vld [vmem:[%s12966_s24] ss:$0 sm:$0xff] }
0x20de   :  { %10233 = vmatprep.subr.mxu0 %v12207_v4 }
0x20df   :  { %10234 = vmatpush3.msra.mxu0 %v12207_v4 }
0x20e0   :  { %10235 = vmatprep.subr.mxu0 %v12212_v22 }
0x20e1   :  { %10236 = vmatpush3.msra.mxu0 %v12212_v22 }
0x20e2   :  { %10237 = vmatprep.subr.mxu0 %v12217_v23 }
0x20e3   :  { %10238 = vmatpush3.msra.mxu0 %v12217_v23 }
0x20e4   :  { %10239 = vmatprep.subr.mxu0 %v12222_v20 }
0x20e5   :  { %10240 = vmatpush3.msra.mxu0 %v12222_v20 }
0x20e6   :  { %10241 = vmatprep.subr.mxu0 %v12228_v32 }
0x20e7   :  { %10242 = vmatpush3.msra.mxu0 %v12228_v32 }
0x20e8   :  { %10243 = vmatprep.subr.mxu0 %v12233_v34 }
0x20e9   :  { %10244 = vmatpush3.msra.mxu0 %v12233_v34 }
0x20ea   :  { %10245 = vmatprep.subr.mxu0 %v12239_v29 }
0x20eb   :  { %10246 = vmatpush3.msra.mxu0 %v12239_v29 }
0x20ec   :  { %10280 = vmatprep.subr.mxu0 %v11234_v26 }
0x2119   :  { %v10658_v62 = vpop.permute.xlu1 %10657 }
0x211a   :  { %v10660_v16 = vunpack.i.h.bf16 %v10658_v62  ;;  %v10659_v3 = vunpack.i.l.bf16 %v10658_v62 }
0x211b   :  { %v10663_v25 = vpop.permute.xlu0 %10662 }
0x211c   :  { %v10665_v5 = vunpack.i.h.bf16 %v10663_v25  ;;  %v10664_v58 = vunpack.i.l.bf16 %v10663_v25  ;;  %v4713_v6 = vsel %vm458_vm1, %v12098_v15, %v10659_v3  ;;  %v4714_v8 = vsel %vm458_vm1, %v12103_v2, %v10660_v16  ;;  %v5082_v15 = vld [vmem:[%s12965_s19 + $0x18] sm:$0xff] }
0x211d   :  { %v10668_v9 = vpop.permute.xlu1 %10667  ;;  %10269 = vmatprep.subr.mxu1 %v5082_v15 }
0x211e   :  { %v10670_v33 = vunpack.i.h.bf16 %v10668_v9  ;;  %v10669_v24 = vunpack.i.l.bf16 %v10668_v9  ;;  %v4715_v10 = vsel %vm3948_vm9, %v4713_v6, %v10664_v58  ;;  %v4716_v7 = vsel %vm3948_vm9, %v4714_v8, %v10665_v5 }
0x2120   :  { %v4717_v11 = vsel %vm4682_vm10, %v4715_v10, %v10669_v24  ;;  %v4718_v31 = vsel %vm4682_vm10, %v4716_v7, %v10670_v33 }
0x2121   :  { %10247 = vmatprep.mubr.f32.mxu0 %v4717_v11 }
0x2122   :  { %10248 = vmatmul.mubr.f32.vlgmr.msra.gmra.mxu0 %v4718_v31 }
0x2123   :  { %10282 = vmatprep.mubr.msk.f32.mxu0 %vm11235_vm2, %v11234_v26 }
0x2128   :  { %v5092_v20 = vpop.permute.xlu0 %5091 }
0x212a   :  { %v5099_v52 = vpop.permute.xlu1 %5098 }
0x218c   :  { %v10214_v18 = vpop.f32.mrf.mxu0 }
0x218d   :  { %v4912_v28 = vadd.f32 %v10214_v18, %v12319_v19 }
0x218e   :  { %v4906_v2 = vpop.f32.mrf.mxu0 }
0x218f   :  { %v4907_v4 = vadd.f32 %v12319_v19, %v4906_v2  ;;  %v4916_v38 = vmax.f32 %v4912_v28, 0.0 }
0x2191   :  { %v4915_v22 = vmax.f32 %v4907_v4, 0.0  ;;  %v5095_v41 = vmul.f32 %v5092_v20, %v4916_v38 }
0x2193   :  { %v5094_v36 = vmul.f32 %v5092_v20, %v4915_v22  ;;  %v12334_v45 = vadd.f32 %v5099_v52, %v5095_v41 }
0x2195   :  { %v12325_v40 = vadd.f32 %v5099_v52, %v5094_v36 }
0x21e2   :  { %v10249_v23 = vpop.f32.mrf.mxu0 }
0x21e3   :  { %v4989_v32 = vadd.f32 %v10249_v23, %v12269_v63 }
0x21e4   :  { %v4983_v34 = vpop.f32.mrf.mxu0 }
0x21e5   :  { %v4984_v29 = vadd.f32 %v12269_v63, %v4983_v34  ;;  %v4993_v42 = vmax.f32 %v4989_v32, 0.0 }
0x21e7   :  { %v4992_v37 = vmax.f32 %v4984_v29, 0.0 }
0x21e9   :  { %10266 = vmatprep.mubr.msk.f32.mxu1 %vm3948_vm9, %v4992_v37 }
0x21ea   :  { %10267 = vmatmul.mubr.msk.f32.vlgmr.msra.gmra.mxu1 %vm3948_vm9, %v4993_v42 }
0x21eb   :  { %10270 = vmatpush3.msra.mxu1 %v5082_v15  ;;  %10277 = vmatprep.mubr.msk.f32.mxu1 %vm458_vm1, %v12325_v40 }
0x21ec   :  { %10271 = vmatprep.subr.mxu1 %v5081_v13 }
0x21ed   :  { %10272 = vmatpush3.msra.mxu1 %v5081_v13 }
0x21ee   :  { %10273 = vmatprep.subr.mxu1 %v5080_v12 }
0x21ef   :  { %10274 = vmatpush3.msra.mxu1 %v5080_v12 }
0x21f0   :  { %10275 = vmatprep.subr.mxu1 %v5079_v43 }
0x21f1   :  { %10276 = vmatpush3.msra.mxu1 %v5079_v43 }
0x21f2   :  { %10278 = vmatmul.mubr.msk.f32.vlgmr.msra.gmra.mxu1 %vm458_vm1, %v12334_v45  ;;  %10290 = vmatprep.subr.mxu1 %v11234_v26 }
0x21f3   :  { %10292 = vmatprep.mubr.msk.f32.mxu1 %vm11235_vm2, %v11234_v26 }
0x22aa   :  { %v12341_v46 = vpop.f32.mrf.mxu1 }
0x22ac   :  { %v12343_v47 = vpop.f32.mrf.mxu1 }
0x22b2   :  { %v10279_v49 = vpop.f32.mrf.mxu1 }
0x22b3   :  { %v12345_v17 = vadd.f32 %v10279_v49, %v9465_v48 }
0x22b4   :  { %v5181_v51 = vpop.f32.mrf.mxu1 }
0x22b5   :  { %v12347_v53 = vadd.f32 %v9465_v48, %v5181_v51  ;;  %5268 = vrot.lane.b32.xlu1 %v12345_v17, %s11236_s17 }
0x22b7   :  { %5191 = vrot.lane.b32.xlu0 %v12347_v53, %s11236_s17 }
0x2327   :  { %v5269_v55 = vpop.permute.xlu1 %5268 }
0x2329   :  { %v5192_v54 = vpop.permute.xlu0 %5191 }
0x232a   :  { %10281 = vmatpush3.xpose.msk.msra.mxu0 %vm543_vm3, %v5192_v54 }
0x232b   :  { %10285 = vmatprep.subr.mxu0 %v11234_v26 }
0x232d   :  { %10283 = vmatmul.mubr.msk.f32.vlgmr.msra.gmra.mxu0 %vm543_vm3, %v12347_v53 }
0x232e   :  { %10286 = vmatpush3.xpose.msk.msra.mxu0 %vm543_vm3, %v5269_v55  ;;  %10287 = vmatprep.mubr.msk.f32.mxu0 %vm11235_vm2, %v11234_v26 }
0x232f   :  { %10295 = vmatprep.subr.mxu0 %v11234_v26 }
0x2331   :  { %10288 = vmatmul.mubr.msk.f32.vlgmr.msra.gmra.mxu0 %vm543_vm3, %v12345_v17 }
0x2332   :  { %10297 = vmatprep.mubr.msk.f32.mxu0 %vm11235_vm2, %v11234_v26 }
0x23ed   :  { %v5263_v56 = vpop.f32.mrf.mxu0 }
0x23ee   :  { %v5344_v59 = vmul.f32 0.35355338, %v5263_v56 }
0x23ef   :  { %v10284_v60 = vpop.f32.mrf.mxu0 }
0x23f0   :  { %v5346_v35 = vsel %vm543_vm3, %v5344_v59, -inf }
0x23f1   :  { %5347 = vmax.xlane.f32.xlu0 %v5346_v35  ;;  %v5340_v14 = vpop.f32.mrf.mxu0 }
0x23f2   :  { %v5345_v61 = vmul.f32 0.35355338, %v5340_v14 }
0x23f3   :  { %v10289_v63 = vpop.f32.mrf.mxu0 }
0x23f4   :  { %v5349_v39 = vsel %vm543_vm3, %v5345_v61, -inf }
0x23f5   :  { %5350 = vmax.xlane.f32.xlu1 %v5349_v39 }
0x2406   :  { %5368 = vrot.lane.b32.xlu1 %v12347_v53, %s11237_s3 }
0x2407   :  { %5444 = vrot.lane.b32.xlu0 %v12345_v17, %s11237_s3 }
0x240a   :  { %5522 = vrot.lane.b32.xlu1 %v12347_v53, %s11239_s14 }
0x240e   :  { %5600 = vrot.lane.b32.xlu1 %v12345_v17, %s11239_s14 }
0x2412   :  { %5598 = vrot.lane.b32.xlu1 %v12345_v17, %s11238_s8 }
0x247a   :  { %v5348_v0 = vpop.xlane.xlu0 %5347 }
0x247b   :  { %v5352_v1 = vsub.f32 %v5344_v59, %v5348_v0 }
0x247d   :  { %v5354_v50 = vmul.f32 1.442695, %v5352_v1 }
0x247e   :  { %v5445_v21 = vpop.permute.xlu0 %5444  ;;  %v5351_v57 = vpop.xlane.xlu1 %5350 }
0x247f   :  { %10771 = vpow2.f32 %v5354_v50  ;;  %v5353_v62 = vsub.f32 %v5345_v61, %v5351_v57  ;;  %10296 = vmatpush3.msra.mxu0 %v5445_v21 }
0x2480   :  { %10305 = vmatprep.subr.mxu0 %v11234_v26 }
0x2481   :  { %v5356_v16 = vmul.f32 1.442695, %v5353_v62 }
0x2482   :  { %v5369_v3 = vpop.permute.xlu1 %5368 }
0x2483   :  { %10773 = vpow2.f32 %v5356_v16  ;;  %10291 = vmatpush3.msra.mxu1 %v5369_v3 }
0x2484   :  { %10300 = vmatprep.subr.mxu1 %v11234_v26 }
0x2486   :  { %v5523_v33 = vpop.permute.xlu1 %5522 }
0x248a   :  { %v5601_v11 = vpop.permute.xlu1 %5600 }
0x248c   :  { %v10772_v25 = vpop.eup %10771 }
0x248d   :  { %v5358_v5 = vsel %vm543_vm3, %v10772_v25, 0.0 }
0x248e   :  { %5359 = vadd.xlane.f32.xlu0 %v5358_v5  ;;  %v5599_v18 = vpop.permute.xlu1 %5598 }
0x2490   :  { %v10774_v58 = vpop.eup %10773 }
0x2491   :  { %v5361_v6 = vsel %vm543_vm3, %v10774_v58, 0.0 }
0x2492   :  { %5362 = vadd.xlane.f32.xlu0 %v5361_v6 }
0x24a8   :  { %5520 = vrot.lane.b32.xlu0 %v12347_v53, %s11238_s8 }
0x2517   :  { %v5360_v8 = vpop.xlane.xlu0 %5359 }
0x2518   :  { %10775 = vrcp.f32 %v5360_v8 }
0x251b   :  { %v5363_v9 = vpop.xlane.xlu0 %5362 }
0x251c   :  { %10777 = vrcp.f32 %v5363_v9 }
0x251f   :  { %v5521_v15 = vpop.permute.xlu0 %5520 }
0x2525   :  { %v10776_v24 = vpop.eup %10775 }
0x2526   :  { %v5365_v10 = vmul.f32 %v10776_v24, %v10772_v25 }
0x2528   :  { %10293 = vmatmul.mubr.msk.f32.vlgmr.msra.gmra.mxu1 %vm543_vm3, %v5365_v10 }
0x2529   :  { %v10778_v7 = vpop.eup %10777  ;;  %10301 = vmatpush3.xpose.msk.msra.mxu1 %vm543_vm3, %v5523_v33  ;;  %10302 = vmatprep.mubr.msk.f32.mxu1 %vm11235_vm2, %v11234_v26 }
0x252a   :  { %v5367_v31 = vmul.f32 %v10778_v7, %v10774_v58  ;;  %10310 = vmatprep.subr.mxu1 %v11234_v26 }
0x252c   :  { %10298 = vmatmul.mubr.msk.f32.vlgmr.msra.gmra.mxu0 %vm543_vm3, %v5367_v31  ;;  %10303 = vmatmul.mubr.msk.f32.vlgmr.msra.gmra.mxu1 %vm543_vm3, %v5521_v15 }
0x252d   :  { %10306 = vmatpush3.xpose.msk.msra.mxu0 %vm543_vm3, %v5601_v11  ;;  %10307 = vmatprep.mubr.msk.f32.mxu0 %vm11235_vm2, %v11234_v26 }
0x252e   :  { %10315 = vmatprep.subr.mxu0 %v11234_v26  ;;  %10312 = vmatprep.mubr.msk.f32.mxu1 %vm11235_vm2, %v11234_v26 }
0x2530   :  { %10308 = vmatmul.mubr.msk.f32.vlgmr.msra.gmra.mxu0 %vm543_vm3, %v5599_v18 }
0x2531   :  { %10317 = vmatprep.mubr.msk.f32.mxu0 %vm11235_vm2, %v11234_v26 }
0x25e8   :  { %v12399_v2 = vpop.f32.mrf.mxu1 }
0x25ea   :  { %v10294_v4 = vpop.f32.mrf.mxu1 }
0x25ec   :  { %v12401_v22 = vpop.f32.mrf.mxu0  ;;  %v5594_v23 = vpop.f32.mrf.mxu1 }
0x25ed   :  { %v5676_v20 = vmul.f32 0.35355338, %v5594_v23 }
0x25ee   :  { %v10299_v28 = vpop.f32.mrf.mxu0  ;;  %v10304_v32 = vpop.f32.mrf.mxu1 }
0x25ef   :  { %v5678_v34 = vsel %vm543_vm3, %v5676_v20, -inf }
0x25f0   :  { %5679 = vmax.xlane.f32.xlu0 %v5678_v34  ;;  %v5672_v36 = vpop.f32.mrf.mxu0 }
0x25f1   :  { %v5677_v29 = vmul.f32 0.35355338, %v5672_v36 }
0x25f2   :  { %v10309_v37 = vpop.f32.mrf.mxu0 }
0x25f3   :  { %v5681_v52 = vsel %vm543_vm3, %v5677_v29, -inf }
0x25f4   :  { %5682 = vmax.xlane.f32.xlu1 %v5681_v52 }
0x2605   :  { %5700 = vrot.lane.b32.xlu1 %v12347_v53, %s11240_s12 }
0x2606   :  { %5776 = vrot.lane.b32.xlu0 %v12345_v17, %s11240_s12 }
0x2609   :  { %5854 = vrot.lane.b32.xlu1 %v12347_v53, %s11242_s30 }
0x260d   :  { %5932 = vrot.lane.b32.xlu1 %v12345_v17, %s11242_s30 }
0x2611   :  { %5930 = vrot.lane.b32.xlu1 %v12345_v17, %s11241_s27 }
0x2679   :  { %v5680_v38 = vpop.xlane.xlu0 %5679 }
0x267a   :  { %v5684_v42 = vsub.f32 %v5676_v20, %v5680_v38 }
0x267c   :  { %v5686_v13 = vmul.f32 1.442695, %v5684_v42 }
0x267d   :  { %v5777_v12 = vpop.permute.xlu0 %5776  ;;  %v5683_v41 = vpop.xlane.xlu1 %5682 }
0x267e   :  { %10779 = vpow2.f32 %v5686_v13  ;;  %v5685_v43 = vsub.f32 %v5677_v29, %v5683_v41  ;;  %10316 = vmatpush3.msra.mxu0 %v5777_v12 }
0x267f   :  { %10325 = vmatprep.subr.mxu0 %v11234_v26 }
0x2680   :  { %v5688_v48 = vmul.f32 1.442695, %v5685_v43 }
0x2681   :  { %v5701_v49 = vpop.permute.xlu1 %5700 }
0x2682   :  { %10781 = vpow2.f32 %v5688_v48  ;;  %10311 = vmatpush3.msra.mxu1 %v5701_v49 }
0x2683   :  { %10320 = vmatprep.subr.mxu1 %v11234_v26 }
0x2685   :  { %v5855_v35 = vpop.permute.xlu1 %5854 }
0x2689   :  { %v5933_v39 = vpop.permute.xlu1 %5932 }
0x268b   :  { %v10780_v51 = vpop.eup %10779 }
0x268c   :  { %v5690_v54 = vsel %vm543_vm3, %v10780_v51, 0.0 }
0x268d   :  { %5691 = vadd.xlane.f32.xlu0 %v5690_v54  ;;  %v5931_v50 = vpop.permute.xlu1 %5930 }
0x268f   :  { %v10782_v55 = vpop.eup %10781 }
0x2690   :  { %v5693_v56 = vsel %vm543_vm3, %v10782_v55, 0.0 }
0x2691   :  { %5694 = vadd.xlane.f32.xlu0 %v5693_v56 }
0x26a7   :  { %5852 = vrot.lane.b32.xlu0 %v12347_v53, %s11241_s27 }
0x2716   :  { %v5692_v59 = vpop.xlane.xlu0 %5691 }
0x2717   :  { %10783 = vrcp.f32 %v5692_v59 }
0x271a   :  { %v5695_v60 = vpop.xlane.xlu0 %5694 }
0x271b   :  { %10785 = vrcp.f32 %v5695_v60 }
0x271e   :  { %v5853_v1 = vpop.permute.xlu0 %5852 }
0x2724   :  { %v10784_v14 = vpop.eup %10783 }
0x2725   :  { %v5697_v61 = vmul.f32 %v10784_v14, %v10780_v51 }
0x2727   :  { %10313 = vmatmul.mubr.msk.f32.vlgmr.msra.gmra.mxu1 %vm543_vm3, %v5697_v61 }
0x2728   :  { %v10786_v63 = vpop.eup %10785  ;;  %10321 = vmatpush3.xpose.msk.msra.mxu1 %vm543_vm3, %v5855_v35  ;;  %10322 = vmatprep.mubr.msk.f32.mxu1 %vm11235_vm2, %v11234_v26 }
0x2729   :  { %v5699_v0 = vmul.f32 %v10786_v63, %v10782_v55  ;;  %10330 = vmatprep.subr.mxu1 %v11234_v26 }
0x272b   :  { %10318 = vmatmul.mubr.msk.f32.vlgmr.msra.gmra.mxu0 %vm543_vm3, %v5699_v0  ;;  %10323 = vmatmul.mubr.msk.f32.vlgmr.msra.gmra.mxu1 %vm543_vm3, %v5853_v1 }
0x272c   :  { %10326 = vmatpush3.xpose.msk.msra.mxu0 %vm543_vm3, %v5933_v39  ;;  %10327 = vmatprep.mubr.msk.f32.mxu0 %vm11235_vm2, %v11234_v26 }
0x272d   :  { %10335 = vmatprep.subr.mxu0 %v11234_v26  ;;  %10332 = vmatprep.mubr.msk.f32.mxu1 %vm11235_vm2, %v11234_v26 }
0x272f   :  { %10328 = vmatmul.mubr.msk.f32.vlgmr.msra.gmra.mxu0 %vm543_vm3, %v5931_v50 }
0x2730   :  { %10337 = vmatprep.mubr.msk.f32.mxu0 %vm11235_vm2, %v11234_v26 }
0x27e7   :  { %v12437_v21 = vpop.f32.mrf.mxu1 }
0x27e9   :  { %v10314_v57 = vpop.f32.mrf.mxu1 }
0x27eb   :  { %v12439_v62 = vpop.f32.mrf.mxu0  ;;  %v5926_v16 = vpop.f32.mrf.mxu1 }
0x27ec   :  { %v6008_v3 = vmul.f32 0.35355338, %v5926_v16 }
0x27ed   :  { %v10319_v25 = vpop.f32.mrf.mxu0  ;;  %v10324_v5 = vpop.f32.mrf.mxu1 }
0x27ee   :  { %v6010_v58 = vsel %vm543_vm3, %v6008_v3, -inf }
0x27ef   :  { %6011 = vmax.xlane.f32.xlu0 %v6010_v58  ;;  %v6004_v6 = vpop.f32.mrf.mxu0 }
0x27f0   :  { %v6009_v8 = vmul.f32 0.35355338, %v6004_v6 }
0x27f1   :  { %v10329_v9 = vpop.f32.mrf.mxu0 }
0x27f2   :  { %v6013_v33 = vsel %vm543_vm3, %v6009_v8, -inf }
0x27f3   :  { %6014 = vmax.xlane.f32.xlu1 %v6013_v33 }
0x2804   :  { %6032 = vrot.lane.b32.xlu1 %v12347_v53, %s11243_s20 }
0x2805   :  { %6108 = vrot.lane.b32.xlu0 %v12345_v17, %s11243_s20 }
0x2808   :  { %6186 = vrot.lane.b32.xlu1 %v12347_v53, %s11245_s16 }
0x280c   :  { %6264 = vrot.lane.b32.xlu1 %v12345_v17, %s11245_s16 }
0x2810   :  { %6262 = vrot.lane.b32.xlu1 %v12345_v17, %s11244_s13 }
0x2878   :  { %v6012_v24 = vpop.xlane.xlu0 %6011 }
0x2879   :  { %v6016_v10 = vsub.f32 %v6008_v3, %v6012_v24  ;;  %v5087_v24 = vld [vmem:[%s12967_s11 + $0x18] sm:$0xff] }
0x287b   :  { %v6018_v7 = vmul.f32 1.442695, %v6016_v10  ;;  %v5085_v10 = vld [vmem:[%s12967_s11 + $0x8] sm:$0xff] }
0x287c   :  { %v6109_v11 = vpop.permute.xlu0 %6108  ;;  %v6015_v31 = vpop.xlane.xlu1 %6014 }
0x287d   :  { %10787 = vpow2.f32 %v6018_v7  ;;  %v6017_v15 = vsub.f32 %v6009_v8, %v6015_v31  ;;  %10336 = vmatpush3.msra.mxu0 %v6109_v11  ;;  %v5084_v7 = vld [vmem:[%s12967_s11] sm:$0xff] }
0x287e   :  { %10345 = vmatprep.subr.mxu0 %v11234_v26 }
0x287f   :  { %v6020_v18 = vmul.f32 1.442695, %v6017_v15 }
0x2880   :  { %v6033_v4 = vpop.permute.xlu1 %6032 }
0x2881   :  { %10789 = vpow2.f32 %v6020_v18  ;;  %10331 = vmatpush3.msra.mxu1 %v6033_v4 }
0x2882   :  { %10340 = vmatprep.subr.mxu1 %v11234_v26 }
0x2884   :  { %v6187_v29 = vpop.permute.xlu1 %6186 }
0x2888   :  { %v6265_v42 = vpop.permute.xlu1 %6264 }
0x288a   :  { %v10788_v23 = vpop.eup %10787 }
0x288b   :  { %v6022_v20 = vsel %vm543_vm3, %v10788_v23, 0.0 }
0x288c   :  { %6023 = vadd.xlane.f32.xlu0 %v6022_v20  ;;  %v6263_v41 = vpop.permute.xlu1 %6262 }
0x288e   :  { %v10790_v28 = vpop.eup %10789 }
0x288f   :  { %v6025_v32 = vsel %vm543_vm3, %v10790_v28, 0.0 }
0x2890   :  { %6026 = vadd.xlane.f32.xlu0 %v6025_v32 }
0x28a6   :  { %6184 = vrot.lane.b32.xlu0 %v12347_v53, %s11244_s13 }
0x2915   :  { %v6024_v34 = vpop.xlane.xlu0 %6023 }
0x2916   :  { %10791 = vrcp.f32 %v6024_v34 }
0x2919   :  { %v6027_v36 = vpop.xlane.xlu0 %6026 }
0x291a   :  { %10793 = vrcp.f32 %v6027_v36 }
0x291d   :  { %v6185_v12 = vpop.permute.xlu0 %6184 }
0x2923   :  { %v10792_v37 = vpop.eup %10791 }
0x2924   :  { %v6029_v52 = vmul.f32 %v10792_v37, %v10788_v23 }
0x2926   :  { %10333 = vmatmul.mubr.msk.f32.vlgmr.msra.gmra.mxu1 %vm543_vm3, %v6029_v52 }
0x2927   :  { %v10794_v38 = vpop.eup %10793  ;;  %10341 = vmatpush3.xpose.msk.msra.mxu1 %vm543_vm3, %v6187_v29  ;;  %10342 = vmatprep.mubr.msk.f32.mxu1 %vm11235_vm2, %v11234_v26 }
0x2928   :  { %v6031_v13 = vmul.f32 %v10794_v38, %v10790_v28  ;;  %10350 = vmatprep.subr.mxu1 %v11234_v26 }
0x292a   :  { %10338 = vmatmul.mubr.msk.f32.vlgmr.msra.gmra.mxu0 %vm543_vm3, %v6031_v13  ;;  %10343 = vmatmul.mubr.msk.f32.vlgmr.msra.gmra.mxu1 %vm543_vm3, %v6185_v12 }
0x292b   :  { %10346 = vmatpush3.xpose.msk.msra.mxu0 %vm543_vm3, %v6265_v42  ;;  %10347 = vmatprep.mubr.msk.f32.mxu0 %vm11235_vm2, %v11234_v26 }
0x292c   :  { %10355 = vmatprep.subr.mxu0 %v11234_v26  ;;  %10352 = vmatprep.mubr.msk.f32.mxu1 %vm11235_vm2, %v11234_v26 }
0x292e   :  { %10348 = vmatmul.mubr.msk.f32.vlgmr.msra.gmra.mxu0 %vm543_vm3, %v6263_v41 }
0x292f   :  { %10357 = vmatprep.mubr.msk.f32.mxu0 %vm11235_vm2, %v11234_v26 }
0x29e6   :  { %v6104_v43 = vpop.f32.mrf.mxu1 }
0x29e8   :  { %v10334_v48 = vpop.f32.mrf.mxu1 }
0x29ea   :  { %v6180_v49 = vpop.f32.mrf.mxu0  ;;  %v6258_v51 = vpop.f32.mrf.mxu1 }
0x29eb   :  { %v6340_v54 = vmul.f32 0.35355338, %v6258_v51 }
0x29ec   :  { %v10339_v55 = vpop.f32.mrf.mxu0  ;;  %v10344_v56 = vpop.f32.mrf.mxu1 }
0x29ed   :  { %v6342_v59 = vsel %vm543_vm3, %v6340_v54, -inf }
0x29ee   :  { %6343 = vmax.xlane.f32.xlu0 %v6342_v59  ;;  %v6336_v60 = vpop.f32.mrf.mxu0 }
0x29ef   :  { %v6341_v35 = vmul.f32 0.35355338, %v6336_v60 }
0x29f0   :  { %v10349_v14 = vpop.f32.mrf.mxu0 }
0x29f1   :  { %v6345_v61 = vsel %vm543_vm3, %v6341_v35, -inf }
0x29f2   :  { %6346 = vmax.xlane.f32.xlu1 %v6345_v61 }
0x2a03   :  { %6364 = vrot.lane.b32.xlu1 %v12347_v53, %s11246_s21 }
0x2a07   :  { %6518 = vrot.lane.b32.xlu1 %v12437_v21, %s11247_s0 }
0x2a0b   :  { %6520 = vrot.lane.b32.xlu1 %v12439_v62, %s11247_s0 }
0x2a0f   :  { %6528 = vrot.lane.b32.xlu1 %v6180_v49, %s11248_s6 }
0x2a77   :  { %v6344_v63 = vpop.xlane.xlu0 %6343 }
0x2a78   :  { %v6348_v39 = vsub.f32 %v6340_v54, %v6344_v63  ;;  %v12517_v63 = vld [vmem:[%s12968_s5 + $0x18] sm:$0xff] }
0x2a7a   :  { %v6350_v0 = vmul.f32 1.442695, %v6348_v39  ;;  %v12522_v39 = vld [vmem:[%s12968_s5 + $0x10] sm:$0xff] }
0x2a7b   :  { %v6347_v1 = vpop.xlane.xlu1 %6346 }
0x2a7c   :  { %10795 = vpow2.f32 %v6350_v0  ;;  %v6349_v50 = vsub.f32 %v6341_v35, %v6347_v1  ;;  %v12526_v0 = vld [vmem:[%s12968_s5 + $0x8] sm:$0xff]  ;;  %v12531_v1 = vld [vmem:[%s12968_s5] sm:$0xff] }
0x2a7e   :  { %v6352_v57 = vmul.f32 1.442695, %v6349_v50 }
0x2a7f   :  { %v6365_v16 = vpop.permute.xlu1 %6364 }
0x2a80   :  { %10797 = vpow2.f32 %v6352_v57  ;;  %10351 = vmatpush3.msra.mxu1 %v6365_v16 }
0x2a81   :  { %10360 = vmatprep.subr.mxu1 %v5087_v24 }
0x2a83   :  { %v6519_v4 = vpop.permute.xlu1 %6518 }
0x2a84   :  { %v6540_v28 = vsel %vm543_vm3, %v12399_v2, %v6519_v4  ;;  %v9492_v2 = vld [vmem:[#allocation6] ss:$0 sm:$0xff] }
0x2a87   :  { %v6521_v23 = vpop.permute.xlu1 %6520 }
0x2a88   :  { %v6541_v37 = vsel %vm543_vm3, %v12401_v22, %v6521_v23 }
0x2a89   :  { %v10796_v3 = vpop.eup %10795 }
0x2a8a   :  { %v6354_v53 = vsel %vm543_vm3, %v10796_v3, 0.0 }
0x2a8b   :  { %6355 = vadd.xlane.f32.xlu0 %v6354_v53  ;;  %v6529_v32 = vpop.permute.xlu1 %6528 }
0x2a8c   :  { %v6543_v52 = vsel %vm1899_vm8, %v6541_v37, %v6529_v32  ;;  %v12567_v37 = vsub.s32 %v11760_v44, %v11873_v27 }
0x2a8d   :  { %v10798_v21 = vpop.eup %10797 }
0x2a8e   :  { %v6357_v25 = vsel %vm543_vm3, %v10798_v21, 0.0 }
0x2a8f   :  { %6358 = vadd.xlane.f32.xlu0 %v6357_v25 }
0x2aa5   :  { %6440 = vrot.lane.b32.xlu0 %v12345_v17, %s11246_s21  ;;  %v5086_v17 = vld [vmem:[%s12967_s11 + $0x10] sm:$0xff] }
0x2aa9   :  { %6526 = vrot.lane.b32.xlu0 %v6104_v43, %s11248_s6 }
0x2b14   :  { %v6356_v62 = vpop.xlane.xlu0 %6355 }
0x2b15   :  { %10799 = vrcp.f32 %v6356_v62 }
0x2b18   :  { %v6359_v5 = vpop.xlane.xlu0 %6358 }
0x2b19   :  { %10801 = vrcp.f32 %v6359_v5  ;;  %v12538_v5 = vld [vmem:[%s12959_s18] ss:$0 sm:$0xff]  ;;  %s12969_s18 = sld [smem:[#allocation67_spill]] }
0x2b1c   :  { %v6441_v58 = vpop.permute.xlu0 %6440 }
0x2b1d   :  { %10356 = vmatpush3.msra.mxu0 %v6441_v58 }
0x2b1e   :  { %10371 = vmatprep.subr.mxu0 %v12517_v63 }
0x2b20   :  { %v6527_v20 = vpop.permute.xlu0 %6526 }
0x2b21   :  { %v6542_v34 = vsel %vm1899_vm8, %v6540_v28, %v6527_v20 }
0x2b22   :  { %v10800_v6 = vpop.eup %10799 }
0x2b23   :  { %v6361_v8 = vmul.f32 %v10800_v6, %v10796_v3 }
0x2b25   :  { %10353 = vmatmul.mubr.msk.f32.vlgmr.msra.gmra.mxu1 %vm543_vm3, %v6361_v8 }
0x2b26   :  { %v10802_v9 = vpop.eup %10801  ;;  %10361 = vmatpush3.msra.mxu1 %v5087_v24 }
0x2b27   :  { %v6363_v33 = vmul.f32 %v10802_v9, %v10798_v21  ;;  %10362 = vmatprep.subr.mxu1 %v5086_v17  ;;  %v12542_v9 = vld [vmem:[%s12961_s26] ss:$0 sm:$0xff] }
0x2b28   :  { %10363 = vmatpush3.msra.mxu1 %v5086_v17 }
0x2b29   :  { %10358 = vmatmul.mubr.msk.f32.vlgmr.msra.gmra.mxu0 %vm543_vm3, %v6363_v33  ;;  %10364 = vmatprep.subr.mxu1 %v5085_v10 }
0x2b2a   :  { %10365 = vmatpush3.msra.mxu1 %v5085_v10  ;;  %10372 = vmatpush3.msra.mxu0 %v12517_v63  ;;  %v12552_v10 = vld [vmem:[#allocation11] ss:$0 sm:$0xff] }
0x2b2b   :  { %10366 = vmatprep.subr.mxu1 %v5084_v7  ;;  %10373 = vmatprep.subr.mxu0 %v12522_v39 }
0x2b2c   :  { %10367 = vmatpush3.msra.mxu1 %v5084_v7  ;;  %10374 = vmatpush3.msra.mxu0 %v12522_v39 }
0x2b2d   :  { %10382 = vmatprep.subr.mxu1 %v11234_v26  ;;  %10375 = vmatprep.subr.mxu0 %v12526_v0 }
0x2b2e   :  { %10376 = vmatpush3.msra.mxu0 %v12526_v0 }
0x2b2f   :  { %10377 = vmatprep.subr.mxu0 %v12531_v1 }
0x2b30   :  { %10378 = vmatpush3.msra.mxu0 %v12531_v1 }
0x2b31   :  { %10387 = vmatprep.subr.mxu0 %v11234_v26 }
0x2be5   :  { %v6436_v11 = vpop.f32.mrf.mxu1 }
0x2be6   :  { %6534 = vrot.lane.b32.xlu0 %v6436_v11, %s11249_s2 }
0x2be7   :  { %v10354_v31 = vpop.f32.mrf.mxu1 }
0x2be9   :  { %v6512_v15 = vpop.f32.mrf.mxu0 }
0x2bea   :  { %6536 = vrot.lane.b32.xlu1 %v6512_v15, %s11249_s2 }
0x2beb   :  { %v10359_v18 = vpop.f32.mrf.mxu0 }
0x2bec   :  { %v12556_v18 = vld [vmem:[#allocation12] ss:$0 sm:$0xff] }
0x2c58   :  { %v6535_v36 = vpop.permute.xlu0 %6534 }
0x2c59   :  { %v6544_v29 = vsel %vm342_vm0, %v6542_v34, %v6535_v36  ;;  %v12562_v36 = vld [vmem:[#allocation2] ss:$0 sm:$0xff] }
0x2c5a   :  { %10368 = vmatprep.mubr.msk.f32.mxu1 %vm458_vm1, %v6544_v29 }
0x2c5c   :  { %v6537_v38 = vpop.permute.xlu1 %6536 }
0x2c5d   :  { %v6545_v42 = vsel %vm342_vm0, %v6543_v52, %v6537_v38 }
0x2c5e   :  { %10369 = vmatmul.mubr.msk.f32.vlgmr.msra.gmra.mxu1 %vm458_vm1, %v6545_v42 }
0x2c5f   :  { %10384 = vmatprep.mubr.msk.f32.mxu1 %vm11235_vm2, %v11234_v26 }
0x2d1e   :  { %v10370_v13 = vpop.f32.mrf.mxu1 }
0x2d1f   :  { %v6630_v12 = vadd.f32 %v10370_v13, %v9492_v2 }
0x2d20   :  { %v6624_v41 = vpop.f32.mrf.mxu1 }
0x2d21   :  { %v6634_v43 = vadd.f32 %v6630_v12, %v12334_v45  ;;  %v6625_v48 = vadd.f32 %v9492_v2, %v6624_v41 }
0x2d23   :  { %v6633_v49 = vadd.f32 %v6625_v48, %v12325_v40  ;;  %v6638_v22 = vsel %vm458_vm1, %v6634_v43, 0.0  ;;  %v12574_v48 = vsub.s32 1, %v11873_v27 }
0x2d24   :  { %6639 = vadd.xlane.f32.xlu1 %v6638_v22 }
0x2d25   :  { %v6635_v51 = vsel %vm458_vm1, %v6633_v49, 0.0 }
0x2d26   :  { %6636 = vadd.xlane.f32.xlu0 %v6635_v51 }
0x2dad   :  { %v6640_v54 = vpop.xlane.xlu1 %6639 }
0x2dae   :  { %v6642_v55 = vmul.f32 0.03125, %v6640_v54 }
0x2daf   :  { %v6637_v56 = vpop.xlane.xlu0 %6636 }
0x2db0   :  { %v6641_v59 = vmul.f32 0.03125, %v6637_v56  ;;  %v6644_v60 = vsub.f32 %v6634_v43, %v6642_v55 }
0x2db2   :  { %v6643_v35 = vsub.f32 %v6633_v49, %v6641_v59  ;;  %v6646_v40 = vmul.f32 %v6644_v60, %v6644_v60 }
0x2db4   :  { %v6645_v45 = vmul.f32 %v6643_v35, %v6643_v35  ;;  %v6650_v61 = vsel %vm458_vm1, %v6646_v40, 0.0 }
0x2db6   :  { %v6647_v14 = vsel %vm458_vm1, %v6645_v45, 0.0 }
0x2db7   :  { %6648 = vadd.xlane.f32.xlu0 %v6647_v14 }
0x2dbb   :  { %6651 = vadd.xlane.f32.xlu0 %v6650_v61 }
0x2e40   :  { %v6649_v50 = vpop.xlane.xlu0 %6648 }
0x2e41   :  { %v6653_v57 = vmul.f32 0.03125, %v6649_v50 }
0x2e43   :  { %v6655_v16 = vadd.f32 1e-05, %v6653_v57 }
0x2e44   :  { %v6652_v3 = vpop.xlane.xlu0 %6651 }
0x2e45   :  { %10803 = vrsqrt.f32 %v6655_v16  ;;  %v6654_v53 = vmul.f32 0.03125, %v6652_v3 }
0x2e47   :  { %v6656_v21 = vadd.f32 1e-05, %v6654_v53 }
0x2e49   :  { %10805 = vrsqrt.f32 %v6656_v21  ;;  %v7026_v21 = vld [vmem:[%s12969_s18 + $0x18] sm:$0xff] }
0x2e52   :  { %v10804_v25 = vpop.eup %10803 }
0x2e53   :  { %v6659_v62 = vmul.f32 %v10804_v25, %v6643_v35  ;;  %v7021_v25 = vld [vmem:[%s12956_s29] sm:$0xff] }
0x2e55   :  { %v6661_v58 = vmul.f32 %v12538_v5, %v6659_v62  ;;  %v7022_v62 = vld [vmem:[%s12957_s9] sm:$0xff] }
0x2e56   :  { %v10806_v6 = vpop.eup %10805 }
0x2e57   :  { %v6660_v8 = vmul.f32 %v10806_v6, %v6644_v60  ;;  %v6663_v33 = vadd.f32 %v12542_v9, %v6661_v58 }
0x2e59   :  { %10379 = vmatprep.mubr.msk.f32.mxu0 %vm458_vm1, %v6663_v33  ;;  %10383 = vmatpush3.msra.mxu1 %v6663_v33  ;;  %v6662_v24 = vmul.f32 %v12538_v5, %v6660_v8  ;;  %v5072_v33 = vadd.f32 %v12341_v46, %v12319_v19 }
0x2e5a   :  { %10392 = vmatprep.subr.mxu1 %v7026_v21 }
0x2e5b   :  { %v6664_v17 = vadd.f32 %v12542_v9, %v6662_v24  ;;  %v5067_v24 = vadd.f32 %v12319_v19, %v12343_v47 }
0x2e5d   :  { %10380 = vmatmul.mubr.msk.f32.vlgmr.msra.gmra.mxu0 %vm458_vm1, %v6664_v17 }
0x2e5e   :  { %10388 = vmatpush3.msra.mxu0 %v6664_v17  ;;  %10389 = vmatprep.mubr.msk.f32.mxu0 %vm11235_vm2, %v11234_v26 }
0x2e5f   :  { %10403 = vmatprep.subr.mxu0 %v11234_v26 }
0x2f1d   :  { %v10381_v7 = vpop.f32.mrf.mxu0 }
0x2f1e   :  { %v6754_v11 = vadd.f32 %v10381_v7, %v12552_v10  ;;  %v7025_v7 = vld [vmem:[%s12969_s18 + $0x10] sm:$0xff] }
0x2f1f   :  { %v6748_v31 = vpop.f32.mrf.mxu0 }
0x2f20   :  { %10807 = vtanh.f32 %v6754_v11  ;;  %v6749_v15 = vadd.f32 %v12552_v10, %v6748_v31  ;;  %v7024_v31 = vld [vmem:[%s12969_s18 + $0x8] sm:$0xff] }
0x2f22   :  { %10809 = vtanh.f32 %v6749_v15  ;;  %v5076_v15 = vmax.f32 %v5072_v33, 0.0 }
0x2f2d   :  { %v10808_v4 = vpop.eup %10807 }
0x2f2e   :  { %v6767_v23 = vmul.f32 %v10808_v4, %v12556_v18  ;;  %v5075_v4 = vmax.f32 %v5067_v24, 0.0 }
0x2f2f   :  { %v10810_v20 = vpop.eup %10809 }
0x2f30   :  { %v6771_v28 = vsel %vm458_vm1, %v6767_v23, 0.0  ;;  %v6766_v32 = vmul.f32 %v10810_v20, %v12556_v18  ;;  %v7023_v23 = vld [vmem:[%s12969_s18] sm:$0xff] }
0x2f31   :  { %6772 = vadd.xlane.f32.xlu0 %v6771_v28 }
0x2f32   :  { %v6768_v34 = vsel %vm458_vm1, %v6766_v32, 0.0 }
0x2f33   :  { %6769 = vadd.xlane.f32.xlu1 %v6768_v34 }
0x2f44   :  { %6781 = vperm.xlu1 %10640, %v12562_v36  }
0x2fba   :  { %v6773_v52 = vpop.xlane.xlu0 %6772 }
0x2fbc   :  { %v6770_v29 = vpop.xlane.xlu1 %6769 }
0x2fc0   :  { %v6782_v38 = vpop.permute.xlu1 %6781 }
0x2fc1   :  { %v6784_v42 = vadd.f32 %v6782_v38, %v6770_v29  ;;  %v6785_v2 = vadd.f32 %v6782_v38, %v6773_v52 }
0x2fc3   :  { %v6791_v13 = vrot.slane %v6784_v42, %v12567_v37  ;;  %v6795_v12 = vrot.slane %v6785_v2, %v12567_v37 }
0x2fc5   :  { %v6797_v41 = vsel %vm6796_vm11, %v6795_v12, %v6791_v13 }
0x2fc6   :  { %v6800_v43 = vsel %vm6799_vm12, %v6797_v41, -inf }
0x2fc7   :  { %6801 = vmax.xlane.f32.xlu0 %v6800_v43 }
0x3050   :  { %v6802_v44 = vpop.xlane.xlu0 %6801 }
0x3051   :  { %v6807_v49 = vrot.slane %v6802_v44, %v11877_v30  ;;  %v6811_v22 = vrot.slane %v6802_v44, %v12574_v48 }
0x3053   :  { %v6814_v51 = vsub.f32 %v6784_v42, %v6807_v49  ;;  %v6815_v54 = vsub.f32 %v6785_v2, %v6811_v22  ;;  %v9502_v2 = vld [vmem:[#allocation8] ss:$0 sm:$0xff] }
0x3055   :  { %v6816_v55 = vmul.f32 1.442695, %v6814_v51  ;;  %v6818_v56 = vmul.f32 1.442695, %v6815_v54 }
0x3057   :  { %10811 = vpow2.f32 %v6816_v55 }
0x3058   :  { %10813 = vpow2.f32 %v6818_v56 }
0x3064   :  { %v10812_v59 = vpop.eup %10811 }
0x3065   :  { %v10814_v60 = vpop.eup %10813  ;;  %6823 = vperm.xlu0 %10639, %v10812_v59  }
0x3066   :  { %6826 = vperm.xlu1 %10640, %v10814_v60  }
0x30e0   :  { %v6824_v35 = vpop.permute.xlu0 %6823 }
0x30e1   :  { %v6827_v45 = vpop.permute.xlu1 %6826  ;;  %v6831_v27 = vrot.slane %v6824_v35, %v12567_v37 }
0x30e2   :  { %v6835_v14 = vrot.slane %v6827_v45, %v12567_v37 }
0x30e4   :  { %v6836_v40 = vsel %vm6796_vm11, %v6835_v14, %v6831_v27 }
0x30e5   :  { %v6838_v61 = vsel %vm6799_vm12, %v6836_v40, 0.0 }
0x30e6   :  { %6839 = vadd.xlane.f32.xlu1 %v6838_v61 }
0x316f   :  { %v6840_v50 = vpop.xlane.xlu1 %6839 }
0x3170   :  { %v6845_v57 = vrot.slane %v6840_v50, %v11877_v30  ;;  %v6849_v16 = vrot.slane %v6840_v50, %v12574_v48 }
0x3172   :  { %10815 = vrcp.f32 %v6845_v57 }
0x3173   :  { %10817 = vrcp.f32 %v6849_v16 }
0x317f   :  { %v10816_v3 = vpop.eup %10815 }
0x3180   :  { %v6853_v53 = vmul.f32 %v10816_v3, %v10812_v59  ;;  %v10818_v58 = vpop.eup %10817 }
0x3181   :  { %v6855_v6 = vmul.f32 %v10818_v58, %v10814_v60 }
0x3182   :  { %6858 = vperm.xlu0 %10639, %v6853_v53  }
0x3186   :  { %7035 = vperm.xlu0 %10639, %v7021_v25  }
0x318a   :  { %7042 = vperm.xlu0 %10639, %v7022_v62  }
0x318e   :  { %6938 = vperm.xlu0 %10639, %v6855_v6  }
0x31fd   :  { %v6859_v8 = vpop.permute.xlu0 %6858 }
0x31fe   :  { %v6863_v17 = vrot.slane %v6859_v8, %v12567_v37 }
0x3200   :  { %10385 = vmatmul.mubr.msk.f32.vlgmr.msra.gmra.mxu1 %vm543_vm3, %v6863_v17 }
0x3201   :  { %v7036_v11 = vpop.permute.xlu0 %7035  ;;  %10393 = vmatpush3.msra.mxu1 %v7026_v21 }
0x3202   :  { %10394 = vmatprep.subr.mxu1 %v7025_v7  ;;  %v7038_v20 = vmul.f32 %v7036_v11, %v5075_v4  ;;  %v7039_v28 = vmul.f32 %v7036_v11, %v5076_v15 }
0x3203   :  { %10395 = vmatpush3.msra.mxu1 %v7025_v7 }
0x3204   :  { %10396 = vmatprep.subr.mxu1 %v7024_v31 }
0x3205   :  { %v7043_v46 = vpop.permute.xlu0 %7042  ;;  %10397 = vmatpush3.msra.mxu1 %v7024_v31 }
0x3206   :  { %v12596_v32 = vadd.f32 %v7043_v46, %v7038_v20  ;;  %v12598_v19 = vadd.f32 %v7043_v46, %v7039_v28  ;;  %10398 = vmatprep.subr.mxu1 %v7023_v23 }
0x3207   :  { %10399 = vmatpush3.msra.mxu1 %v7023_v23 }
0x3208   :  { %10400 = vmatprep.mubr.msk.f32.mxu1 %vm458_vm1, %v12596_v32  ;;  %10413 = vmatprep.subr.mxu1 %v11234_v26 }
0x3209   :  { %10401 = vmatmul.mubr.msk.f32.vlgmr.msra.gmra.mxu1 %vm458_vm1, %v12598_v19  ;;  %v6939_v47 = vpop.permute.xlu0 %6938 }
0x320a   :  { %v6943_v34 = vrot.slane %v6939_v47, %v12567_v37  ;;  %10415 = vmatprep.mubr.msk.f32.mxu1 %vm11235_vm2, %v11234_v26 }
0x320c   :  { %v8962_v29 = vsel %vm6796_vm11, %v6943_v34, %v6863_v17  ;;  %10390 = vmatmul.mubr.msk.f32.vlgmr.msra.gmra.mxu0 %vm543_vm3, %v6943_v34 }
0x320d   :  { %8964 = vst.msk [vmem:[#allocation23] sm:$0x3] %vm6799_vm12, %v8962_v29  ;;  %10405 = vmatprep.mubr.msk.f32.mxu0 %vm11235_vm2, %v11234_v26 }
0x32c0   :  { %v6932_v52 = vpop.f32.mrf.mxu1 }
0x32c2   :  { %v10386_v38 = vpop.f32.mrf.mxu1 }
0x32c9   :  { %v10402_v42 = vpop.f32.mrf.mxu1 }
0x32ca   :  { %v12620_v22 = vadd.f32 %v10402_v42, %v9502_v2 }
0x32cb   :  { %v7125_v13 = vpop.f32.mrf.mxu1 }
0x32cc   :  { %v12613_v12 = vadd.f32 %v9502_v2, %v7125_v13  ;;  %v7012_v41 = vpop.f32.mrf.mxu0 }
0x32cd   :  { %v7017_v43 = vrot.slane %v7012_v41, 7 }
0x32ce   :  { %7135 = vrot.lane.b32.xlu0 %v12613_v12, %s11236_s17  ;;  %v10391_v44 = vpop.f32.mrf.mxu0 }
0x32cf   :  { %v12618_v49 = vsel %vm7019_vm13, %v6932_v52, %v7017_v43 }
0x32d2   :  { %7212 = vrot.lane.b32.xlu0 %v12620_v22, %s11236_s17  ;;  %s12970_s17 = sld [smem:[#allocation68_spill]] }
0x3340   :  { %v7136_v51 = vpop.permute.xlu0 %7135 }
0x3341   :  { %10404 = vmatpush3.xpose.msk.msra.mxu0 %vm543_vm3, %v7136_v51 }
0x3342   :  { %10408 = vmatprep.subr.mxu0 %v11234_v26 }
0x3344   :  { %10406 = vmatmul.mubr.msk.f32.vlgmr.msra.gmra.mxu0 %vm543_vm3, %v12613_v12  ;;  %v7213_v54 = vpop.permute.xlu0 %7212 }
0x3345   :  { %10409 = vmatpush3.xpose.msk.msra.mxu0 %vm543_vm3, %v7213_v54  ;;  %10410 = vmatprep.mubr.msk.f32.mxu0 %vm11235_vm2, %v11234_v26 }
0x3346   :  { %10418 = vmatprep.subr.mxu0 %v11234_v26 }
0x3348   :  { %10411 = vmatmul.mubr.msk.f32.vlgmr.msra.gmra.mxu0 %vm543_vm3, %v12620_v22 }
0x3349   :  { %10420 = vmatprep.mubr.msk.f32.mxu0 %vm11235_vm2, %v11234_v26 }
0x3404   :  { %v7207_v55 = vpop.f32.mrf.mxu0 }
0x3405   :  { %v7288_v56 = vmul.f32 0.35355338, %v7207_v55 }
0x3406   :  { %v10407_v59 = vpop.f32.mrf.mxu0 }
0x3407   :  { %v7290_v60 = vsel %vm543_vm3, %v7288_v56, -inf }
0x3408   :  { %7291 = vmax.xlane.f32.xlu0 %v7290_v60  ;;  %v7284_v35 = vpop.f32.mrf.mxu0 }
0x3409   :  { %v7289_v45 = vmul.f32 0.35355338, %v7284_v35 }
0x340a   :  { %v10412_v27 = vpop.f32.mrf.mxu0 }
0x340b   :  { %v7293_v14 = vsel %vm543_vm3, %v7289_v45, -inf }
0x340c   :  { %7294 = vmax.xlane.f32.xlu1 %v7293_v14 }
0x341d   :  { %7312 = vrot.lane.b32.xlu1 %v12613_v12, %s11237_s3 }
0x341e   :  { %7388 = vrot.lane.b32.xlu0 %v12620_v22, %s11237_s3  ;;  %s12971_s3 = sld [smem:[#allocation70_spill]] }
0x3421   :  { %7466 = vrot.lane.b32.xlu1 %v12613_v12, %s11239_s14 }
0x3425   :  { %7544 = vrot.lane.b32.xlu1 %v12620_v22, %s11239_s14  ;;  %s12973_s14 = sld [smem:[#allocation72_spill]] }
0x3429   :  { %7464 = vrot.lane.b32.xlu1 %v12613_v12, %s11238_s8 }
0x3491   :  { %v7292_v40 = vpop.xlane.xlu0 %7291 }
0x3492   :  { %v7296_v61 = vsub.f32 %v7288_v56, %v7292_v40 }
0x3494   :  { %v7298_v50 = vmul.f32 1.442695, %v7296_v61 }
0x3495   :  { %v7295_v57 = vpop.xlane.xlu1 %7294  ;;  %v7389_v16 = vpop.permute.xlu0 %7388 }
0x3496   :  { %10819 = vpow2.f32 %v7298_v50  ;;  %v7297_v3 = vsub.f32 %v7289_v45, %v7295_v57  ;;  %10419 = vmatpush3.msra.mxu0 %v7389_v16 }
0x3497   :  { %10428 = vmatprep.subr.mxu0 %v11234_v26 }
0x3498   :  { %v7300_v53 = vmul.f32 1.442695, %v7297_v3 }
0x3499   :  { %v7313_v21 = vpop.permute.xlu1 %7312 }
0x349a   :  { %10821 = vpow2.f32 %v7300_v53  ;;  %10414 = vmatpush3.msra.mxu1 %v7313_v21 }
0x349b   :  { %10423 = vmatprep.subr.mxu1 %v11234_v26 }
0x349d   :  { %v7467_v8 = vpop.permute.xlu1 %7466 }
0x34a1   :  { %v7545_v33 = vpop.permute.xlu1 %7544 }
0x34a3   :  { %v10820_v25 = vpop.eup %10819 }
0x34a4   :  { %v7302_v62 = vsel %vm543_vm3, %v10820_v25, 0.0 }
0x34a5   :  { %7303 = vadd.xlane.f32.xlu1 %v7302_v62  ;;  %v7465_v24 = vpop.permute.xlu1 %7464 }
0x34a7   :  { %v10822_v58 = vpop.eup %10821 }
0x34a8   :  { %v7305_v6 = vsel %vm543_vm3, %v10822_v58, 0.0 }
0x34a9   :  { %7306 = vadd.xlane.f32.xlu1 %v7305_v6 }
0x34ba   :  { %7542 = vrot.lane.b32.xlu1 %v12620_v22, %s11238_s8  ;;  %s12972_s8 = sld [smem:[#allocation71_spill]] }
0x352e   :  { %v7304_v17 = vpop.xlane.xlu1 %7303 }
0x352f   :  { %10823 = vrcp.f32 %v7304_v17 }
0x3532   :  { %v7307_v7 = vpop.xlane.xlu1 %7306 }
0x3533   :  { %10825 = vrcp.f32 %v7307_v7 }
0x3536   :  { %v7543_v23 = vpop.permute.xlu1 %7542 }
0x353c   :  { %v10824_v11 = vpop.eup %10823 }
0x353d   :  { %v7309_v31 = vmul.f32 %v10824_v11, %v10820_v25 }
0x353f   :  { %10416 = vmatmul.mubr.msk.f32.vlgmr.msra.gmra.mxu1 %vm543_vm3, %v7309_v31 }
0x3540   :  { %v10826_v15 = vpop.eup %10825  ;;  %10424 = vmatpush3.xpose.msk.msra.mxu1 %vm543_vm3, %v7467_v8  ;;  %10425 = vmatprep.mubr.msk.f32.mxu1 %vm11235_vm2, %v11234_v26 }
0x3541   :  { %v7311_v4 = vmul.f32 %v10826_v15, %v10822_v58  ;;  %10433 = vmatprep.subr.mxu1 %v11234_v26 }
0x3543   :  { %10421 = vmatmul.mubr.msk.f32.vlgmr.msra.gmra.mxu0 %vm543_vm3, %v7311_v4  ;;  %10426 = vmatmul.mubr.msk.f32.vlgmr.msra.gmra.mxu1 %vm543_vm3, %v7465_v24 }
0x3544   :  { %10429 = vmatpush3.xpose.msk.msra.mxu0 %vm543_vm3, %v7545_v33  ;;  %10430 = vmatprep.mubr.msk.f32.mxu0 %vm11235_vm2, %v11234_v26 }
0x3545   :  { %10438 = vmatprep.subr.mxu0 %v11234_v26  ;;  %10435 = vmatprep.mubr.msk.f32.mxu1 %vm11235_vm2, %v11234_v26 }
0x3547   :  { %10431 = vmatmul.mubr.msk.f32.vlgmr.msra.gmra.mxu0 %vm543_vm3, %v7543_v23 }
0x3548   :  { %10440 = vmatprep.mubr.msk.f32.mxu0 %vm11235_vm2, %v11234_v26 }
0x35ff   :  { %v12670_v20 = vpop.f32.mrf.mxu1 }
0x3601   :  { %v10417_v28 = vpop.f32.mrf.mxu1 }
0x3603   :  { %v12672_v46 = vpop.f32.mrf.mxu0  ;;  %v7538_v47 = vpop.f32.mrf.mxu1 }
0x3604   :  { %v7620_v34 = vmul.f32 0.35355338, %v7538_v47 }
0x3605   :  { %v10422_v29 = vpop.f32.mrf.mxu0  ;;  %v10427_v52 = vpop.f32.mrf.mxu1 }
0x3606   :  { %v7622_v38 = vsel %vm543_vm3, %v7620_v34, -inf }
0x3607   :  { %7623 = vmax.xlane.f32.xlu1 %v7622_v38  ;;  %v7616_v42 = vpop.f32.mrf.mxu0 }
0x3608   :  { %v7621_v2 = vmul.f32 0.35355338, %v7616_v42 }
0x3609   :  { %v10432_v13 = vpop.f32.mrf.mxu0 }
0x360a   :  { %v7625_v41 = vsel %vm543_vm3, %v7621_v2, -inf }
0x360b   :  { %7626 = vmax.xlane.f32.xlu0 %v7625_v41 }
0x3618   :  { %7720 = vrot.lane.b32.xlu1 %v12620_v22, %s11240_s12 }
0x361c   :  { %7798 = vrot.lane.b32.xlu1 %v12613_v12, %s11242_s30 }
0x3621   :  { %7644 = vrot.lane.b32.xlu0 %v12613_v12, %s11240_s12  ;;  %s11251_s12 = smov [#allocation18]  }
0x3690   :  { %v7624_v43 = vpop.xlane.xlu1 %7623 }
0x3691   :  { %v7628_v44 = vsub.f32 %v7620_v34, %v7624_v43 }
0x3693   :  { %v7630_v51 = vmul.f32 1.442695, %v7628_v44 }
0x3694   :  { %v7721_v54 = vpop.permute.xlu1 %7720  ;;  %v7627_v55 = vpop.xlane.xlu0 %7626 }
0x3695   :  { %10827 = vpow2.f32 %v7630_v51  ;;  %v7629_v56 = vsub.f32 %v7621_v2, %v7627_v55  ;;  %10439 = vmatpush3.msra.mxu0 %v7721_v54 }
0x3696   :  { %10448 = vmatprep.subr.mxu0 %v11234_v26 }
0x3697   :  { %v7632_v59 = vmul.f32 1.442695, %v7629_v56 }
0x3698   :  { %v7645_v60 = vpop.permute.xlu0 %7644  ;;  %v7799_v40 = vpop.permute.xlu1 %7798 }
0x3699   :  { %10829 = vpow2.f32 %v7632_v59  ;;  %10434 = vmatpush3.msra.mxu1 %v7645_v60 }
0x369a   :  { %10443 = vmatprep.subr.mxu1 %v11234_v26 }
0x36a2   :  { %v10828_v35 = vpop.eup %10827 }
0x36a3   :  { %v7634_v45 = vsel %vm543_vm3, %v10828_v35, 0.0 }
0x36a4   :  { %7635 = vadd.xlane.f32.xlu0 %v7634_v45 }
0x36a6   :  { %v10830_v27 = vpop.eup %10829 }
0x36a7   :  { %v7637_v14 = vsel %vm543_vm3, %v10830_v27, 0.0 }
0x36a8   :  { %7638 = vadd.xlane.f32.xlu1 %v7637_v14 }
0x36b9   :  { %7796 = vrot.lane.b32.xlu1 %v12613_v12, %s11241_s27 }
0x36ba   :  { %7876 = vrot.lane.b32.xlu0 %v12620_v22, %s11242_s30  ;;  %s11252_s30 = smov [#allocation21]  }
0x36be   :  { %7874 = vrot.lane.b32.xlu0 %v12620_v22, %s11241_s27  ;;  %s9232_s27 = sshll.u32 %s11251_s12, 4  ;;  %s9233_s27 = int_to_ptr.vmem [resolvable:$true] %s9232_s27 }
0x36bf   :  { %p11034_p13 = scmp.lt.s32.totalorder %s9233_s27, %s9233_s27 }
0x372d   :  { %v7636_v61 = vpop.xlane.xlu0 %7635 }
0x372e   :  { %10831 = vrcp.f32 %v7636_v61 }
0x3731   :  { %v7639_v50 = vpop.xlane.xlu1 %7638  ;;  %v7877_v53 = vpop.permute.xlu0 %7876 }
0x3732   :  { %10833 = vrcp.f32 %v7639_v50 }
0x3735   :  { %v7797_v25 = vpop.permute.xlu1 %7796  ;;  %v7875_v62 = vpop.permute.xlu0 %7874 }
0x373b   :  { %v10832_v57 = vpop.eup %10831 }
0x373c   :  { %v7641_v16 = vmul.f32 %v10832_v57, %v10828_v35 }
0x373e   :  { %10436 = vmatmul.mubr.msk.f32.vlgmr.msra.gmra.mxu1 %vm543_vm3, %v7641_v16 }
0x373f   :  { %v10834_v3 = vpop.eup %10833  ;;  %10444 = vmatpush3.xpose.msk.msra.mxu1 %vm543_vm3, %v7799_v40  ;;  %10445 = vmatprep.mubr.msk.f32.mxu1 %vm11235_vm2, %v11234_v26 }
0x3740   :  { %v7643_v21 = vmul.f32 %v10834_v3, %v10830_v27  ;;  %10453 = vmatprep.subr.mxu1 %v11234_v26 }
0x3742   :  { %10441 = vmatmul.mubr.msk.f32.vlgmr.msra.gmra.mxu0 %vm543_vm3, %v7643_v21  ;;  %10446 = vmatmul.mubr.msk.f32.vlgmr.msra.gmra.mxu1 %vm543_vm3, %v7797_v25 }
0x3743   :  { %10449 = vmatpush3.xpose.msk.msra.mxu0 %vm543_vm3, %v7877_v53  ;;  %10450 = vmatprep.mubr.msk.f32.mxu0 %vm11235_vm2, %v11234_v26 }
0x3744   :  { %10458 = vmatprep.subr.mxu0 %v11234_v26  ;;  %10455 = vmatprep.mubr.msk.f32.mxu1 %vm11235_vm2, %v11234_v26 }
0x3746   :  { %10451 = vmatmul.mubr.msk.f32.vlgmr.msra.gmra.mxu0 %vm543_vm3, %v7875_v62 }
0x3747   :  { %10460 = vmatprep.mubr.msk.f32.mxu0 %vm11235_vm2, %v11234_v26 }
0x37fe   :  { %v12708_v58 = vpop.f32.mrf.mxu1 }
0x3800   :  { %v10437_v6 = vpop.f32.mrf.mxu1 }
0x3802   :  { %v12710_v8 = vpop.f32.mrf.mxu0  ;;  %v7870_v33 = vpop.f32.mrf.mxu1 }
0x3803   :  { %v7952_v24 = vmul.f32 0.35355338, %v7870_v33 }
0x3804   :  { %v10442_v17 = vpop.f32.mrf.mxu0  ;;  %v10447_v7 = vpop.f32.mrf.mxu1 }
0x3805   :  { %v7954_v11 = vsel %vm543_vm3, %v7952_v24, -inf }
0x3806   :  { %7955 = vmax.xlane.f32.xlu1 %v7954_v11  ;;  %v7948_v31 = vpop.f32.mrf.mxu0 }
0x3807   :  { %v7953_v15 = vmul.f32 0.35355338, %v7948_v31 }
0x3808   :  { %v10452_v4 = vpop.f32.mrf.mxu0 }
0x3809   :  { %v7957_v23 = vsel %vm543_vm3, %v7953_v15, -inf }
0x380a   :  { %7958 = vmax.xlane.f32.xlu0 %v7957_v23 }
0x3817   :  { %8052 = vrot.lane.b32.xlu1 %v12620_v22, %s11243_s20 }
0x381b   :  { %8130 = vrot.lane.b32.xlu1 %v12613_v12, %s11245_s16 }
0x3820   :  { %7976 = vrot.lane.b32.xlu0 %v12613_v12, %s11243_s20  ;;  %s9256_s20 = sshll.u32 %s11252_s30, 4  ;;  %s9257_s20 = int_to_ptr.vmem [resolvable:$true] %s9256_s20 }
0x388f   :  { %v7956_v28 = vpop.xlane.xlu1 %7955 }
0x3890   :  { %v7960_v47 = vsub.f32 %v7952_v24, %v7956_v28 }
0x3892   :  { %v7962_v34 = vmul.f32 1.442695, %v7960_v47 }
0x3893   :  { %v8053_v29 = vpop.permute.xlu1 %8052  ;;  %v7959_v52 = vpop.xlane.xlu0 %7958 }
0x3894   :  { %10835 = vpow2.f32 %v7962_v34  ;;  %v7961_v38 = vsub.f32 %v7953_v15, %v7959_v52  ;;  %10459 = vmatpush3.msra.mxu0 %v8053_v29 }
0x3895   :  { %10468 = vmatprep.subr.mxu0 %v11234_v26 }
0x3896   :  { %v7964_v42 = vmul.f32 1.442695, %v7961_v38 }
0x3897   :  { %v7977_v2 = vpop.permute.xlu0 %7976  ;;  %v8131_v51 = vpop.permute.xlu1 %8130 }
0x3898   :  { %10837 = vpow2.f32 %v7964_v42  ;;  %10454 = vmatpush3.msra.mxu1 %v7977_v2  ;;  %v7031_v42 = vld [vmem:[%s12970_s17 + $0x18] sm:$0xff]  ;;  %v7030_v2 = vld [vmem:[%s12970_s17 + $0x10] sm:$0xff] }
0x3899   :  { %10463 = vmatprep.subr.mxu1 %v11234_v26 }
0x38a1   :  { %v10836_v13 = vpop.eup %10835 }
0x38a2   :  { %v7966_v41 = vsel %vm543_vm3, %v10836_v13, 0.0 }
0x38a3   :  { %7967 = vadd.xlane.f32.xlu0 %v7966_v41 }
0x38a5   :  { %v10838_v43 = vpop.eup %10837 }
0x38a6   :  { %v7969_v44 = vsel %vm543_vm3, %v10838_v43, 0.0 }
0x38a7   :  { %7970 = vadd.xlane.f32.xlu1 %v7969_v44 }
0x38b8   :  { %8128 = vrot.lane.b32.xlu1 %v12613_v12, %s11244_s13 }
0x38b9   :  { %8208 = vrot.lane.b32.xlu0 %v12620_v22, %s11245_s16 }
0x38bd   :  { %8206 = vrot.lane.b32.xlu0 %v12620_v22, %s11244_s13  ;;  %s11029_s13 = scalar_lea.vmem %s9233_s27, 256 }
0x38be   :  { %p11030_p12 = scmp.ne.s32.totalorder %s9233_s27, %s11029_s13  ;;  %p11035_p0 = scmp.lt.s32.totalorder %s11029_s13, %s11029_s13 }
0x38c0   :  { %p11036_p1 = por %p11035_p0, %p11034_p13 }
0x38c2   :  { %p11037_p2 = pnand %p11036_p1, %p11030_p12 }
0x392c   :  { %v7968_v54 = vpop.xlane.xlu0 %7967 }
0x392d   :  { %10839 = vrcp.f32 %v7968_v54 }
0x3930   :  { %v7971_v55 = vpop.xlane.xlu1 %7970  ;;  %v8209_v35 = vpop.permute.xlu0 %8208 }
0x3931   :  { %10841 = vrcp.f32 %v7971_v55 }
0x3934   :  { %v8129_v27 = vpop.permute.xlu1 %8128  ;;  %v8207_v14 = vpop.permute.xlu0 %8206 }
0x393a   :  { %v10840_v56 = vpop.eup %10839 }
0x393b   :  { %v7973_v59 = vmul.f32 %v10840_v56, %v10836_v13  ;;  %v7028_v13 = vld [vmem:[%s12970_s17] sm:$0xff] }
0x393d   :  { %10456 = vmatmul.mubr.msk.f32.vlgmr.msra.gmra.mxu1 %vm543_vm3, %v7973_v59 }
0x393e   :  { %v10842_v60 = vpop.eup %10841  ;;  %10464 = vmatpush3.xpose.msk.msra.mxu1 %vm543_vm3, %v8131_v51  ;;  %10465 = vmatprep.mubr.msk.f32.mxu1 %vm11235_vm2, %v11234_v26 }
0x393f   :  { %v7975_v45 = vmul.f32 %v10842_v60, %v10838_v43  ;;  %10473 = vmatprep.subr.mxu1 %v11234_v26 }
0x3941   :  { %10461 = vmatmul.mubr.msk.f32.vlgmr.msra.gmra.mxu0 %vm543_vm3, %v7975_v45  ;;  %10466 = vmatmul.mubr.msk.f32.vlgmr.msra.gmra.mxu1 %vm543_vm3, %v8129_v27 }
0x3942   :  { %10469 = vmatpush3.xpose.msk.msra.mxu0 %vm543_vm3, %v8209_v35  ;;  %10470 = vmatprep.mubr.msk.f32.mxu0 %vm11235_vm2, %v11234_v26 }
0x3943   :  { %10478 = vmatprep.subr.mxu0 %v11234_v26  ;;  %10475 = vmatprep.mubr.msk.f32.mxu1 %vm11235_vm2, %v11234_v26 }
0x3945   :  { %10471 = vmatmul.mubr.msk.f32.vlgmr.msra.gmra.mxu0 %vm543_vm3, %v8207_v14 }
0x3946   :  { %10480 = vmatprep.mubr.msk.f32.mxu0 %vm11235_vm2, %v11234_v26 }
0x39fd   :  { %v8048_v40 = vpop.f32.mrf.mxu1 }
0x39ff   :  { %v10457_v61 = vpop.f32.mrf.mxu1 }
0x3a01   :  { %v8124_v50 = vpop.f32.mrf.mxu0  ;;  %v8202_v57 = vpop.f32.mrf.mxu1 }
0x3a02   :  { %v8284_v16 = vmul.f32 0.35355338, %v8202_v57 }
0x3a03   :  { %v10462_v3 = vpop.f32.mrf.mxu0  ;;  %v10467_v53 = vpop.f32.mrf.mxu1 }
0x3a04   :  { %v8286_v21 = vsel %vm543_vm3, %v8284_v16, -inf }
0x3a05   :  { %8287 = vmax.xlane.f32.xlu1 %v8286_v21  ;;  %v8280_v25 = vpop.f32.mrf.mxu0 }
0x3a06   :  { %v8285_v62 = vmul.f32 0.35355338, %v8280_v25 }
0x3a07   :  { %v10472_v6 = vpop.f32.mrf.mxu0 }
0x3a08   :  { %v8289_v33 = vsel %vm543_vm3, %v8285_v62, -inf }
0x3a09   :  { %8290 = vmax.xlane.f32.xlu0 %v8289_v33 }
0x3a8e   :  { %v8288_v24 = vpop.xlane.xlu1 %8287 }
0x3a8f   :  { %v8292_v17 = vsub.f32 %v8284_v16, %v8288_v24 }
0x3a91   :  { %v8294_v7 = vmul.f32 1.442695, %v8292_v17 }
0x3a92   :  { %v8291_v11 = vpop.xlane.xlu0 %8290 }
0x3a93   :  { %10843 = vpow2.f32 %v8294_v7  ;;  %v8293_v31 = vsub.f32 %v8285_v62, %v8291_v11 }
0x3a95   :  { %v8296_v15 = vmul.f32 1.442695, %v8293_v31 }
0x3a97   :  { %10845 = vpow2.f32 %v8296_v15 }
0x3aa0   :  { %v10844_v4 = vpop.eup %10843 }
0x3aa1   :  { %v8298_v23 = vsel %vm543_vm3, %v10844_v4, 0.0 }
0x3aa2   :  { %8299 = vadd.xlane.f32.xlu0 %v8298_v23 }
0x3aa4   :  { %v10846_v28 = vpop.eup %10845 }
0x3aa5   :  { %v8301_v47 = vsel %vm543_vm3, %v10846_v28, 0.0 }
0x3aa6   :  { %8302 = vadd.xlane.f32.xlu1 %v8301_v47 }
0x3ab7   :  { %8384 = vrot.lane.b32.xlu1 %v12620_v22, %s11246_s21 }
0x3ab8   :  { %8308 = vrot.lane.b32.xlu0 %v12613_v12, %s11246_s21 }
0x3abb   :  { %8462 = vrot.lane.b32.xlu1 %v12708_v58, %s11247_s0 }
0x3abc   :  { %8464 = vrot.lane.b32.xlu0 %v12710_v8, %s11247_s0 }
0x3abf   :  { %8470 = vrot.lane.b32.xlu1 %v8048_v40, %s11248_s6 }
0x3ac0   :  { %8472 = vrot.lane.b32.xlu0 %v8124_v50, %s11248_s6 }
0x3b2b   :  { %v8300_v34 = vpop.xlane.xlu0 %8299 }
0x3b2c   :  { %10847 = vrcp.f32 %v8300_v34 }
0x3b2f   :  { %v8303_v29 = vpop.xlane.xlu1 %8302  ;;  %v8309_v52 = vpop.permute.xlu0 %8308 }
0x3b30   :  { %10849 = vrcp.f32 %v8303_v29  ;;  %10474 = vmatpush3.msra.mxu1 %v8309_v52 }
0x3b31   :  { %10483 = vmatprep.subr.mxu1 %v7031_v42 }
0x3b33   :  { %v8385_v22 = vpop.permute.xlu1 %8384  ;;  %v8465_v44 = vpop.permute.xlu0 %8464 }
0x3b34   :  { %10479 = vmatpush3.msra.mxu0 %v8385_v22  ;;  %v8485_v35 = vsel %vm543_vm3, %v12672_v46, %v8465_v44 }
0x3b35   :  { %10494 = vmatprep.subr.mxu0 %v12517_v63 }
0x3b37   :  { %v8463_v43 = vpop.permute.xlu1 %8462  ;;  %v8473_v55 = vpop.permute.xlu0 %8472 }
0x3b38   :  { %v8484_v54 = vsel %vm543_vm3, %v12670_v20, %v8463_v43  ;;  %v8487_v45 = vsel %vm1899_vm8, %v8485_v35, %v8473_v55  ;;  %v9529_v20 = vld [vmem:[#allocation9] ss:$0 sm:$0xff] }
0x3b39   :  { %v10848_v12 = vpop.eup %10847 }
0x3b3a   :  { %v8305_v58 = vmul.f32 %v10848_v12, %v10844_v4 }
0x3b3b   :  { %v8471_v51 = vpop.permute.xlu1 %8470 }
0x3b3c   :  { %10476 = vmatmul.mubr.msk.f32.vlgmr.msra.gmra.mxu1 %vm543_vm3, %v8305_v58  ;;  %v8486_v56 = vsel %vm1899_vm8, %v8484_v54, %v8471_v51 }
0x3b3d   :  { %v10850_v8 = vpop.eup %10849  ;;  %10484 = vmatpush3.msra.mxu1 %v7031_v42 }
0x3b3e   :  { %v8307_v38 = vmul.f32 %v10850_v8, %v10846_v28  ;;  %10485 = vmatprep.subr.mxu1 %v7030_v2 }
0x3b3f   :  { %10486 = vmatpush3.msra.mxu1 %v7030_v2 }
0x3b40   :  { %10481 = vmatmul.mubr.msk.f32.vlgmr.msra.gmra.mxu0 %vm543_vm3, %v8307_v38 }
0x3b41   :  { %10495 = vmatpush3.msra.mxu0 %v12517_v63  ;;  %v7029_v63 = vld [vmem:[%s12970_s17 + $0x8] sm:$0xff] }
0x3b42   :  { %10496 = vmatprep.subr.mxu0 %v12522_v39  ;;  %10487 = vmatprep.subr.mxu1 %v7029_v63 }
0x3b43   :  { %10497 = vmatpush3.msra.mxu0 %v12522_v39  ;;  %10488 = vmatpush3.msra.mxu1 %v7029_v63 }
0x3b44   :  { %10498 = vmatprep.subr.mxu0 %v12526_v0  ;;  %10489 = vmatprep.subr.mxu1 %v7028_v13 }
0x3b45   :  { %10499 = vmatpush3.msra.mxu0 %v12526_v0  ;;  %10490 = vmatpush3.msra.mxu1 %v7028_v13 }
0x3b46   :  { %10500 = vmatprep.subr.mxu0 %v12531_v1  ;;  %10505 = vmatprep.subr.mxu1 %v11234_v26 }
0x3b47   :  { %10501 = vmatpush3.msra.mxu0 %v12531_v1 }
0x3b48   :  { %10510 = vmatprep.subr.mxu0 %v11234_v26 }
0x3bfc   :  { %v8380_v39 = vpop.f32.mrf.mxu1 }
0x3bfd   :  { %8478 = vrot.lane.b32.xlu1 %v8380_v39, %s11249_s2 }
0x3bfe   :  { %v10477_v0 = vpop.f32.mrf.mxu1 }
0x3c00   :  { %v8456_v1 = vpop.f32.mrf.mxu0 }
0x3c01   :  { %8480 = vrot.lane.b32.xlu0 %v8456_v1, %s11249_s2 }
0x3c02   :  { %v10482_v41 = vpop.f32.mrf.mxu0 }
0x3c6f   :  { %v8479_v59 = vpop.permute.xlu1 %8478 }
0x3c70   :  { %v8488_v60 = vsel %vm342_vm0, %v8486_v56, %v8479_v59 }
0x3c71   :  { %10491 = vmatprep.mubr.msk.f32.mxu1 %vm458_vm1, %v8488_v60 }
0x3c73   :  { %v8481_v27 = vpop.permute.xlu0 %8480 }
0x3c74   :  { %v8489_v14 = vsel %vm342_vm0, %v8487_v45, %v8481_v27 }
0x3c75   :  { %10492 = vmatmul.mubr.msk.f32.vlgmr.msra.gmra.mxu1 %vm458_vm1, %v8489_v14 }
0x3c76   :  { %10507 = vmatprep.mubr.msk.f32.mxu1 %vm11235_vm2, %v11234_v26 }
0x3d35   :  { %v10493_v40 = vpop.f32.mrf.mxu1 }
0x3d36   :  { %v8574_v61 = vadd.f32 %v10493_v40, %v9529_v20 }
0x3d37   :  { %v8568_v50 = vpop.f32.mrf.mxu1 }
0x3d38   :  { %v8578_v57 = vadd.f32 %v8574_v61, %v12598_v19  ;;  %v8569_v16 = vadd.f32 %v9529_v20, %v8568_v50 }
0x3d3a   :  { %v8577_v3 = vadd.f32 %v8569_v16, %v12596_v32  ;;  %v8582_v46 = vsel %vm458_vm1, %v8578_v57, 0.0 }
0x3d3b   :  { %8583 = vadd.xlane.f32.xlu0 %v8582_v46 }
0x3d3c   :  { %v8579_v53 = vsel %vm458_vm1, %v8577_v3, 0.0 }
0x3d3d   :  { %8580 = vadd.xlane.f32.xlu1 %v8579_v53 }
0x3dc4   :  { %v8584_v21 = vpop.xlane.xlu0 %8583 }
0x3dc5   :  { %v8586_v25 = vmul.f32 0.03125, %v8584_v21 }
0x3dc6   :  { %v8581_v62 = vpop.xlane.xlu1 %8580 }
0x3dc7   :  { %v8588_v6 = vsub.f32 %v8578_v57, %v8586_v25  ;;  %v8585_v33 = vmul.f32 0.03125, %v8581_v62 }
0x3dc9   :  { %v8587_v24 = vsub.f32 %v8577_v3, %v8585_v33  ;;  %v8590_v17 = vmul.f32 %v8588_v6, %v8588_v6 }
0x3dcb   :  { %v8594_v7 = vsel %vm458_vm1, %v8590_v17, 0.0  ;;  %v8589_v11 = vmul.f32 %v8587_v24, %v8587_v24 }
0x3dcc   :  { %8595 = vadd.xlane.f32.xlu1 %v8594_v7 }
0x3dcd   :  { %v8591_v19 = vsel %vm458_vm1, %v8589_v11, 0.0  ;;  %v8971_v11 = vld [vmem:[%s12971_s3 + $0x18] sm:$0xff] }
0x3dce   :  { %8592 = vadd.xlane.f32.xlu0 %v8591_v19 }
0x3e55   :  { %v8596_v32 = vpop.xlane.xlu1 %8595 }
0x3e56   :  { %v8598_v31 = vmul.f32 0.03125, %v8596_v32  ;;  %v8969_v32 = vld [vmem:[%s12971_s3 + $0x8] sm:$0xff] }
0x3e57   :  { %v8593_v15 = vpop.xlane.xlu0 %8592 }
0x3e58   :  { %v8600_v4 = vadd.f32 1e-05, %v8598_v31  ;;  %v8597_v23 = vmul.f32 0.03125, %v8593_v15  ;;  %v8975_v31 = vld [vmem:[%s12972_s8 + $0x18] sm:$0xff]  ;;  %v8968_v15 = vld [vmem:[%s12971_s3] sm:$0xff] }
0x3e5a   :  { %10851 = vrsqrt.f32 %v8600_v4  ;;  %v8599_v28 = vadd.f32 1e-05, %v8597_v23  ;;  %v8973_v23 = vld [vmem:[%s12972_s8 + $0x8] sm:$0xff] }
0x3e5c   :  { %10853 = vrsqrt.f32 %v8599_v28  ;;  %v8972_v28 = vld [vmem:[%s12972_s8] sm:$0xff] }
0x3e67   :  { %v10852_v47 = vpop.eup %10851 }
0x3e68   :  { %v8604_v34 = vmul.f32 %v10852_v47, %v8588_v6 }
0x3e69   :  { %v10854_v29 = vpop.eup %10853 }
0x3e6a   :  { %v8603_v52 = vmul.f32 %v10854_v29, %v8587_v24  ;;  %v8606_v22 = vmul.f32 %v12538_v5, %v8604_v34 }
0x3e6c   :  { %v8605_v12 = vmul.f32 %v12538_v5, %v8603_v52  ;;  %v8608_v8 = vadd.f32 %v12542_v9, %v8606_v22 }
0x3e6e   :  { %v8607_v58 = vadd.f32 %v12542_v9, %v8605_v12 }
0x3e70   :  { %10502 = vmatprep.mubr.msk.f32.mxu0 %vm458_vm1, %v8607_v58  ;;  %10506 = vmatpush3.msra.mxu1 %v8607_v58 }
0x3e71   :  { %10503 = vmatmul.mubr.msk.f32.vlgmr.msra.gmra.mxu0 %vm458_vm1, %v8608_v8  ;;  %10515 = vmatprep.subr.mxu1 %v11234_v26 }
0x3e72   :  { %10511 = vmatpush3.msra.mxu0 %v8608_v8  ;;  %10512 = vmatprep.mubr.msk.f32.mxu0 %vm11235_vm2, %v11234_v26  ;;  %v9134_v8 = vld [vmem:[%s12973_s14 + $0x18] sm:$0xff] }
0x3e73   :  { %10526 = vmatprep.subr.mxu0 %v11234_v26 }
0x3f31   :  { %v10504_v38 = vpop.f32.mrf.mxu0 }
0x3f32   :  { %v8698_v5 = vadd.f32 %v10504_v38, %v12552_v10  ;;  %v9133_v38 = vld [vmem:[%s12973_s14 + $0x10] sm:$0xff] }
0x3f33   :  { %v8692_v42 = vpop.f32.mrf.mxu0 }
0x3f34   :  { %10855 = vtanh.f32 %v8698_v5  ;;  %v8693_v9 = vadd.f32 %v12552_v10, %v8692_v42  ;;  %v9132_v5 = vld [vmem:[%s12973_s14 + $0x8] sm:$0xff]  ;;  %v9131_v42 = vld [vmem:[%s12973_s14] sm:$0xff] }
0x3f36   :  { %10857 = vtanh.f32 %v8693_v9 }
0x3f41   :  { %v10856_v2 = vpop.eup %10855 }
0x3f42   :  { %v8711_v63 = vmul.f32 %v10856_v2, %v12556_v18  ;;  %v9541_v2 = vld [vmem:[#allocation14] ss:$0 sm:$0xff] }
0x3f43   :  { %v10858_v13 = vpop.eup %10857 }
0x3f44   :  { %v8715_v39 = vsel %vm458_vm1, %v8711_v63, 0.0  ;;  %v8710_v0 = vmul.f32 %v10858_v13, %v12556_v18 }
0x3f45   :  { %8716 = vadd.xlane.f32.xlu1 %v8715_v39 }
0x3f46   :  { %v8712_v1 = vsel %vm458_vm1, %v8710_v0, 0.0 }
0x3f47   :  { %8713 = vadd.xlane.f32.xlu0 %v8712_v1 }
0x3f5d   :  { %8725 = vperm.xlu0 %10639, %v12562_v36  }
0x3fce   :  { %v8717_v43 = vpop.xlane.xlu1 %8716 }
0x3fd0   :  { %v8714_v41 = vpop.xlane.xlu0 %8713 }
0x3fd8   :  { %v8726_v44 = vpop.permute.xlu0 %8725 }
0x3fd9   :  { %v8728_v51 = vadd.f32 %v8726_v44, %v8714_v41  ;;  %v8729_v10 = vadd.f32 %v8726_v44, %v8717_v43 }
0x3fdb   :  { %v8735_v54 = vrot.slane %v8728_v51, %v12567_v37  ;;  %v8739_v55 = vrot.slane %v8729_v10, %v12567_v37 }
0x3fdd   :  { %v8740_v56 = vsel %vm6796_vm11, %v8739_v55, %v8735_v54 }
0x3fde   :  { %v8742_v59 = vsel %vm6799_vm12, %v8740_v56, -inf }
0x3fdf   :  { %8743 = vmax.xlane.f32.xlu1 %v8742_v59 }
0x4068   :  { %v8744_v18 = vpop.xlane.xlu1 %8743 }
0x4069   :  { %v8749_v60 = vrot.slane %v8744_v18, %v11877_v30  ;;  %v8753_v35 = vrot.slane %v8744_v18, %v12574_v48 }
0x406b   :  { %v8756_v36 = vsub.f32 %v8728_v51, %v8749_v60  ;;  %v8757_v45 = vsub.f32 %v8729_v10, %v8753_v35 }
0x406d   :  { %v8758_v27 = vmul.f32 1.442695, %v8756_v36  ;;  %v8760_v14 = vmul.f32 1.442695, %v8757_v45 }
0x406f   :  { %10859 = vpow2.f32 %v8758_v27 }
0x4070   :  { %10861 = vpow2.f32 %v8760_v14 }
0x407c   :  { %v10860_v20 = vpop.eup %10859 }
0x407d   :  { %v10862_v40 = vpop.eup %10861  ;;  %8765 = vperm.xlu1 %10640, %v10860_v20  }
0x407e   :  { %8768 = vperm.xlu0 %10639, %v10862_v40  }
0x40f8   :  { %v8766_v61 = vpop.permute.xlu1 %8765 }
0x40f9   :  { %v8769_v50 = vpop.permute.xlu0 %8768  ;;  %v8773_v57 = vrot.slane %v8766_v61, %v12567_v37 }
0x40fa   :  { %v8777_v16 = vrot.slane %v8769_v50, %v12567_v37 }
0x40fc   :  { %v8778_v3 = vsel %vm6796_vm11, %v8777_v16, %v8773_v57 }
0x40fd   :  { %v8780_v46 = vsel %vm6799_vm12, %v8778_v3, 0.0 }
0x40fe   :  { %8781 = vadd.xlane.f32.xlu1 %v8780_v46 }
0x4187   :  { %v8782_v53 = vpop.xlane.xlu1 %8781 }
0x4188   :  { %v8791_v21 = vrot.slane %v8782_v53, %v12574_v48  ;;  %v8787_v25 = vrot.slane %v8782_v53, %v11877_v30  ;;  %v8970_v48 = vld [vmem:[%s12971_s3 + $0x10] sm:$0xff] }
0x418a   :  { %10863 = vrcp.f32 %v8791_v21 }
0x418b   :  { %10865 = vrcp.f32 %v8787_v25 }
0x4197   :  { %v10864_v62 = vpop.eup %10863 }
0x4198   :  { %v8797_v6 = vmul.f32 %v10864_v62, %v10862_v40  ;;  %v10866_v33 = vpop.eup %10865 }
0x4199   :  { %v8795_v24 = vmul.f32 %v10866_v33, %v10860_v20 }
0x419a   :  { %8880 = vperm.xlu0 %10639, %v8797_v6  }
0x419e   :  { %8800 = vperm.xlu0 %10639, %v8795_v24  }
0x4215   :  { %v8881_v17 = vpop.permute.xlu0 %8880 }
0x4216   :  { %v8885_v7 = vrot.slane %v8881_v17, %v12567_v37 }
0x4218   :  { %10513 = vmatmul.mubr.msk.f32.vlgmr.msra.gmra.mxu0 %vm543_vm3, %v8885_v7 }
0x4219   :  { %10527 = vmatpush3.msra.mxu0 %v8971_v11  ;;  %v8801_v30 = vpop.permute.xlu0 %8800  ;;  %10534 = vmatprep.mubr.msk.f32.mxu0 %vm11235_vm2, %v11234_v26 }
0x421a   :  { %10528 = vmatprep.subr.mxu0 %v11234_v26  ;;  %v8805_v19 = vrot.slane %v8801_v30, %v12567_v37  ;;  %v8974_v37 = vld [vmem:[%s12972_s8 + $0x10] sm:$0xff] }
0x421b   :  { %10529 = vmatpush3.msra.mxu0 %v8970_v48 }
0x421c   :  { %10530 = vmatprep.subr.mxu0 %v11234_v26  ;;  %10508 = vmatmul.mubr.msk.f32.vlgmr.msra.gmra.mxu1 %vm543_vm3, %v8805_v19  ;;  %v8965_v4 = vsel %vm6796_vm11, %v8885_v7, %v8805_v19 }
0x421d   :  { %10531 = vmatpush3.msra.mxu0 %v8969_v32  ;;  %10516 = vmatpush3.msra.mxu1 %v8975_v31  ;;  %8967 = vst.msk [vmem:[#allocation24] sm:$0x3] %vm6799_vm12, %v8965_v4 }
0x421e   :  { %10532 = vmatprep.subr.mxu0 %v11234_v26  ;;  %10517 = vmatprep.subr.mxu1 %v11234_v26 }
0x421f   :  { %10533 = vmatpush3.msra.mxu0 %v8968_v15  ;;  %10523 = vmatprep.mubr.msk.f32.mxu1 %vm11235_vm2, %v11234_v26 }
0x4220   :  { %10535 = vmatmul.mubr.msk.f32.vlgmr.msra.gmra.mxu0 %vm458_vm1, %v12618_v49  ;;  %10518 = vmatpush3.msra.mxu1 %v8974_v37 }
0x4221   :  { %10519 = vmatprep.subr.mxu1 %v11234_v26 }
0x4222   :  { %10520 = vmatpush3.msra.mxu1 %v8973_v23 }
0x4223   :  { %10521 = vmatprep.subr.mxu1 %v11234_v26 }
0x4224   :  { %10522 = vmatpush3.msra.mxu1 %v8972_v28 }
0x4225   :  { %10537 = vmatprep.subr.mxu1 %v11234_v26 }
0x42d8   :  { %v8954_v47 = vpop.f32.mrf.mxu0 }
0x42d9   :  { %v8959_v29 = vrot.slane %v8954_v47, 7 }
0x42da   :  { %v10514_v34 = vpop.f32.mrf.mxu0 }
0x42dc   :  { %v8874_v49 = vpop.f32.mrf.mxu1 }
0x42dd   :  { %v8961_v52 = vsel %vm7019_vm13, %v8874_v49, %v8959_v29 }
0x42de   :  { %v10509_v22 = vpop.f32.mrf.mxu1  ;;  %10524 = vmatmul.mubr.msk.f32.vlgmr.msra.gmra.mxu1 %vm458_vm1, %v8961_v52 }
0x42df   :  { %10545 = vmatprep.mubr.msk.f32.mxu1 %vm11235_vm2, %v11234_v26  ;;  %10538 = vmatpush3.msra.mxu1 %v9134_v8 }
0x42e0   :  { %v9118_v12 = vpop.f32.mrf.mxu0  ;;  %10539 = vmatprep.subr.mxu1 %v11234_v26 }
0x42e1   :  { %10540 = vmatpush3.msra.mxu1 %v9133_v38 }
0x42e2   :  { %v10536_v58 = vpop.f32.mrf.mxu0  ;;  %10541 = vmatprep.subr.mxu1 %v11234_v26 }
0x42e3   :  { %10542 = vmatpush3.msra.mxu1 %v9132_v5 }
0x42e4   :  { %10543 = vmatprep.subr.mxu1 %v11234_v26 }
0x42e5   :  { %10544 = vmatpush3.msra.mxu1 %v9131_v42 }
0x439e   :  { %v9045_v9 = vpop.f32.mrf.mxu1 }
0x439f   :  { %v9119_v63 = vadd.f32 %v9118_v12, %v9045_v9 }
0x43a0   :  { %v10525_v13 = vpop.f32.mrf.mxu1 }
0x43a1   :  { %v9129_v39 = vadd.f32 %v9541_v2, %v9119_v63 }
0x43a3   :  { %v9130_v0 = vmax.f32 %v9129_v39, 0.0 }
0x43a5   :  { %10546 = vmatmul.mubr.msk.f32.vlgmr.msra.gmra.mxu1 %vm458_vm1, %v9130_v0 }
0x43a6   :  { %11040 = shalt.err (!%p11037_p2)
}
0x43a7   :  { %s11253_s16 = smov 128   ;;  %s12974_s21 = sld [smem:[#allocation74_spill]] }
0x43a8   :  { %s11049_s6 = scalar_lea.vmem %s9257_s20, 256  ;;  %p11054_p4 = scmp.lt.s32.totalorder %s9257_s20, %s9257_s20 }
0x43a9   :  { %p11050_p3 = scmp.ne.s32.totalorder %s9257_s20, %s11049_s6  ;;  %p11055_p5 = scmp.lt.s32.totalorder %s11049_s6, %s11049_s6 }
0x43ab   :  { %p11056_p6 = por %p11055_p5, %p11054_p4 }
0x43ad   :  { %9238 = dma.vmem_to_hbm [thread:$0]  %s9233_s27, 256, %s12974_s21, [#allocation19], %s11253_s16, %s11253_s16, %s11247_s0  }
0x43ae   :  { %p11057_p7 = pnand %p11056_p6, %p11050_p3 }
0x43b0   :  { %11060 = shalt.err (!%p11057_p7)
}
0x43b1   :  { %9262 = dma.vmem_to_hbm [thread:$0]  %s9257_s20, 256, %s11544_s1, [#allocation22], %s11253_s16, %s11253_s16, %s11247_s0  }
0x43b2   :  { %s11254_s2 = smov [#allocation20]  }
0x43b3   :  { %s9244_s29 = sshll.u32 %s11254_s2, 4  ;;  %s9245_s29 = int_to_ptr.vmem [resolvable:$true] %s9244_s29 }
0x43b4   :  { %s11069_s9 = scalar_lea.vmem %s9245_s29, 256  ;;  %p11074_p9 = scmp.lt.s32.totalorder %s9245_s29, %s9245_s29 }
0x43b5   :  { %p11070_p8 = scmp.ne.s32.totalorder %s9245_s29, %s11069_s9  ;;  %p11075_p10 = scmp.lt.s32.totalorder %s11069_s9, %s11069_s9 }
0x43b7   :  { %p11076_p11 = por %p11075_p10, %p11074_p9 }
0x43b9   :  { %p11077_p12 = pnand %p11076_p11, %p11070_p8 }
0x43bb   :  { %11080 = shalt.err (!%p11077_p12)
}
0x43bc   :  { %9250 = dma.vmem_to_hbm [thread:$0]  %s9245_s29, 256, %s11539_s23, [#allocation19], %s11253_s16, %s11253_s16, %s11247_s0  }
0x43bd   :  { %s11255_s22 = smov [#allocation23]   ;;  %s11256_s4 = smov [#allocation24]  }
0x43be   :  { %s9269_s26 = sshll.u32 %s11255_s22, 4  ;;  %s9279_s25 = sshll.u32 %s11256_s4, 4  ;;  %s9270_s26 = int_to_ptr.vmem [resolvable:$true] %s9269_s26  ;;  %s9280_s25 = int_to_ptr.vmem [resolvable:$true] %s9279_s25 }
0x43bf   :  { %s11089_s28 = scalar_lea.vmem %s9270_s26, 32  ;;  %p11094_p0 = scmp.lt.s32.totalorder %s9270_s26, %s9270_s26 }
0x43c0   :  { %p11090_p13 = scmp.ne.s32.totalorder %s9270_s26, %s11089_s28  ;;  %p11095_p1 = scmp.lt.s32.totalorder %s11089_s28, %s11089_s28 }
0x43c2   :  { %p11096_p2 = por %p11095_p1, %p11094_p0 }
0x43c4   :  { %p11097_p3 = pnand %p11096_p2, %p11090_p13 }
0x43c6   :  { %11100 = shalt.err (!%p11097_p3)
}
0x43c7   :  { %9272 = dma.vmem_to_hbm [thread:$0]  %s9270_s26, 32, %s11549_s7, [#allocation22]  }
0x43c8   :  { %s11109_s1 = scalar_lea.vmem %s9280_s25, 32  ;;  %p11114_p5 = scmp.lt.s32.totalorder %s9280_s25, %s9280_s25 }
0x43c9   :  { %p11110_p4 = scmp.ne.s32.totalorder %s9280_s25, %s11109_s1  ;;  %p11115_p6 = scmp.lt.s32.totalorder %s11109_s1, %s11109_s1 }
0x43cb   :  { %p11116_p7 = por %p11115_p6, %p11114_p5 }
0x43cd   :  { %p11117_p8 = pnand %p11116_p7, %p11110_p4 }
0x43cf   :  { %11120 = shalt.err (!%p11117_p8)
}
0x43d0   :  { %9282 = dma.vmem_to_hbm [thread:$0]  %s9280_s25, 32, %s11554_s15, [#allocation25]   ;;  %v9542_v26 = vld [vmem:[#allocation15] ss:$0 sm:$0xff]  ;;  %vm9215_vm14 = vcmask 17408  }
0x43d1   :  { %s11257_s23 = smov [#allocation17]  }
0x43d2   :  { %s9223_s0 = sshll.u32 %s11257_s23, 4  ;;  %s9224_s0 = int_to_ptr.vmem [resolvable:$true] %s9223_s0 }
0x43d3   :  { %s11129_s7 = scalar_lea.vmem %s9224_s0, 32  ;;  %p11134_p10 = scmp.lt.s32.totalorder %s9224_s0, %s9224_s0 }
0x43d4   :  { %p11130_p9 = scmp.ne.s32.totalorder %s9224_s0, %s11129_s7  ;;  %p11135_p11 = scmp.lt.s32.totalorder %s11129_s7, %s11129_s7 }
0x43d6   :  { %p11136_p12 = por %p11135_p11, %p11134_p10 }
0x43d8   :  { %p11137_p13 = pnand %p11136_p12, %p11130_p9 }
0x4465   :  { %v9211_v1 = vpop.f32.mrf.mxu1 }
0x4466   :  { %v9212_v41 = vadd.f32 %v9542_v26, %v9211_v1 }
0x4467   :  { %v10547_v43 = vpop.f32.mrf.mxu1 }
0x4468   :  { %9216 = vst.msk [vmem:[#allocation17] sm:$0x3] %vm9215_vm14, %v9212_v41 }
0x4469   :  { %11140 = shalt.err (!%p11137_p13)
}
0x446a   :  { %s12975_s10 = sld [smem:[#allocation73_spill]] }
0x4470   :  { %9226 = dma.vmem_to_hbm [thread:$0]  %s9224_s0, 32, %s12975_s10, [#allocation5]  }
0x4471   :  { %11159 = dma.done.wait [#allocation5], 32  }
0x4472   :  { %11160 = vsyncadd [#allocation5], 4294967264 }
0x4473   :  { %11161 = dma.done.wait [#allocation19], 512  }
0x4474   :  { %11162 = vsyncadd [#allocation19], 4294966784 }
0x4475   :  { %11163 = dma.done.wait [#allocation22], 288  }
0x4476   :  { %11164 = vsyncadd [#allocation22], 4294967008 }
0x4477   :  { %11165 = dma.done.wait [#allocation25], 32  }
0x4478   :  { %11166 = vsyncadd [#allocation25], 4294967264 }
0x4479   :  { %9301 = vsyncpa [#allocation4], 1 }
0x447a   :  { %9302 = vsyncpa [#allocation7], 1 }
0x447b   :  { %9303 = vsyncpa [#allocation10], 1 }
0x447c   :  { %9304 = vsyncpa [#allocation13], 1 }
0x447d   :  { %9305 = vsyncpa [#allocation16], 1 }
0x447e   :  { %9306 = vsyncpa [#allocation5], 1 }
0x447f   :  { %9307 = vsyncpa [#allocation19], 1 }
0x4480   :  { %9308 = vsyncpa [#allocation22], 1 }
0x4481   :  { %9309 = vsyncpa [#allocation25], 1 }

</bundles_post_ra>
